<compile_context>
chip_gen: v6e
topology: v6e:2x2x1
jax: 0.10.0
libtpu: 0.0.40
codegen_flags: <defaults>
</compile_context>

<pallas_src>
import functools

import jax
import jax.numpy as jnp
from jax.experimental import pallas as pl
from jax.experimental.pallas import tpu as pltpu


# ----------------------------------------------------------------------------- helpers
_ROW_TILE_TARGET = 512
_VMEM_LIMIT = 64 * 1024 * 1024  # <= v7x physical (64 MiB); raises v5e/v6e scoped default.


def _round_up(x, m):
    return ((x + m - 1) // m) * m


def _pad_last(a, target):
    pad = [(0, 0)] * (a.ndim - 1) + [(0, target - a.shape[-1])]
    return jnp.pad(a, pad)


def _fold_bn(w, bn, eps=1e-5):
    """Fold inference-mode BatchNorm into conv-as-matmul weights (last dim = Cout)."""
    s = bn["gamma"] / jnp.sqrt(bn["var"] + eps)
    return w * s, bn["beta"] - bn["mean"] * s


def _row_plan(m):
    """Pick a row tile: multiple-of-8 divisor of m, <= 512, >= 2 grid steps when possible."""
    mp = _round_up(m, 8)
    cap = min(_ROW_TILE_TARGET, mp)
    if mp // cap < 2 and mp >= 16:
        cap = max(8, (mp // 2) // 8 * 8)
    t = cap - cap % 8
    while t >= 8:
        if mp % t == 0:
            return t, mp
        t -= 8
    return mp, mp


# ----------------------------------------------------------------------------- kernels
def _conv12_kernel(x_ref, w1_ref, b1_ref, w2_ref, b2_ref, o_ref, h1pad_ref, acc_ref,
                   *, H, W):
    """Fused conv1(1x1)+bn1+relu + conv2(3x3,pad=1)+bn2+relu for one image.

    x_ref:   (1, H, W, Cin)  bf16
    w1_ref:  (Cin, Cp) bf16   b1_ref: (1, Cp) f32
    w2_ref:  (9, Cp, Cp) bf16 b2_ref: (1, Cp) f32
    o_ref:   (H*W, Cp) bf16
    h1pad_ref: (H+2, W+2, Cp) f32 scratch (zero-padded h1 halo)
    acc_ref:   (H*W, Cp) f32 scratch (conv2 accumulator)
    """
    Cin = x_ref.shape[-1]
    Cp = w1_ref.shape[-1]

    # ---- conv1 (1x1) + folded bn1 + relu ----
    x2d = x_ref[...].reshape(H * W, Cin)
    h1 = jnp.dot(x2d, w1_ref[...], preferred_element_type=jnp.float32) + b1_ref[...]
    h1 = jnp.maximum(h1, 0.0)

    # ---- zero-padded copy of h1 in VMEM (halo for the 3x3 conv) ----
    h1pad_ref[...] = jnp.zeros(h1pad_ref.shape, h1pad_ref.dtype)
    h1pad_ref[1:H + 1, 1:W + 1, :] = h1.reshape(H, W, Cp)

    # ---- conv2 (3x3, pad=1) as 9 shifted accumulating MXU matmuls ----
    acc_ref[...] = jnp.zeros(acc_ref.shape, acc_ref.dtype)
    taps = [(dy, dx) for dy in range(3) for dx in range(3)]
    for t, (dy, dx) in enumerate(taps):
        patch = h1pad_ref[dy:dy + H, dx:dx + W, :].reshape(H * W, Cp)
        acc_ref[...] += jnp.dot(patch.astype(jnp.bfloat16), w2_ref[t],
                                preferred_element_type=jnp.float32)

    o_ref[...] = jnp.maximum(acc_ref[...] + b2_ref[...], 0.0).astype(o_ref.dtype)


def _epilogue_ds_kernel(h_ref, id_ref, w3_ref, b3_ref, wd_ref, bd_ref, o_ref):
    """conv3+bn3, downsample 1x1 conv+bn, residual add, final ReLU."""
    main = jnp.dot(h_ref[...], w3_ref[...], preferred_element_type=jnp.float32) + b3_ref[...]
    ident = jnp.dot(id_ref[...], wd_ref[...], preferred_element_type=jnp.float32) + bd_ref[...]
    o_ref[...] = jnp.maximum(main + ident, 0.0).astype(o_ref.dtype)


def _epilogue_id_kernel(h_ref, id_ref, w3_ref, b3_ref, o_ref):
    """conv3+bn3, identity residual add, final ReLU."""
    main = jnp.dot(h_ref[...], w3_ref[...], preferred_element_type=jnp.float32) + b3_ref[...]
    o_ref[...] = jnp.maximum(main + id_ref[...].astype(jnp.float32), 0.0).astype(o_ref.dtype)


# ----------------------------------------------------------------------------- pallas wrappers
def _fused_conv12(x_bf, w1, b1, w2, b2, *, H, W):
    N, _, _, Cin = x_bf.shape
    Cp = w1.shape[-1]
    hw = H * W
    return pl.pallas_call(
        functools.partial(_conv12_kernel, H=H, W=W),
        out_shape=jax.ShapeDtypeStruct((N * hw, Cp), jnp.bfloat16),
        grid=(N,),
        in_specs=[
            pl.BlockSpec((1, H, W, Cin), lambda n: (n, 0, 0, 0)),
            pl.BlockSpec((Cin, Cp), lambda n: (0, 0)),
            pl.BlockSpec((1, Cp), lambda n: (0, 0)),
            pl.BlockSpec((9, Cp, Cp), lambda n: (0, 0, 0)),
            pl.BlockSpec((1, Cp), lambda n: (0, 0)),
        ],
        out_specs=pl.BlockSpec((hw, Cp), lambda n: (n, 0)),
        scratch_shapes=[
            pltpu.VMEM((H + 2, W + 2, Cp), jnp.float32),
            pltpu.VMEM((hw, Cp), jnp.float32),
        ],
        compiler_params=pltpu.CompilerParams(
            dimension_semantics=("parallel",),
            vmem_limit_bytes=_VMEM_LIMIT,
        ),
    )(x_bf, w1, b1, w2, b2)


def _epilogue(h2d, idsrc, w3, b3, wd=None, bd=None):
    m, cp = h2d.shape
    cin = idsrc.shape[1]
    cop = w3.shape[1]
    tr, mp = _row_plan(m)
    if mp != m:  # fallback only for row counts not divisible by 8 (never hit in tests)
        h2d = jnp.pad(h2d, ((0, mp - m), (0, 0)))
        idsrc = jnp.pad(idsrc, ((0, mp - m), (0, 0)))
    cparams = pltpu.CompilerParams(dimension_semantics=("parallel",),
                                   vmem_limit_bytes=_VMEM_LIMIT)
    row = lambda i: (i, 0)
    const = lambda i: (0, 0)
    if wd is not None:
        out = pl.pallas_call(
            _epilogue_ds_kernel,
            out_shape=jax.ShapeDtypeStruct((mp, cop), jnp.float32),
            grid=(mp // tr,),
            in_specs=[pl.BlockSpec((tr, cp), row),
                      pl.BlockSpec((tr, cin), row),
                      pl.BlockSpec((cp, cop), const),
                      pl.BlockSpec((1, cop), const),
                      pl.BlockSpec((cin, cop), const),
                      pl.BlockSpec((1, cop), const)],
            out_specs=pl.BlockSpec((tr, cop), row),
            compiler_params=cparams,
        )(h2d, idsrc, w3, b3, wd, bd)
    else:
        out = pl.pallas_call(
            _epilogue_id_kernel,
            out_shape=jax.ShapeDtypeStruct((mp, cop), jnp.float32),
            grid=(mp // tr,),
            in_specs=[pl.BlockSpec((tr, cp), row),
                      pl.BlockSpec((tr, cin), row),
                      pl.BlockSpec((cp, cop), const),
                      pl.BlockSpec((1, cop), const)],
            out_specs=pl.BlockSpec((tr, cop), row),
            compiler_params=cparams,
        )(h2d, idsrc, w3, b3)
    return out[:m] if mp != m else out


# ----------------------------------------------------------------------------- params
def init_bottleneck_params(key, inplanes, planes, *, stride):
    expansion = 4
    keys = jax.random.split(key, 8)

    def conv(k, cout, cin, ks):
        fan_in = cin * ks * ks
        return jax.random.normal(k, (cout, cin, ks, ks), jnp.float32) / jnp.sqrt(fan_in)

    def bn(k, c):
        k1, k2, k3, k4 = jax.random.split(k, 4)
        return {
            "gamma": 1.0 + 0.1 * jax.random.normal(k1, (c,), jnp.float32),
            "beta": 0.1 * jax.random.normal(k2, (c,), jnp.float32),
            "mean": 0.1 * jax.random.normal(k3, (c,), jnp.float32),
            "var": 0.5 + jnp.abs(jax.random.normal(k4, (c,), jnp.float32)),
        }

    params = {
        "conv1_w": conv(keys[0], planes, inplanes, 1),
        "bn1": bn(keys[1], planes),
        "conv2_w": conv(keys[2], planes, planes, 3),
        "bn2": bn(keys[3], planes),
        "conv3_w": conv(keys[4], planes * expansion, planes, 1),
        "bn3": bn(keys[5], planes * expansion),
    }
    if stride > 1 or inplanes != planes * expansion:
        params["downsample_conv_w"] = conv(keys[6], planes * expansion, inplanes, 1)
        params["downsample_bn"] = bn(keys[7], planes * expansion)
    return params


# ----------------------------------------------------------------------------- forward
def bottleneck_forward(params, x, *, stride):
    """Bottleneck forward. x: (N, Cin, H, W) f32 -> (N, 4*planes, H//stride, W//stride) f32."""
    N, Cin, H, W = x.shape
    planes = params["conv1_w"].shape[0]
    cout = planes * 4
    Cp = _round_up(planes, 128)    # lane-dense intermediate channel width
    Cop = _round_up(cout, 128)     # lane-dense output channel width
    Ho, Wo = H // stride, W // stride

    # Channel-last (NHWC); bf16 activations go into the kernels.
    x_nhwc = jnp.transpose(x, (0, 2, 3, 1))
    x_bf = x_nhwc.astype(jnp.bfloat16)

    # --- fold BN into conv weights; zero-pad channels to lane width (128) ---
    w1, b1 = _fold_bn(params["conv1_w"][:, :, 0, 0].T, params["bn1"])          # (Cin, planes)
    w1 = _pad_last(w1, Cp).astype(jnp.bfloat16)
    b1 = _pad_last(b1, Cp)[None, :].astype(jnp.float32)

    w2 = jnp.transpose(params["conv2_w"], (2, 3, 1, 0)).reshape(9, planes, planes)
    w2, b2 = _fold_bn(w2, params["bn2"])
    w2 = jnp.pad(w2, ((0, 0), (0, Cp - planes), (0, Cp - planes))).astype(jnp.bfloat16)
    b2 = _pad_last(b2, Cp)[None, :].astype(jnp.float32)

    w3, b3 = _fold_bn(params["conv3_w"][:, :, 0, 0].T, params["bn3"])          # (planes, cout)
    w3 = jnp.pad(w3, ((0, Cp - planes), (0, Cop - cout))).astype(jnp.bfloat16)
    b3 = _pad_last(b3, Cop)[None, :].astype(jnp.float32)

    # --- fused conv1+bn1+relu + conv2(3x3)+bn2+relu : one Pallas kernel per image ---
    h2 = _fused_conv12(x_bf, w1, b1, w2, b2, H=H, W=W)        # (N*H*W, Cp) bf16

    # --- AvgPool2d(stride) on main path and identity source (f32 accumulation) ---
    # TODO(synk): fuse this pooling into the kernels to drop the HBM round trip.
    if stride > 1:
        h2d = h2.reshape(N, Ho, stride, Wo, stride, Cp).astype(jnp.float32)
        h2d = h2d.mean(axis=(2, 4)).reshape(N * Ho * Wo, Cp).astype(jnp.bfloat16)
        idsrc = x_nhwc.reshape(N, Ho, stride, Wo, stride, Cin).mean(axis=(2, 4))
        idsrc = idsrc.reshape(N * Ho * Wo, Cin).astype(jnp.bfloat16)
    else:
        h2d = h2
        idsrc = x_bf.reshape(N * H * W, Cin)

    # --- fused epilogue: conv3+bn3 (+ downsample conv+bn) + residual + relu ---
    if "downsample_conv_w" in params:
        wd, bd = _fold_bn(params["downsample_conv_w"][:, :, 0, 0].T, params["downsample_bn"])
        wd = _pad_last(wd, Cop).astype(jnp.bfloat16)
        bd = _pad_last(bd, Cop)[None, :].astype(jnp.float32)
        out2d = _epilogue(h2d, idsrc, w3, b3, wd, bd)
    else:
        if Cop != cout:
            idsrc = _pad_last(idsrc, Cop)   # zero-pad identity channels (test sizes only)
        out2d = _epilogue(h2d, idsrc, w3, b3)

    # TODO(synk): keep bf16 NHWC here when chaining blocks; transpose only once at the end.
    if Cop != cout:
        out2d = out2d[:, :cout]
    return out2d.reshape(N, Ho, Wo, cout).transpose(0, 3, 1, 2)


# ----------------------------------------------------------------------------- pure-JAX reference
def bottleneck_reference(params, x, *, stride, eps=1e-5):
    def conv(x, w, pad):
        return jax.lax.conv_general_dilated(
            x, w, window_strides=(1, 1), padding=pad,
            dimension_numbers=("NCHW", "OIHW", "NCHW"))

    def bn(x, p):
        s = p["gamma"] / jnp.sqrt(p["var"] + eps)
        return x * s[None, :, None, None] + (p["beta"] - p["mean"] * s)[None, :, None, None]

    def avgpool(x, s):
        if s <= 1:
            return x
        n, c, h, w = x.shape
        return x.reshape(n, c, h // s, s, w // s, s).mean(axis=(3, 5))

    out = jax.nn.relu(bn(conv(x, params["conv1_w"], "VALID"), params["bn1"]))
    out = jax.nn.relu(bn(conv(out, params["conv2_w"], [(1, 1), (1, 1)]), params["bn2"]))
    out = avgpool(out, stride)
    out = bn(conv(out, params["conv3_w"], "VALID"), params["bn3"])
    if "downsample_conv_w" in params:
        identity = bn(conv(avgpool(x, stride), params["downsample_conv_w"], "VALID"),
                      params["downsample_bn"])
    else:
        identity = x
    return jax.nn.relu(out + identity)


# ----------------------------------------------------------------------------- main
if __name__ == "__main__":
    configs = [
        # (batch, inplanes, planes, H=W, stride) -- exercises all residual paths
        dict(batch=2, inplanes=32, planes=16, hw=16, stride=2),  # avgpool + downsample
        dict(batch=2, inplanes=64, planes=16, hw=8, stride=1),   # identity residual
        dict(batch=2, inplanes=48, planes=16, hw=8, stride=1),   # stride-1 downsample
    ]
    key = jax.random.PRNGKey(0)
    for cfg in configs:
        key, kp, kx = jax.random.split(key, 3)
        params = init_bottleneck_params(kp, cfg["inplanes"], cfg["planes"], stride=cfg["stride"])
        x = jax.random.normal(
            kx, (cfg["batch"], cfg["inplanes"], cfg["hw"], cfg["hw"]), jnp.float32)

        fwd = jax.jit(functools.partial(bottleneck_forward, stride=cfg["stride"]))
        out = jax.block_until_ready(fwd(params, x))

        ho = cfg["hw"] // cfg["stride"]
        assert out.shape == (cfg["batch"], cfg["planes"] * 4, ho, ho), out.shape
        assert bool(jnp.all(jnp.isfinite(out)))

        ref = bottleneck_reference(params, x, stride=cfg["stride"])
        rel_err = float(jnp.max(jnp.abs(out - ref)) / (jnp.max(jnp.abs(ref)) + 1e-6))
        assert rel_err < 2e-2, f"mismatch vs reference: rel_err={rel_err}"

    print("KERNEL_OK")
</pallas_src>

<mosaic_0001>
module attributes {stable_mosaic.version = 11 : i64} {
  func.func @_conv12_kernel(%arg0: i32, %arg1: memref<1x16x16x32xbf16, #tpu.memory_space<vmem>>, %arg2: memref<32x128xbf16, #tpu.memory_space<vmem>>, %arg3: memref<1x128xf32, #tpu.memory_space<vmem>>, %arg4: memref<9x128x128xbf16, #tpu.memory_space<vmem>>, %arg5: memref<1x128xf32, #tpu.memory_space<vmem>>, %arg6: memref<256x128xbf16, #tpu.memory_space<vmem>>, %arg7: memref<18x18x128xf32, #tpu.memory_space<vmem>>, %arg8: memref<256x128xf32, #tpu.memory_space<vmem>>) attributes {dimension_semantics = [#tpu.dimension_semantics<parallel>], iteration_bounds = array<i64: 2>, scalar_prefetch = 0 : i64, scratch_operands = 2 : i64, tpu.core_type = #tpu.core_type<tc>, window_params = [{transform_indices = @transform_0, window_bounds = array<i64: 1, 16, 16, 32>}, {pipeline_mode = #tpu.pipeline_mode<synchronous>, transform_indices = @transform_1, window_bounds = array<i64: 32, 128>}, {pipeline_mode = #tpu.pipeline_mode<synchronous>, transform_indices = @transform_2, window_bounds = array<i64: 1, 128>}, {pipeline_mode = #tpu.pipeline_mode<synchronous>, transform_indices = @transform_3, window_bounds = array<i64: 9, 128, 128>}, {pipeline_mode = #tpu.pipeline_mode<synchronous>, transform_indices = @transform_4, window_bounds = array<i64: 1, 128>}, {transform_indices = @transform_5, window_bounds = array<i64: 256, 128>}]} {
    %c0 = arith.constant 0 : index
    %c0_0 = arith.constant 0 : index
    %c0_1 = arith.constant 0 : index
    %c0_2 = arith.constant 0 : index
    %0 = vector.load %arg1[%c0, %c0_0, %c0_1, %c0_2] : memref<1x16x16x32xbf16, #tpu.memory_space<vmem>>, vector<1x16x16x32xbf16>
    %1 = vector.shape_cast %0 : vector<1x16x16x32xbf16> to vector<256x32xbf16>
    %c0_3 = arith.constant 0 : index
    %c0_4 = arith.constant 0 : index
    %2 = vector.load %arg2[%c0_3, %c0_4] : memref<32x128xbf16, #tpu.memory_space<vmem>>, vector<32x128xbf16>
    %cst = arith.constant dense<0.000000e+00> : vector<256x128xf32>
    %3 = tpu.matmul %1, %2, %cst {dimension_numbers = #tpu.dot_dimension_numbers<[1], [0], [0], [1], [0, 0, 1, 1], [], []>} : vector<256x32xbf16>, vector<32x128xbf16>, vector<256x128xf32> -> vector<256x128xf32>
    %c0_5 = arith.constant 0 : index
    %c0_6 = arith.constant 0 : index
    %4 = vector.load %arg3[%c0_5, %c0_6] : memref<1x128xf32, #tpu.memory_space<vmem>>, vector<1x128xf32>
    %5 = vector.broadcast %4 : vector<1x128xf32> to vector<256x128xf32>
    %6 = arith.addf %3, %5 : vector<256x128xf32>
    %cst_7 = arith.constant 0.000000e+00 : f32
    %7 = vector.broadcast %cst_7 : f32 to vector<256x128xf32>
    %8 = arith.maximumf %6, %7 : vector<256x128xf32>
    %cst_8 = arith.constant 0.000000e+00 : f32
    %9 = vector.broadcast %cst_8 : f32 to vector<18x18x128xf32>
    %c0_9 = arith.constant 0 : index
    %c0_10 = arith.constant 0 : index
    %c0_11 = arith.constant 0 : index
    %10 = vector.load %arg7[%c0_9, %c0_10, %c0_11] : memref<18x18x128xf32, #tpu.memory_space<vmem>>, vector<18x18x128xf32>
    tpu.vector_store %arg7[%c0_9, %c0_10, %c0_11], %9 {strides = array<i32>} : memref<18x18x128xf32, #tpu.memory_space<vmem>>, vector<18x18x128xf32>,
    %11 = vector.shape_cast %8 : vector<256x128xf32> to vector<16x16x128xf32>
    %c1 = arith.constant 1 : index
    %c1_12 = arith.constant 1 : index
    %c0_13 = arith.constant 0 : index
    %12 = vector.load %arg7[%c1, %c1_12, %c0_13] : memref<18x18x128xf32, #tpu.memory_space<vmem>>, vector<16x16x128xf32>
    tpu.vector_store %arg7[%c1, %c1_12, %c0_13], %11 {strides = array<i32>} : memref<18x18x128xf32, #tpu.memory_space<vmem>>, vector<16x16x128xf32>,
    %cst_14 = arith.constant 0.000000e+00 : f32
    %13 = vector.broadcast %cst_14 : f32 to vector<256x128xf32>
    %c0_15 = arith.constant 0 : index
    %c0_16 = arith.constant 0 : index
    %14 = vector.load %arg8[%c0_15, %c0_16] : memref<256x128xf32, #tpu.memory_space<vmem>>, vector<256x128xf32>
    tpu.vector_store %arg8[%c0_15, %c0_16], %13 {strides = array<i32>} : memref<256x128xf32, #tpu.memory_space<vmem>>, vector<256x128xf32>,
    %c0_17 = arith.constant 0 : index
    %c0_18 = arith.constant 0 : index
    %c0_19 = arith.constant 0 : index
    %15 = vector.load %arg7[%c0_17, %c0_18, %c0_19] : memref<18x18x128xf32, #tpu.memory_space<vmem>>, vector<16x16x128xf32>
    %16 = vector.shape_cast %15 : vector<16x16x128xf32> to vector<256x128xf32>
    %c0_20 = arith.constant 0 : index
    %c0_21 = arith.constant 0 : index
    %17 = vector.load %arg8[%c0_20, %c0_21] : memref<256x128xf32, #tpu.memory_space<vmem>>, vector<256x128xf32>
    %18 = arith.truncf %16 : vector<256x128xf32> to vector<256x128xbf16>
    %c0_22 = arith.constant 0 : index
    %c0_23 = arith.constant 0 : index
    %c0_24 = arith.constant 0 : index
    %19 = vector.load %arg4[%c0_22, %c0_23, %c0_24] : memref<9x128x128xbf16, #tpu.memory_space<vmem>>, vector<1x128x128xbf16>
    %20 = vector.shape_cast %19 : vector<1x128x128xbf16> to vector<128x128xbf16>
    %cst_25 = arith.constant dense<0.000000e+00> : vector<256x128xf32>
    %21 = tpu.matmul %18, %20, %cst_25 {dimension_numbers = #tpu.dot_dimension_numbers<[1], [0], [0], [1], [0, 0, 1, 1], [], []>} : vector<256x128xbf16>, vector<128x128xbf16>, vector<256x128xf32> -> vector<256x128xf32>
    %22 = arith.addf %17, %21 : vector<256x128xf32>
    %c0_26 = arith.constant 0 : index
    %c0_27 = arith.constant 0 : index
    %23 = vector.load %arg8[%c0_26, %c0_27] : memref<256x128xf32, #tpu.memory_space<vmem>>, vector<256x128xf32>
    tpu.vector_store %arg8[%c0_26, %c0_27], %22 {strides = array<i32>} : memref<256x128xf32, #tpu.memory_space<vmem>>, vector<256x128xf32>,
    %c0_28 = arith.constant 0 : index
    %c1_29 = arith.constant 1 : index
    %c0_30 = arith.constant 0 : index
    %24 = vector.load %arg7[%c0_28, %c1_29, %c0_30] : memref<18x18x128xf32, #tpu.memory_space<vmem>>, vector<16x16x128xf32>
    %25 = vector.shape_cast %24 : vector<16x16x128xf32> to vector<256x128xf32>
    %c0_31 = arith.constant 0 : index
    %c0_32 = arith.constant 0 : index
    %26 = vector.load %arg8[%c0_31, %c0_32] : memref<256x128xf32, #tpu.memory_space<vmem>>, vector<256x128xf32>
    %27 = arith.truncf %25 : vector<256x128xf32> to vector<256x128xbf16>
    %c1_33 = arith.constant 1 : index
    %c0_34 = arith.constant 0 : index
    %c0_35 = arith.constant 0 : index
    %28 = vector.load %arg4[%c1_33, %c0_34, %c0_35] : memref<9x128x128xbf16, #tpu.memory_space<vmem>>, vector<1x128x128xbf16>
    %29 = vector.shape_cast %28 : vector<1x128x128xbf16> to vector<128x128xbf16>
    %cst_36 = arith.constant dense<0.000000e+00> : vector<256x128xf32>
    %30 = tpu.matmul %27, %29, %cst_36 {dimension_numbers = #tpu.dot_dimension_numbers<[1], [0], [0], [1], [0, 0, 1, 1], [], []>} : vector<256x128xbf16>, vector<128x128xbf16>, vector<256x128xf32> -> vector<256x128xf32>
    %31 = arith.addf %26, %30 : vector<256x128xf32>
    %c0_37 = arith.constant 0 : index
    %c0_38 = arith.constant 0 : index
    %32 = vector.load %arg8[%c0_37, %c0_38] : memref<256x128xf32, #tpu.memory_space<vmem>>, vector<256x128xf32>
    tpu.vector_store %arg8[%c0_37, %c0_38], %31 {strides = array<i32>} : memref<256x128xf32, #tpu.memory_space<vmem>>, vector<256x128xf32>,
    %c0_39 = arith.constant 0 : index
    %c2 = arith.constant 2 : index
    %c0_40 = arith.constant 0 : index
    %33 = vector.load %arg7[%c0_39, %c2, %c0_40] : memref<18x18x128xf32, #tpu.memory_space<vmem>>, vector<16x16x128xf32>
    %34 = vector.shape_cast %33 : vector<16x16x128xf32> to vector<256x128xf32>
    %c0_41 = arith.constant 0 : index
    %c0_42 = arith.constant 0 : index
    %35 = vector.load %arg8[%c0_41, %c0_42] : memref<256x128xf32, #tpu.memory_space<vmem>>, vector<256x128xf32>
    %36 = arith.truncf %34 : vector<256x128xf32> to vector<256x128xbf16>
    %c2_43 = arith.constant 2 : index
    %c0_44 = arith.constant 0 : index
    %c0_45 = arith.constant 0 : index
    %37 = vector.load %arg4[%c2_43, %c0_44, %c0_45] : memref<9x128x128xbf16, #tpu.memory_space<vmem>>, vector<1x128x128xbf16>
    %38 = vector.shape_cast %37 : vector<1x128x128xbf16> to vector<128x128xbf16>
    %cst_46 = arith.constant dense<0.000000e+00> : vector<256x128xf32>
    %39 = tpu.matmul %36, %38, %cst_46 {dimension_numbers = #tpu.dot_dimension_numbers<[1], [0], [0], [1], [0, 0, 1, 1], [], []>} : vector<256x128xbf16>, vector<128x128xbf16>, vector<256x128xf32> -> vector<256x128xf32>
    %40 = arith.addf %35, %39 : vector<256x128xf32>
    %c0_47 = arith.constant 0 : index
    %c0_48 = arith.constant 0 : index
    %41 = vector.load %arg8[%c0_47, %c0_48] : memref<256x128xf32, #tpu.memory_space<vmem>>, vector<256x128xf32>
    tpu.vector_store %arg8[%c0_47, %c0_48], %40 {strides = array<i32>} : memref<256x128xf32, #tpu.memory_space<vmem>>, vector<256x128xf32>,
    %c1_49 = arith.constant 1 : index
    %c0_50 = arith.constant 0 : index
    %c0_51 = arith.constant 0 : index
    %42 = vector.load %arg7[%c1_49, %c0_50, %c0_51] : memref<18x18x128xf32, #tpu.memory_space<vmem>>, vector<16x16x128xf32>
    %43 = vector.shape_cast %42 : vector<16x16x128xf32> to vector<256x128xf32>
    %c0_52 = arith.constant 0 : index
    %c0_53 = arith.constant 0 : index
    %44 = vector.load %arg8[%c0_52, %c0_53] : memref<256x128xf32, #tpu.memory_space<vmem>>, vector<256x128xf32>
    %45 = arith.truncf %43 : vector<256x128xf32> to vector<256x128xbf16>
    %c3 = arith.constant 3 : index
    %c0_54 = arith.constant 0 : index
    %c0_55 = arith.constant 0 : index
    %46 = vector.load %arg4[%c3, %c0_54, %c0_55] : memref<9x128x128xbf16, #tpu.memory_space<vmem>>, vector<1x128x128xbf16>
    %47 = vector.shape_cast %46 : vector<1x128x128xbf16> to vector<128x128xbf16>
    %cst_56 = arith.constant dense<0.000000e+00> : vector<256x128xf32>
    %48 = tpu.matmul %45, %47, %cst_56 {dimension_numbers = #tpu.dot_dimension_numbers<[1], [0], [0], [1], [0, 0, 1, 1], [], []>} : vector<256x128xbf16>, vector<128x128xbf16>, vector<256x128xf32> -> vector<256x128xf32>
    %49 = arith.addf %44, %48 : vector<256x128xf32>
    %c0_57 = arith.constant 0 : index
    %c0_58 = arith.constant 0 : index
    %50 = vector.load %arg8[%c0_57, %c0_58] : memref<256x128xf32, #tpu.memory_space<vmem>>, vector<256x128xf32>
    tpu.vector_store %arg8[%c0_57, %c0_58], %49 {strides = array<i32>} : memref<256x128xf32, #tpu.memory_space<vmem>>, vector<256x128xf32>,
    %c1_59 = arith.constant 1 : index
    %c1_60 = arith.constant 1 : index
    %c0_61 = arith.constant 0 : index
    %51 = vector.load %arg7[%c1_59, %c1_60, %c0_61] : memref<18x18x128xf32, #tpu.memory_space<vmem>>, vector<16x16x128xf32>
    %52 = vector.shape_cast %51 : vector<16x16x128xf32> to vector<256x128xf32>
    %c0_62 = arith.constant 0 : index
    %c0_63 = arith.constant 0 : index
    %53 = vector.load %arg8[%c0_62, %c0_63] : memref<256x128xf32, #tpu.memory_space<vmem>>, vector<256x128xf32>
    %54 = arith.truncf %52 : vector<256x128xf32> to vector<256x128xbf16>
    %c4 = arith.constant 4 : index
    %c0_64 = arith.constant 0 : index
    %c0_65 = arith.constant 0 : index
    %55 = vector.load %arg4[%c4, %c0_64, %c0_65] : memref<9x128x128xbf16, #tpu.memory_space<vmem>>, vector<1x128x128xbf16>
    %56 = vector.shape_cast %55 : vector<1x128x128xbf16> to vector<128x128xbf16>
    %cst_66 = arith.constant dense<0.000000e+00> : vector<256x128xf32>
    %57 = tpu.matmul %54, %56, %cst_66 {dimension_numbers = #tpu.dot_dimension_numbers<[1], [0], [0], [1], [0, 0, 1, 1], [], []>} : vector<256x128xbf16>, vector<128x128xbf16>, vector<256x128xf32> -> vector<256x128xf32>
    %58 = arith.addf %53, %57 : vector<256x128xf32>
    %c0_67 = arith.constant 0 : index
    %c0_68 = arith.constant 0 : index
    %59 = vector.load %arg8[%c0_67, %c0_68] : memref<256x128xf32, #tpu.memory_space<vmem>>, vector<256x128xf32>
    tpu.vector_store %arg8[%c0_67, %c0_68], %58 {strides = array<i32>} : memref<256x128xf32, #tpu.memory_space<vmem>>, vector<256x128xf32>,
    %c1_69 = arith.constant 1 : index
    %c2_70 = arith.constant 2 : index
    %c0_71 = arith.constant 0 : index
    %60 = vector.load %arg7[%c1_69, %c2_70, %c0_71] : memref<18x18x128xf32, #tpu.memory_space<vmem>>, vector<16x16x128xf32>
    %61 = vector.shape_cast %60 : vector<16x16x128xf32> to vector<256x128xf32>
    %c0_72 = arith.constant 0 : index
    %c0_73 = arith.constant 0 : index
    %62 = vector.load %arg8[%c0_72, %c0_73] : memref<256x128xf32, #tpu.memory_space<vmem>>, vector<256x128xf32>
    %63 = arith.truncf %61 : vector<256x128xf32> to vector<256x128xbf16>
    %c5 = arith.constant 5 : index
    %c0_74 = arith.constant 0 : index
    %c0_75 = arith.constant 0 : index
    %64 = vector.load %arg4[%c5, %c0_74, %c0_75] : memref<9x128x128xbf16, #tpu.memory_space<vmem>>, vector<1x128x128xbf16>
    %65 = vector.shape_cast %64 : vector<1x128x128xbf16> to vector<128x128xbf16>
    %cst_76 = arith.constant dense<0.000000e+00> : vector<256x128xf32>
    %66 = tpu.matmul %63, %65, %cst_76 {dimension_numbers = #tpu.dot_dimension_numbers<[1], [0], [0], [1], [0, 0, 1, 1], [], []>} : vector<256x128xbf16>, vector<128x128xbf16>, vector<256x128xf32> -> vector<256x128xf32>
    %67 = arith.addf %62, %66 : vector<256x128xf32>
    %c0_77 = arith.constant 0 : index
    %c0_78 = arith.constant 0 : index
    %68 = vector.load %arg8[%c0_77, %c0_78] : memref<256x128xf32, #tpu.memory_space<vmem>>, vector<256x128xf32>
    tpu.vector_store %arg8[%c0_77, %c0_78], %67 {strides = array<i32>} : memref<256x128xf32, #tpu.memory_space<vmem>>, vector<256x128xf32>,
    %c2_79 = arith.constant 2 : index
    %c0_80 = arith.constant 0 : index
    %c0_81 = arith.constant 0 : index
    %69 = vector.load %arg7[%c2_79, %c0_80, %c0_81] : memref<18x18x128xf32, #tpu.memory_space<vmem>>, vector<16x16x128xf32>
    %70 = vector.shape_cast %69 : vector<16x16x128xf32> to vector<256x128xf32>
    %c0_82 = arith.constant 0 : index
    %c0_83 = arith.constant 0 : index
    %71 = vector.load %arg8[%c0_82, %c0_83] : memref<256x128xf32, #tpu.memory_space<vmem>>, vector<256x128xf32>
    %72 = arith.truncf %70 : vector<256x128xf32> to vector<256x128xbf16>
    %c6 = arith.constant 6 : index
    %c0_84 = arith.constant 0 : index
    %c0_85 = arith.constant 0 : index
    %73 = vector.load %arg4[%c6, %c0_84, %c0_85] : memref<9x128x128xbf16, #tpu.memory_space<vmem>>, vector<1x128x128xbf16>
    %74 = vector.shape_cast %73 : vector<1x128x128xbf16> to vector<128x128xbf16>
    %cst_86 = arith.constant dense<0.000000e+00> : vector<256x128xf32>
    %75 = tpu.matmul %72, %74, %cst_86 {dimension_numbers = #tpu.dot_dimension_numbers<[1], [0], [0], [1], [0, 0, 1, 1], [], []>} : vector<256x128xbf16>, vector<128x128xbf16>, vector<256x128xf32> -> vector<256x128xf32>
    %76 = arith.addf %71, %75 : vector<256x128xf32>
    %c0_87 = arith.constant 0 : index
    %c0_88 = arith.constant 0 : index
    %77 = vector.load %arg8[%c0_87, %c0_88] : memref<256x128xf32, #tpu.memory_space<vmem>>, vector<256x128xf32>
    tpu.vector_store %arg8[%c0_87, %c0_88], %76 {strides = array<i32>} : memref<256x128xf32, #tpu.memory_space<vmem>>, vector<256x128xf32>,
    %c2_89 = arith.constant 2 : index
    %c1_90 = arith.constant 1 : index
    %c0_91 = arith.constant 0 : index
    %78 = vector.load %arg7[%c2_89, %c1_90, %c0_91] : memref<18x18x128xf32, #tpu.memory_space<vmem>>, vector<16x16x128xf32>
    %79 = vector.shape_cast %78 : vector<16x16x128xf32> to vector<256x128xf32>
    %c0_92 = arith.constant 0 : index
    %c0_93 = arith.constant 0 : index
    %80 = vector.load %arg8[%c0_92, %c0_93] : memref<256x128xf32, #tpu.memory_space<vmem>>, vector<256x128xf32>
    %81 = arith.truncf %79 : vector<256x128xf32> to vector<256x128xbf16>
    %c7 = arith.constant 7 : index
    %c0_94 = arith.constant 0 : index
    %c0_95 = arith.constant 0 : index
    %82 = vector.load %arg4[%c7, %c0_94, %c0_95] : memref<9x128x128xbf16, #tpu.memory_space<vmem>>, vector<1x128x128xbf16>
    %83 = vector.shape_cast %82 : vector<1x128x128xbf16> to vector<128x128xbf16>
    %cst_96 = arith.constant dense<0.000000e+00> : vector<256x128xf32>
    %84 = tpu.matmul %81, %83, %cst_96 {dimension_numbers = #tpu.dot_dimension_numbers<[1], [0], [0], [1], [0, 0, 1, 1], [], []>} : vector<256x128xbf16>, vector<128x128xbf16>, vector<256x128xf32> -> vector<256x128xf32>
    %85 = arith.addf %80, %84 : vector<256x128xf32>
    %c0_97 = arith.constant 0 : index
    %c0_98 = arith.constant 0 : index
    %86 = vector.load %arg8[%c0_97, %c0_98] : memref<256x128xf32, #tpu.memory_space<vmem>>, vector<256x128xf32>
    tpu.vector_store %arg8[%c0_97, %c0_98], %85 {strides = array<i32>} : memref<256x128xf32, #tpu.memory_space<vmem>>, vector<256x128xf32>,
    %c2_99 = arith.constant 2 : index
    %c2_100 = arith.constant 2 : index
    %c0_101 = arith.constant 0 : index
    %87 = vector.load %arg7[%c2_99, %c2_100, %c0_101] : memref<18x18x128xf32, #tpu.memory_space<vmem>>, vector<16x16x128xf32>
    %88 = vector.shape_cast %87 : vector<16x16x128xf32> to vector<256x128xf32>
    %c0_102 = arith.constant 0 : index
    %c0_103 = arith.constant 0 : index
    %89 = vector.load %arg8[%c0_102, %c0_103] : memref<256x128xf32, #tpu.memory_space<vmem>>, vector<256x128xf32>
    %90 = arith.truncf %88 : vector<256x128xf32> to vector<256x128xbf16>
    %c8 = arith.constant 8 : index
    %c0_104 = arith.constant 0 : index
    %c0_105 = arith.constant 0 : index
    %91 = vector.load %arg4[%c8, %c0_104, %c0_105] : memref<9x128x128xbf16, #tpu.memory_space<vmem>>, vector<1x128x128xbf16>
    %92 = vector.shape_cast %91 : vector<1x128x128xbf16> to vector<128x128xbf16>
    %cst_106 = arith.constant dense<0.000000e+00> : vector<256x128xf32>
    %93 = tpu.matmul %90, %92, %cst_106 {dimension_numbers = #tpu.dot_dimension_numbers<[1], [0], [0], [1], [0, 0, 1, 1], [], []>} : vector<256x128xbf16>, vector<128x128xbf16>, vector<256x128xf32> -> vector<256x128xf32>
    %94 = arith.addf %89, %93 : vector<256x128xf32>
    %c0_107 = arith.constant 0 : index
    %c0_108 = arith.constant 0 : index
    %95 = vector.load %arg8[%c0_107, %c0_108] : memref<256x128xf32, #tpu.memory_space<vmem>>, vector<256x128xf32>
    tpu.vector_store %arg8[%c0_107, %c0_108], %94 {strides = array<i32>} : memref<256x128xf32, #tpu.memory_space<vmem>>, vector<256x128xf32>,
    %c0_109 = arith.constant 0 : index
    %c0_110 = arith.constant 0 : index
    %96 = vector.load %arg8[%c0_109, %c0_110] : memref<256x128xf32, #tpu.memory_space<vmem>>, vector<256x128xf32>
    %c0_111 = arith.constant 0 : index
    %c0_112 = arith.constant 0 : index
    %97 = vector.load %arg5[%c0_111, %c0_112] : memref<1x128xf32, #tpu.memory_space<vmem>>, vector<1x128xf32>
    %98 = vector.broadcast %97 : vector<1x128xf32> to vector<256x128xf32>
    %99 = arith.addf %96, %98 : vector<256x128xf32>
    %cst_113 = arith.constant 0.000000e+00 : f32
    %100 = vector.broadcast %cst_113 : f32 to vector<256x128xf32>
    %101 = arith.maximumf %99, %100 : vector<256x128xf32>
    %102 = arith.truncf %101 : vector<256x128xf32> to vector<256x128xbf16>
    %c0_114 = arith.constant 0 : index
    %c0_115 = arith.constant 0 : index
    %103 = vector.load %arg6[%c0_114, %c0_115] : memref<256x128xbf16, #tpu.memory_space<vmem>>, vector<256x128xbf16>
    tpu.vector_store %arg6[%c0_114, %c0_115], %102 {strides = array<i32>} : memref<256x128xbf16, #tpu.memory_space<vmem>>, vector<256x128xbf16>,
    return
  }
  func.func @transform_0(%arg0: i32) -> (i32, i32, i32, i32) {
    %c0_i32 = arith.constant 0 : i32
    %c0_i32_0 = arith.constant 0 : i32
    %c0_i32_1 = arith.constant 0 : i32
    %c0_i32_2 = arith.constant 0 : i32
    return %arg0, %c0_i32, %c0_i32_0, %c0_i32_1 : i32, i32, i32, i32
  }
  func.func @transform_1(%arg0: i32) -> (i32, i32) {
    %c0_i32 = arith.constant 0 : i32
    %c0_i32_0 = arith.constant 0 : i32
    %c0_i32_1 = arith.constant 0 : i32
    return %c0_i32, %c0_i32_0 : i32, i32
  }
  func.func @transform_2(%arg0: i32) -> (i32, i32) {
    %c0_i32 = arith.constant 0 : i32
    %c0_i32_0 = arith.constant 0 : i32
    %c0_i32_1 = arith.constant 0 : i32
    return %c0_i32, %c0_i32_0 : i32, i32
  }
  func.func @transform_3(%arg0: i32) -> (i32, i32, i32) {
    %c0_i32 = arith.constant 0 : i32
    %c0_i32_0 = arith.constant 0 : i32
    %c0_i32_1 = arith.constant 0 : i32
    %c0_i32_2 = arith.constant 0 : i32
    return %c0_i32, %c0_i32_0, %c0_i32_1 : i32, i32, i32
  }
  func.func @transform_4(%arg0: i32) -> (i32, i32) {
    %c0_i32 = arith.constant 0 : i32
    %c0_i32_0 = arith.constant 0 : i32
    %c0_i32_1 = arith.constant 0 : i32
    return %c0_i32, %c0_i32_0 : i32, i32
  }
  func.func @transform_5(%arg0: i32) -> (i32, i32) {
    %c0_i32 = arith.constant 0 : i32
    %c0_i32_0 = arith.constant 0 : i32
    return %arg0, %c0_i32 : i32, i32
  }
}

module attributes {stable_mosaic.version = 11 : i64} {
  func.func @_epilogue_ds_kernel(%arg0: i32, %arg1: memref<64x128xbf16, #tpu.memory_space<vmem>>, %arg2: memref<64x32xbf16, #tpu.memory_space<vmem>>, %arg3: memref<128x128xbf16, #tpu.memory_space<vmem>>, %arg4: memref<1x128xf32, #tpu.memory_space<vmem>>, %arg5: memref<32x128xbf16, #tpu.memory_space<vmem>>, %arg6: memref<1x128xf32, #tpu.memory_space<vmem>>, %arg7: memref<64x128xf32, #tpu.memory_space<vmem>>) attributes {dimension_semantics = [#tpu.dimension_semantics<parallel>], iteration_bounds = array<i64: 2>, scalar_prefetch = 0 : i64, scratch_operands = 0 : i64, tpu.core_type = #tpu.core_type<tc>, window_params = [{transform_indices = @transform_0, window_bounds = array<i64: 64, 128>}, {transform_indices = @transform_1, window_bounds = array<i64: 64, 32>}, {pipeline_mode = #tpu.pipeline_mode<synchronous>, transform_indices = @transform_2, window_bounds = array<i64: 128, 128>}, {pipeline_mode = #tpu.pipeline_mode<synchronous>, transform_indices = @transform_3, window_bounds = array<i64: 1, 128>}, {pipeline_mode = #tpu.pipeline_mode<synchronous>, transform_indices = @transform_4, window_bounds = array<i64: 32, 128>}, {pipeline_mode = #tpu.pipeline_mode<synchronous>, transform_indices = @transform_5, window_bounds = array<i64: 1, 128>}, {transform_indices = @transform_6, window_bounds = array<i64: 64, 128>}]} {
    %c0 = arith.constant 0 : index
    %c0_0 = arith.constant 0 : index
    %0 = vector.load %arg1[%c0, %c0_0] : memref<64x128xbf16, #tpu.memory_space<vmem>>, vector<64x128xbf16>
    %c0_1 = arith.constant 0 : index
    %c0_2 = arith.constant 0 : index
    %1 = vector.load %arg3[%c0_1, %c0_2] : memref<128x128xbf16, #tpu.memory_space<vmem>>, vector<128x128xbf16>
    %cst = arith.constant dense<0.000000e+00> : vector<64x128xf32>
    %2 = tpu.matmul %0, %1, %cst {dimension_numbers = #tpu.dot_dimension_numbers<[1], [0], [0], [1], [0, 0, 1, 1], [], []>} : vector<64x128xbf16>, vector<128x128xbf16>, vector<64x128xf32> -> vector<64x128xf32>
    %c0_3 = arith.constant 0 : index
    %c0_4 = arith.constant 0 : index
    %3 = vector.load %arg4[%c0_3, %c0_4] : memref<1x128xf32, #tpu.memory_space<vmem>>, vector<1x128xf32>
    %4 = vector.broadcast %3 : vector<1x128xf32> to vector<64x128xf32>
    %5 = arith.addf %2, %4 : vector<64x128xf32>
    %c0_5 = arith.constant 0 : index
    %c0_6 = arith.constant 0 : index
    %6 = vector.load %arg2[%c0_5, %c0_6] : memref<64x32xbf16, #tpu.memory_space<vmem>>, vector<64x32xbf16>
    %c0_7 = arith.constant 0 : index
    %c0_8 = arith.constant 0 : index
    %7 = vector.load %arg5[%c0_7, %c0_8] : memref<32x128xbf16, #tpu.memory_space<vmem>>, vector<32x128xbf16>
    %cst_9 = arith.constant dense<0.000000e+00> : vector<64x128xf32>
    %8 = tpu.matmul %6, %7, %cst_9 {dimension_numbers = #tpu.dot_dimension_numbers<[1], [0], [0], [1], [0, 0, 1, 1], [], []>} : vector<64x32xbf16>, vector<32x128xbf16>, vector<64x128xf32> -> vector<64x128xf32>
    %c0_10 = arith.constant 0 : index
    %c0_11 = arith.constant 0 : index
    %9 = vector.load %arg6[%c0_10, %c0_11] : memref<1x128xf32, #tpu.memory_space<vmem>>, vector<1x128xf32>
    %10 = vector.broadcast %9 : vector<1x128xf32> to vector<64x128xf32>
    %11 = arith.addf %8, %10 : vector<64x128xf32>
    %12 = arith.addf %5, %11 : vector<64x128xf32>
    %cst_12 = arith.constant 0.000000e+00 : f32
    %13 = vector.broadcast %cst_12 : f32 to vector<64x128xf32>
    %14 = arith.maximumf %12, %13 : vector<64x128xf32>
    %c0_13 = arith.constant 0 : index
    %c0_14 = arith.constant 0 : index
    %15 = vector.load %arg7[%c0_13, %c0_14] : memref<64x128xf32, #tpu.memory_space<vmem>>, vector<64x128xf32>
    tpu.vector_store %arg7[%c0_13, %c0_14], %14 {strides = array<i32>} : memref<64x128xf32, #tpu.memory_space<vmem>>, vector<64x128xf32>,
    return
  }
  func.func @transform_0(%arg0: i32) -> (i32, i32) {
    %c0_i32 = arith.constant 0 : i32
    %c0_i32_0 = arith.constant 0 : i32
    return %arg0, %c0_i32 : i32, i32
  }
  func.func @transform_1(%arg0: i32) -> (i32, i32) {
    %c0_i32 = arith.constant 0 : i32
    %c0_i32_0 = arith.constant 0 : i32
    return %arg0, %c0_i32 : i32, i32
  }
  func.func @transform_2(%arg0: i32) -> (i32, i32) {
    %c0_i32 = arith.constant 0 : i32
    %c0_i32_0 = arith.constant 0 : i32
    %c0_i32_1 = arith.constant 0 : i32
    return %c0_i32, %c0_i32_0 : i32, i32
  }
  func.func @transform_3(%arg0: i32) -> (i32, i32) {
    %c0_i32 = arith.constant 0 : i32
    %c0_i32_0 = arith.constant 0 : i32
    %c0_i32_1 = arith.constant 0 : i32
    return %c0_i32, %c0_i32_0 : i32, i32
  }
  func.func @transform_4(%arg0: i32) -> (i32, i32) {
    %c0_i32 = arith.constant 0 : i32
    %c0_i32_0 = arith.constant 0 : i32
    %c0_i32_1 = arith.constant 0 : i32
    return %c0_i32, %c0_i32_0 : i32, i32
  }
  func.func @transform_5(%arg0: i32) -> (i32, i32) {
    %c0_i32 = arith.constant 0 : i32
    %c0_i32_0 = arith.constant 0 : i32
    %c0_i32_1 = arith.constant 0 : i32
    return %c0_i32, %c0_i32_0 : i32, i32
  }
  func.func @transform_6(%arg0: i32) -> (i32, i32) {
    %c0_i32 = arith.constant 0 : i32
    %c0_i32_0 = arith.constant 0 : i32
    return %arg0, %c0_i32 : i32, i32
  }
}

</mosaic_0001>

<bundles_post_ra>
// kernel: bottleneck_forward.3
= control target key start
LH: loop header
LB: loop body
LE: loop exit
PB: predicated region body
PF: predicated region fallthrough
CT: control target
= control target key end

     0   :  { %11 = vsyncpa [#allocation3], 0  ;;  %s1096_s0 = inlined_call_operand.vmem [shape: bf16[128,128], index: 0, kind: input, shape index: {}]   ;;  %s1097_s1 = inlined_call_operand.vmem [shape: bf16[128,32], index: 1, kind: input, shape index: {}]   ;;  %s1098_s2 = inlined_call_operand.vmem [shape: bf16[128,128], index: 2, kind: input, shape index: {}]   ;;  %s1099_s3 = inlined_call_operand.vmem [shape: f32[1,128], index: 3, kind: input, shape index: {}]   ;;  %s1100_s4 = inlined_call_operand.vmem [shape: bf16[32,128], index: 4, kind: input, shape index: {}]   ;;  %s1101_s5 = inlined_call_operand.vmem [shape: f32[1,128], index: 5, kind: input, shape index: {}]   ;;  %s1102_s6 = inlined_call_operand.hbm [shape: f32[128,128], index: 6, kind: output, shape index: {}]  }
   0x1   :  { %13 = vsyncpa [#allocation3 + $0x1], 0  ;;  %s937_s21 = smov 0   ;;  %s939_s22 = smov 0  }
   0x2   :  { %s941_s23 = smov 0   ;;  %s943_s24 = smov 0  }
   0x3 LB: > { %s958_s25 = sadd.s32 4294967295, %s897_s24   ;;  %s685_s26 = sadd.s32 4294967294, %s897_s24   ;;  %s897_s24 = sphi %s943_s24, %s1108_s24   ;;  %s893_s23 = sphi %s941_s23, %s1107_s23   ;;  %s889_s22 = sphi %s939_s22, %s1106_s22   ;;  %s885_s21 = sphi %s937_s21, %s1105_s21  }
   0x4   : > { %s962_s27 = sadd.s32 1, %s897_s24   ;;  %s162_s28 = sadd.s32 1, %s893_s23 }
   0x5   : > { %s159_s29 = ssub.s32 %s897_s24, %s962_s27  ;;  %p172_p0 = scmp.ne.s32.totalorder %s893_s23, %s889_s22 }
   0x6   : > { %p160_p1 = scmp.eq.s32.totalorder %s159_s29, 0  ;;  %p173_p2 = scmp.eq.s32.totalorder %s958_s25, 1 }
   0x7   : > { %p178_p3 = scmp.ne.s32.totalorder %s889_s22, %s885_s21  ;;  %p179_p4 = scmp.eq.s32.totalorder %s685_s26, 1 }
   0x8   : > { %s973_s30 = scalar_select %p160_p1, %s893_s23, %s162_s28  }
   0x9   : > { %p975_p5 = por %p173_p2, %p172_p0  ;;  %p979_p6 = por %p179_p4, %p178_p3 }
   0xa   : > { %p688_p7 = scmp.ge.s32.totalorder %s897_s24, 1  ;;  %p227_p8 = scmp.lt.s32.totalorder %s897_s24, 3 }
   0xc   : > { %p228_p9 = pnand %p688_p7, %p227_p8 }
   0xd   : > { %s690_s11 = sshll.u32 (!%p228_p9), %s958_s25, 3  ;;  %s259_s9 = sand.u32 (!%p228_p9), 1, %s889_s22  }
   0xe   : > { %231 = sbr.rel (%p228_p9) target bundleno = 279 (0x117), region = 44  ;;  %p263_p10 = scmp.lt.s32.totalorder (!%p228_p9), %s690_s11, 15 }
   0xf   : > { %s689_s12 = sshll.u32 (!%p228_p9), %s259_s9, 6  ;;  %s723_s14 = sshll.u32 (!%p228_p9), %s958_s25, 10 }
  0x10   : > { %s1056_s19 = scalar_lea.sflag (!%p228_p9), [#allocation3], %s259_s9  ;;  %s899_s20 = smov (!%p228_p9), [#allocation2]  }
  0x11   : > { %s841_s28 = sshll.u32 (!%p228_p9), %s899_s20, 4  ;;  %s842_s28 = int_to_ptr.vmem [resolvable:$false] %s841_s28 }
  0x13   : > { %v819_v0 = vld [vmem:[%s1098_s2 + $0x38] sm:$0xff]   ;;  %v820_v1 = vld [vmem:[%s1098_s2 + $0x30] sm:$0xff]   ;;  %s1110_s11 = smov (!%p263_p10, %s690_s11), 15  ;;  %v821_v2 = vld [vmem:[%s1098_s2 + $0x28] sm:$0xff]   ;;  %vm495_vm0 = vcmask 261120  }
  0x14   : > { %742 = vmatprep.subr.bf16.mxu0 %v819_v0  ;;  %v824_v3 = vld [vmem:[%s1100_s4 + $0x8] sm:$0xff]   ;;  %s691_s18 = sshll.u32 %s1110_s11, 2  ;;  %v826_v4 = vld [vmem:[%s1100_s4] sm:$0xff]   ;;  %v823_v7 = vld [vmem:[%s1098_s2 + $0x18] sm:$0xff]  }
  0x15   : > { %743 = vmatpush3.bf16.msra.mxu0 %v819_v0  ;;  %s272_s26 = scalar_lea.vmem %s1097_s1, %s691_s18  ;;  %766 = vmatprep.subr.bf16.mxu1 %v824_v3  ;;  %v822_v5 = vld [vmem:[%s1098_s2 + $0x20] sm:$0xff]   ;;  %s266_s13 = scalar_lea.vmem %s1096_s0, %s691_s18  ;;  %v825_v11 = vld [vmem:[%s1098_s2 + $0x10] sm:$0xff]   ;;  %v827_v13 = vld [vmem:[%s1098_s2 + $0x8] sm:$0xff]  }
  0x16   : > { %744 = vmatprep.subr.bf16.mxu0 %v820_v1  ;;  %767 = vmatpush3.bf16.msra.mxu1 %v824_v3  ;;  %v828_v6 = vld [vmem:[%s272_s26] sm:$0xff]   ;;  %v829_v8 = vld [vmem:[%s272_s26 + $0x8] sm:$0xff]   ;;  %v833_v10 = vld [vmem:[%s272_s26 + $0x10] sm:$0xff]   ;;  %s1048_s18 = scalar_lea.hbm %s1102_s6, %s723_s14 }
  0x17   : > { %768 = vmatprep.subr.bf16.mxu1 %v826_v4  ;;  %770 = vmatprep.mubr.msk.bf16.mxu1 %vm495_vm0, %v828_v6  ;;  %v831_v9 = vld [vmem:[%s266_s13] sm:$0xff]   ;;  %v834_v12 = vld [vmem:[%s272_s26 + $0x18] sm:$0xff]   ;;  %v832_v15 = vld [vmem:[%s266_s13 + $0x8] sm:$0xff]   ;;  %s843_s26 = scalar_lea.vmem %s842_s28, 2048 }
  0x18   : > { %758 = vmatprep.mubr.bf16.mxu0 %v831_v9  ;;  %v830_v14 = vld [vmem:[%s1098_s2] sm:$0xff]   ;;  %v835_v16 = vld [vmem:[%s266_s13 + $0x10] sm:$0xff]   ;;  %v836_v17 = vld [vmem:[%s266_s13 + $0x18] sm:$0xff]   ;;  %s1035_s13 = scalar_lea.vmem [#allocation2], %s689_s12 }
  0x19   : > { %745 = vmatpush3.bf16.msra.mxu0 %v820_v1  ;;  %v707_v21 = vld [vmem:[%s1101_s5] ss:$0 sm:$0xff]  ;;  %s611_s15 = sshll.u32 %s1035_s13, 4  ;;  %s1050_s15 = int_to_ptr.vmem [resolvable:$true] %s611_s15 }
  0x1a   : > { %746 = vmatprep.subr.bf16.mxu0 %v821_v2  ;;  %769 = vmatpush3.bf16.msra.mxu1 %v826_v4  ;;  %v694_v23 = vld [vmem:[%s1099_s3] ss:$0 sm:$0xff]  ;;  %s837_s25 = scalar_lea.vmem %s1050_s15, 1024  ;;  %p844_p0 = scmp.lt.s32.totalorder %s1050_s15, %s842_s28 }
  0x1b   : > { %p838_p11 = scmp.ne.s32.totalorder %s1050_s15, %s837_s25  ;;  %p845_p1 = scmp.lt.s32.totalorder %s843_s26, %s837_s25 }
  0x1d   : > { %747 = vmatpush3.bf16.msra.mxu0 %v821_v2  ;;  %771 = vmatmul.mubr.msk.bf16.vlgmr.msra.gmra.mxu1 %vm495_vm0, %v829_v8  ;;  %p839_p12 = pnand %p838_p11, %p975_p5  ;;  %p846_p2 = por %p845_p1, %p844_p0 }
  0x1e   : > { %748 = vmatprep.subr.bf16.mxu0 %v822_v5  ;;  %774 = vmatprep.mubr.msk.bf16.mxu1 %vm495_vm0, %v833_v10 }
  0x1f   : > { %p840_p13 = pneg %p839_p12 }
  0x21   : > { %749 = vmatpush3.bf16.msra.mxu0 %v822_v5  ;;  %p847_p3 = pnand %p846_p2, %p840_p13 }
  0x22   : > { %750 = vmatprep.subr.bf16.mxu0 %v823_v7 }
  0x25   : > { %751 = vmatpush3.bf16.msra.mxu0 %v823_v7  ;;  %775 = vmatmul.mubr.msk.bf16.gmra.mxu1 %vm495_vm0, %v834_v12 }
  0x26   : > { %752 = vmatprep.subr.bf16.mxu0 %v825_v11 }
  0x29   : > { %753 = vmatpush3.bf16.msra.mxu0 %v825_v11 }
  0x2a   : > { %754 = vmatprep.subr.bf16.mxu0 %v827_v13 }
  0x2d   : > { %755 = vmatpush3.bf16.msra.mxu0 %v827_v13 }
  0x2e   : > { %756 = vmatprep.subr.bf16.mxu0 %v830_v14 }
  0x31   : > { %757 = vmatpush3.bf16.msra.mxu0 %v830_v14 }
  0x34   : > { %759 = vmatmul.mubr.bf16.vlgmr.msra.gmra.mxu0 %v832_v15 }
  0x35   : > { %762 = vmatprep.mubr.bf16.mxu0 %v835_v16 }
  0x3c   : > { %763 = vmatmul.mubr.bf16.gmra.mxu0 %v836_v17 }
  0xdd   : > { %v772_v18 = vpop.f32.mrf.mxu1 }
  0xde   : > { %v551_v24 = vadd.f32 %v772_v18, %v707_v21 }
  0xdf   : > { %v542_v19 = vpop.f32.mrf.mxu1 }
  0xe0   : > { %v543_v29 = vadd.f32 %v707_v21, %v542_v19 }
  0xe1   : > { %v773_v20 = vpop.f32.mrf.mxu1 }
  0xe2   : > { %v554_v34 = vadd.f32 %v773_v20, %v707_v21 }
  0xe3   : > { %v545_v22 = vpop.f32.mrf.mxu1 }
  0xe4   : > { %v546_v38 = vadd.f32 %v707_v21, %v545_v22 }
  0xe5   : > { %v776_v26 = vpop.f32.mrf.mxu1 }
  0xe6   : > { %v567_v41 = vadd.f32 %v776_v26, %v707_v21 }
  0xe7   : > { %v558_v33 = vpop.f32.mrf.mxu1 }
  0xe8   : > { %v559_v50 = vadd.f32 %v707_v21, %v558_v33 }
  0xe9   : > { %v777_v44 = vpop.f32.mrf.mxu1 }
  0xea   : > { %v570_v56 = vadd.f32 %v777_v44, %v707_v21 }
  0xeb   : > { %v561_v54 = vpop.f32.mrf.mxu1 }
  0xec   : > { %v562_v61 = vadd.f32 %v707_v21, %v561_v54 }
  0xf4   : > { %v760_v25 = vpop.f32.mrf.mxu0 }
  0xf5   : > { %v422_v27 = vadd.f32 %v760_v25, %v694_v23 }
  0xf6   : > { %v413_v28 = vpop.f32.mrf.mxu0 }
  0xf7   : > { %v575_v30 = vadd.f32 %v551_v24, %v422_v27  ;;  %v414_v31 = vadd.f32 %v694_v23, %v413_v28 }
  0xf8   : > { %v761_v32 = vpop.f32.mrf.mxu0 }
  0xf9   : > { %v583_v35 = vmax.f32 %v575_v30, 0.0  ;;  %v573_v36 = vadd.f32 %v543_v29, %v414_v31  ;;  %v425_v37 = vadd.f32 %v761_v32, %v694_v23 }
  0xfa   : > { %v416_v39 = vpop.f32.mrf.mxu0 }
  0xfb   : > { %591 = vst [vmem:[%s1035_s13 + $0x10] sm:$0xff] %v583_v35  ;;  %v581_v40 = vmax.f32 %v573_v36, 0.0  ;;  %v576_v42 = vadd.f32 %v554_v34, %v425_v37  ;;  %v417_v43 = vadd.f32 %v694_v23, %v416_v39 }
  0xfc   : > { %v764_v45 = vpop.f32.mrf.mxu0 }
  0xfd   : > { %589 = vst [vmem:[%s1035_s13] sm:$0xff] %v581_v40  ;;  %v584_v46 = vmax.f32 %v576_v42, 0.0  ;;  %v574_v47 = vadd.f32 %v546_v38, %v417_v43  ;;  %v438_v48 = vadd.f32 %v764_v45, %v694_v23 }
  0xfe   : > { %v429_v49 = vpop.f32.mrf.mxu0 }
  0xff   : > { %592 = vst [vmem:[%s1035_s13 + $0x18] sm:$0xff] %v584_v46  ;;  %v582_v51 = vmax.f32 %v574_v47, 0.0  ;;  %v579_v52 = vadd.f32 %v567_v41, %v438_v48  ;;  %v430_v53 = vadd.f32 %v694_v23, %v429_v49 }
 0x100   : > { %v765_v55 = vpop.f32.mrf.mxu0 }
 0x101   : > { %590 = vst [vmem:[%s1035_s13 + $0x8] sm:$0xff] %v582_v51  ;;  %v587_v57 = vmax.f32 %v579_v52, 0.0  ;;  %v577_v58 = vadd.f32 %v559_v50, %v430_v53  ;;  %v441_v59 = vadd.f32 %v765_v55, %v694_v23 }
 0x102   : > { %v432_v60 = vpop.f32.mrf.mxu0 }
 0x103   : > { %595 = vst [vmem:[%s1035_s13 + $0x30] sm:$0xff] %v587_v57  ;;  %v585_v62 = vmax.f32 %v577_v58, 0.0  ;;  %v580_v63 = vadd.f32 %v570_v56, %v441_v59  ;;  %v433_v0 = vadd.f32 %v694_v23, %v432_v60 }
 0x105   : > { %593 = vst [vmem:[%s1035_s13 + $0x20] sm:$0xff] %v585_v62  ;;  %v588_v1 = vmax.f32 %v580_v63, 0.0  ;;  %v578_v2 = vadd.f32 %v562_v61, %v433_v0 }
 0x107   : > { %596 = vst [vmem:[%s1035_s13 + $0x38] sm:$0xff] %v588_v1  ;;  %v586_v3 = vmax.f32 %v578_v2, 0.0 }
 0x109   : > { %594 = vst [vmem:[%s1035_s13 + $0x28] sm:$0xff] %v586_v3 }
 0x10a   : > { %850 = shalt.err (!%p847_p3)
}
 0x10b   : > { %s851_s29 = scalar_lea.hbm %s1048_s18, 1024  ;;  %s855_s11 = scalar_lea.hbm %s1102_s6, 2048 }
 0x10c   : > { %p852_p4 = scmp.ne.s32.totalorder %s1048_s18, %s851_s29  ;;  %p856_p9 = scmp.lt.s32.totalorder %s1048_s18, %s1102_s6 }
 0x10d   : > { %p857_p10 = scmp.lt.s32.totalorder %s855_s11, %s851_s29 }
 0x10e   : > { %p853_p7 = pnand %p852_p4, %p975_p5 }
 0x10f   : > { %p858_p11 = por %p857_p10, %p856_p9 }
 0x110   : > { %p854_p8 = pneg %p853_p7 }
 0x112   : > { %p859_p12 = pnand %p858_p11, %p854_p8 }
 0x114   : > { %862 = shalt.err (!%p859_p12)
}
 0x115   : > { %s900_s14 = smov 128   ;;  %s901_s16 = smov 8  }
 0x116   : > { %778 = dma.vmem_to_hbm [thread:$0]  (%p975_p5), %s1050_s15, 1024, %s1048_s18, %s1056_s19, %s900_s14, %s900_s14, %s901_s16  }
 0x117 PF: > { %p784_p13 = scmp.ge.s32.totalorder %s897_s24, 2  ;;  %s626_s17 = sand.u32 1, %s885_s21  }
 0x118   : > { %s627_s25 = scalar_lea.sflag [#allocation3], %s626_s17 }
 0x119   : > { %p781_p0 = pnand %p784_p13, %p979_p6 }
 0x11b   : > { %p782_p1 = pneg %p781_p0 }
 0x11d   : > { %880 = dma.done.wait (%p782_p1), %s627_s25, 1024  }
 0x11e   : > { %882 = vsyncadd (%p782_p1), %s627_s25, 4294966272  ;;  %p16_p2 = scmp.ge.s32.totalorder %s962_s27, 4   ;;  %s1105_s21 = smov %s889_s22 }
 0x11f   : > { %s1106_s22 = smov %s893_s23  ;;  %s1107_s23 = smov %s973_s30 }
 0x120   : > { %s1108_s24 = smov %s962_s27  ;;  %18 = sbr.rel (!%p16_p2) target bundleno = 3 (0x3), region = 82 }
 0x125   :  { %632 = vsyncpa [#allocation3], 1 }
 0x126   :  { %634 = vsyncpa [#allocation3 + $0x1], 1 }

// kernel: bottleneck_forward.2
= control target key start
LH: loop header
LB: loop body
LE: loop exit
PB: predicated region body
PF: predicated region fallthrough
CT: control target
= control target key end

     0   :  { %s5637_s18 = smov 0   ;;  %s6648_s0 = inlined_call_operand.vmem [shape: bf16[2,16,16,32], index: 0, kind: input, shape index: {}]   ;;  %s6649_s1 = inlined_call_operand.vmem [shape: bf16[32,128], index: 1, kind: input, shape index: {}]   ;;  %s6650_s2 = inlined_call_operand.vmem [shape: f32[1,128], index: 2, kind: input, shape index: {}]   ;;  %s6651_s3 = inlined_call_operand.vmem [shape: bf16[9,128,128], index: 3, kind: input, shape index: {}]   ;;  %s6652_s4 = inlined_call_operand.vmem [shape: f32[1,128], index: 4, kind: input, shape index: {}]   ;;  %s6653_s5 = inlined_call_operand.vmem [shape: bf16[512,128], index: 5, kind: output, shape index: {}]  }
   0x1 LB: > { %s5643_s19 = sadd.s32 4294967295, %s5603_s18   ;;  %p4376_p0 = scmp.ge.s32.totalorder %s5603_s18, 1  ;;  %s5603_s18 = sphi %s5637_s18, %s15_s18  }
   0x2   : > { %p187_p1 = scmp.lt.s32.totalorder %s5603_s18, 3 }
   0x4   : > { %p188_p2 = pnand %p4376_p0, %p187_p1 }
   0x6   : > { %191 = sbr.rel (%p188_p2) target bundleno = 745 (0x2e9), region = 40 }
   0xb   : > { %v5506_v0 = vld [vmem:[%s6649_s1 + $0x8] sm:$0xff]   ;;  %p215_p3 = scmp.lt.s32.totalorder %s5643_s19, 1  ;;  %v5507_v1 = vld [vmem:[%s6649_s1] sm:$0xff]   ;;  %v5524_v2 = vld [vmem:[%s6651_s3 + $0x38] sm:$0xff]   ;;  %vm362_vm0 = vcmask 261120   ;;  %v5605_v28 = vmov 0.0  }
   0xc   : > { %5013 = vmatprep.subr.bf16.mxu0 %v5506_v0  ;;  %v5525_v3 = vld [vmem:[%s6651_s3 + $0x78] sm:$0xff]   ;;  %5049 = vmatprep.subr.bf16.mxu1 %v5524_v2  ;;  %v5526_v4 = vld [vmem:[%s6651_s3 + $0x30] sm:$0xff]   ;;  %v5528_v13 = vld [vmem:[%s6651_s3 + $0x28] sm:$0xff]   ;;  %610 = vst [vmem:[#allocation2 + $0x30] sm:$0xff] %v5605_v28  ;;  %v5606_v38 = vmov 0.0|0.0   ;;  %s4379_s12 = sshll.u32 %s5643_s19, 5 }
   0xd   : > { %s216_s24 = scalar_select %p215_p3, %s5643_s19, 1  ;;  %5014 = vmatpush3.bf16.msra.mxu0 %v5506_v0  ;;  %5050 = vmatpush3.bf16.msra.mxu1 %v5524_v2  ;;  %v5527_v6 = vld [vmem:[%s6651_s3 + $0x70] sm:$0xff]   ;;  %v5529_v14 = vld [vmem:[%s6651_s3 + $0x68] sm:$0xff]   ;;  %v5531_v24 = vld [vmem:[%s6651_s3 + $0x60] sm:$0xff]   ;;  %611 = vst [vmem:[#allocation2 + $0x38] sm:$0xff] %v5605_v28 }
   0xe   : > { %5015 = vmatprep.subr.bf16.mxu0 %v5507_v1  ;;  %5051 = vmatprep.subr.bf16.mxu1 %v5526_v4  ;;  %v5533_v25 = vld [vmem:[%s6651_s3 + $0x58] sm:$0xff]   ;;  %v5530_v26 = vld [vmem:[%s6651_s3 + $0x20] sm:$0xff]   ;;  %v5535_v27 = vld [vmem:[%s6651_s3 + $0x50] sm:$0xff]   ;;  %604 = vst [vmem:[#allocation2] sm:$0xff] %v5605_v28  ;;  %p221_p4 = scmp.lt.s32.totalorder %s4379_s12, 63 }
   0xf   : > { %s4651_s29 = sshll.u32 %s216_s24, 7  ;;  %605 = vst [vmem:[#allocation2 + $0x8] sm:$0xff] %v5605_v28  ;;  %606 = vst [vmem:[#allocation2 + $0x10] sm:$0x3] %v5605_v28  ;;  %v5532_v29 = vld [vmem:[%s6651_s3 + $0x18] sm:$0xff]   ;;  %v5537_v30 = vld [vmem:[%s6651_s3 + $0x48] sm:$0xff]   ;;  %5065 = vmatprep.mubr.bf16.mxu1 %v5606_v38 }
  0x10   : > { %s5667_s9 = scalar_lea.vmem %s6648_s0, %s4651_s29  ;;  %607 = vst [vmem:[#allocation2 + $0x18] sm:$0xff] %v5605_v28  ;;  %608 = vst [vmem:[#allocation2 + $0x20] sm:$0xff] %v5605_v28  ;;  %v5534_v31 = vld [vmem:[%s6651_s3 + $0x10] sm:$0xff]   ;;  %v5539_v32 = vld [vmem:[%s6651_s3 + $0x40] sm:$0xff]   ;;  %s6677_s12 = smov (!%p221_p4, %s4379_s12), 63 }
  0x11   : > { %v5508_v5 = vld [vmem:[%s5667_s9] sm:$0xff]   ;;  %5016 = vmatpush3.bf16.msra.mxu0 %v5507_v1  ;;  %v5509_v7 = vld [vmem:[%s5667_s9 + $0x8] sm:$0xff]   ;;  %v5510_v8 = vld [vmem:[%s5667_s9 + $0x10] sm:$0xff]   ;;  %5052 = vmatpush3.bf16.msra.mxu1 %v5526_v4  ;;  %609 = vst [vmem:[#allocation2 + $0x28] sm:$0x3] %v5605_v28  ;;  %s4380_s14 = sshll.u32 %s6677_s12, 2 }
  0x12   : > { %5017 = vmatprep.mubr.msk.bf16.mxu0 %vm362_vm0, %v5508_v5  ;;  %5097 = vmatprep.subr.bf16.mxu0 %v5525_v3  ;;  %v5511_v9 = vld [vmem:[%s5667_s9 + $0x18] sm:$0xff]   ;;  %v5512_v10 = vld [vmem:[%s5667_s9 + $0x20] sm:$0xff]   ;;  %v5513_v11 = vld [vmem:[%s5667_s9 + $0x28] sm:$0xff]   ;;  %612 = vst [vmem:[#allocation2 + $0x40] sm:$0x3] %v5605_v28  ;;  %s6550_s17 = scalar_lea.vmem %s6653_s5, %s4380_s14 }
  0x13   : > { %v5514_v12 = vld [vmem:[%s5667_s9 + $0x30] sm:$0xff]   ;;  %5053 = vmatprep.subr.bf16.mxu1 %v5528_v13  ;;  %v5515_v15 = vld [vmem:[%s5667_s9 + $0x38] sm:$0xff]   ;;  %v5516_v16 = vld [vmem:[%s5667_s9 + $0x40] sm:$0xff]   ;;  %613 = vst [vmem:[#allocation2 + $0x48] sm:$0xff] %v5605_v28 }
  0x14   : > { %5018 = vmatmul.mubr.msk.bf16.vlgmr.msra.gmra.mxu0 %vm362_vm0, %v5509_v7  ;;  %v5517_v17 = vld [vmem:[%s5667_s9 + $0x48] sm:$0xff]   ;;  %v5518_v18 = vld [vmem:[%s5667_s9 + $0x50] sm:$0xff]   ;;  %v5519_v19 = vld [vmem:[%s5667_s9 + $0x58] sm:$0xff]   ;;  %614 = vst [vmem:[#allocation2 + $0x50] sm:$0xff] %v5605_v28 }
  0x15   : > { %5021 = vmatprep.mubr.msk.bf16.mxu0 %vm362_vm0, %v5510_v8  ;;  %5098 = vmatpush3.bf16.msra.mxu0 %v5525_v3  ;;  %v5520_v20 = vld [vmem:[%s5667_s9 + $0x60] sm:$0xff]   ;;  %v5521_v21 = vld [vmem:[%s5667_s9 + $0x68] sm:$0xff]   ;;  %v5522_v22 = vld [vmem:[%s5667_s9 + $0x70] sm:$0xff]   ;;  %615 = vst [vmem:[#allocation2 + $0x58] sm:$0x3] %v5605_v28 }
  0x16   : > { %5099 = vmatprep.subr.bf16.mxu0 %v5527_v6  ;;  %5054 = vmatpush3.bf16.msra.mxu1 %v5528_v13  ;;  %v5523_v23 = vld [vmem:[%s5667_s9 + $0x78] sm:$0xff]   ;;  %616 = vst [vmem:[#allocation2 + $0x60] sm:$0xff] %v5605_v28  ;;  %617 = vst [vmem:[#allocation2 + $0x68] sm:$0xff] %v5605_v28  ;;  %v1092_v33 = vld [vmem:[#allocation2 + $0x1] sm:$0xff] }
  0x17   : > { %5055 = vmatprep.subr.bf16.mxu1 %v5530_v26  ;;  %618 = vst [vmem:[#allocation2 + $0x70] sm:$0x3] %v5605_v28  ;;  %619 = vst [vmem:[#allocation2 + $0x78] sm:$0xff] %v5605_v28  ;;  %v1093_v34 = vld [vmem:[#allocation2 + $0x9] sm:$0xff]  ;;  %v5538_v37 = vld [vmem:[%s6651_s3] sm:$0xff]  }
  0x18   : > { %620 = vst [vmem:[#allocation2 + $0x80] sm:$0xff] %v5605_v28  ;;  %621 = vst [vmem:[#allocation2 + $0x88] sm:$0x3] %v5605_v28  ;;  %v1156_v35 = vpack.c.bf16 %v1093_v34, %v1092_v33  ;;  %v5536_v36 = vld [vmem:[%s6651_s3 + $0x8] sm:$0xff]   ;;  %v5743_v39 = vld [vmem:[%s6651_s3 + $0xb8] sm:$0xff]  }
  0x19   : > { %5100 = vmatpush3.bf16.msra.mxu0 %v5527_v6  ;;  %622 = vst [vmem:[#allocation2 + $0x90] sm:$0xff] %v5605_v28  ;;  %623 = vst [vmem:[#allocation2 + $0x98] sm:$0xff] %v5605_v28  ;;  %v5545_v40 = vld [vmem:[%s6651_s3 + $0xf8] sm:$0xff]   ;;  %v5752_v41 = vld [vmem:[%s6650_s2] ss:$0 sm:$0xff] }
  0x1a   : > { %5101 = vmatprep.subr.bf16.mxu0 %v5529_v14  ;;  %624 = vst [vmem:[#allocation2 + $0xa0] sm:$0x3] %v5605_v28  ;;  %625 = vst [vmem:[#allocation2 + $0xa8] sm:$0xff] %v5605_v28  ;;  %5056 = vmatpush3.bf16.msra.mxu1 %v5530_v26  ;;  %v5546_v60 = vld [vmem:[%s6651_s3 + $0xf0] sm:$0xff]   ;;  %v5548_v4 = vld [vmem:[%s6651_s3 + $0xe8] sm:$0xff]  }
  0x1b   : > { %626 = vst [vmem:[#allocation2 + $0xb0] sm:$0xff] %v5605_v28  ;;  %627 = vst [vmem:[#allocation2 + $0xb8] sm:$0x3] %v5605_v28  ;;  %5057 = vmatprep.subr.bf16.mxu1 %v5532_v29 }
  0x1c   : > { %5022 = vmatmul.mubr.msk.bf16.gmra.mxu0 %vm362_vm0, %v5511_v9  ;;  %628 = vst [vmem:[#allocation2 + $0xc0] sm:$0xff] %v5605_v28  ;;  %629 = vst [vmem:[#allocation2 + $0xc8] sm:$0xff] %v5605_v28 }
  0x1d   : > { %5025 = vmatprep.mubr.msk.bf16.mxu0 %vm362_vm0, %v5512_v10  ;;  %5102 = vmatpush3.bf16.msra.mxu0 %v5529_v14  ;;  %630 = vst [vmem:[#allocation2 + $0xd0] sm:$0x3] %v5605_v28  ;;  %631 = vst [vmem:[#allocation2 + $0xd8] sm:$0xff] %v5605_v28 }
  0x1e   : > { %5103 = vmatprep.subr.bf16.mxu0 %v5531_v24  ;;  %632 = vst [vmem:[#allocation2 + $0xe0] sm:$0xff] %v5605_v28  ;;  %633 = vst [vmem:[#allocation2 + $0xe8] sm:$0x3] %v5605_v28  ;;  %5058 = vmatpush3.bf16.msra.mxu1 %v5532_v29 }
  0x1f   : > { %634 = vst [vmem:[#allocation2 + $0xf0] sm:$0xff] %v5605_v28  ;;  %635 = vst [vmem:[#allocation2 + $0xf8] sm:$0xff] %v5605_v28  ;;  %5059 = vmatprep.subr.bf16.mxu1 %v5534_v31 }
  0x20   : > { %636 = vst [vmem:[#allocation2 + $0x100] sm:$0x3] %v5605_v28  ;;  %637 = vst [vmem:[#allocation2 + $0x108] sm:$0xff] %v5605_v28 }
  0x21   : > { %5104 = vmatpush3.bf16.msra.mxu0 %v5531_v24  ;;  %638 = vst [vmem:[#allocation2 + $0x110] sm:$0xff] %v5605_v28  ;;  %639 = vst [vmem:[#allocation2 + $0x118] sm:$0x3] %v5605_v28 }
  0x22   : > { %5105 = vmatprep.subr.bf16.mxu0 %v5533_v25  ;;  %640 = vst [vmem:[#allocation2 + $0x120] sm:$0xff] %v5605_v28  ;;  %641 = vst [vmem:[#allocation2 + $0x128] sm:$0xff] %v5605_v28  ;;  %5060 = vmatpush3.bf16.msra.mxu1 %v5534_v31 }
  0x23   : > { %642 = vst [vmem:[#allocation2 + $0x130] sm:$0x3] %v5605_v28  ;;  %643 = vst [vmem:[#allocation2 + $0x138] sm:$0xff] %v5605_v28  ;;  %5061 = vmatprep.subr.bf16.mxu1 %v5536_v36 }
  0x24   : > { %5026 = vmatmul.mubr.msk.bf16.gmra.mxu0 %vm362_vm0, %v5513_v11  ;;  %644 = vst [vmem:[#allocation2 + $0x140] sm:$0xff] %v5605_v28  ;;  %645 = vst [vmem:[#allocation2 + $0x148] sm:$0x3] %v5605_v28 }
  0x25   : > { %5029 = vmatprep.mubr.msk.bf16.mxu0 %vm362_vm0, %v5514_v12  ;;  %5106 = vmatpush3.bf16.msra.mxu0 %v5533_v25  ;;  %646 = vst [vmem:[#allocation2 + $0x150] sm:$0xff] %v5605_v28  ;;  %647 = vst [vmem:[#allocation2 + $0x158] sm:$0xff] %v5605_v28 }
  0x26   : > { %5107 = vmatprep.subr.bf16.mxu0 %v5535_v27  ;;  %648 = vst [vmem:[#allocation2 + $0x160] sm:$0x3] %v5605_v28  ;;  %649 = vst [vmem:[#allocation2 + $0x168] sm:$0xff] %v5605_v28  ;;  %5062 = vmatpush3.bf16.msra.mxu1 %v5536_v36 }
  0x27   : > { %650 = vst [vmem:[#allocation2 + $0x170] sm:$0xff] %v5605_v28  ;;  %651 = vst [vmem:[#allocation2 + $0x178] sm:$0x3] %v5605_v28  ;;  %5063 = vmatprep.subr.bf16.mxu1 %v5538_v37 }
  0x28   : > { %652 = vst [vmem:[#allocation2 + $0x180] sm:$0xff] %v5605_v28  ;;  %653 = vst [vmem:[#allocation2 + $0x188] sm:$0xff] %v5605_v28 }
  0x29   : > { %654 = vst [vmem:[#allocation2 + $0x190] sm:$0x3] %v5605_v28  ;;  %655 = vst [vmem:[#allocation2 + $0x198] sm:$0xff] %v5605_v28  ;;  %5108 = vmatpush3.bf16.msra.mxu0 %v5535_v27  ;;  %v5542_v27 = vld [vmem:[%s6651_s3 + $0xa8] sm:$0xff]  }
  0x2a   : > { %656 = vst [vmem:[#allocation2 + $0x1a0] sm:$0xff] %v5605_v28  ;;  %657 = vst [vmem:[#allocation2 + $0x1a8] sm:$0x3] %v5605_v28  ;;  %5109 = vmatprep.subr.bf16.mxu0 %v5537_v30  ;;  %5064 = vmatpush3.bf16.msra.mxu1 %v5538_v37 }
  0x2b   : > { %5145 = vmatprep.subr.bf16.mxu1 %v5743_v39 }
  0x2c   : > { %5030 = vmatmul.mubr.msk.bf16.gmra.mxu0 %vm362_vm0, %v5515_v15 }
  0x2d   : > { %5033 = vmatprep.mubr.msk.bf16.mxu0 %vm362_vm0, %v5516_v16  ;;  %5110 = vmatpush3.bf16.msra.mxu0 %v5537_v30  ;;  %v5541_v16 = vld [vmem:[%s6651_s3 + $0xb0] sm:$0xff]  }
  0x2e   : > { %5111 = vmatprep.subr.bf16.mxu0 %v5539_v32 }
  0x31   : > { %5112 = vmatpush3.bf16.msra.mxu0 %v5539_v32 }
  0x32   : > { %5193 = vmatprep.subr.bf16.mxu0 %v5545_v40 }
  0x34   : > { %5034 = vmatmul.mubr.msk.bf16.gmra.mxu0 %vm362_vm0, %v5517_v17 }
  0x35   : > { %5037 = vmatprep.mubr.msk.bf16.mxu0 %vm362_vm0, %v5518_v18 }
  0x3c   : > { %5038 = vmatmul.mubr.msk.bf16.gmra.mxu0 %vm362_vm0, %v5519_v19 }
  0x3d   : > { %5041 = vmatprep.mubr.msk.bf16.mxu0 %vm362_vm0, %v5520_v20 }
  0x44   : > { %5042 = vmatmul.mubr.msk.bf16.gmra.mxu0 %vm362_vm0, %v5521_v21 }
  0x45   : > { %5045 = vmatprep.mubr.msk.bf16.mxu0 %vm362_vm0, %v5522_v22 }
  0x4c   : > { %5046 = vmatmul.mubr.msk.bf16.gmra.mxu0 %vm362_vm0, %v5523_v23  ;;  %v5549_v23 = vld [vmem:[%s6651_s3 + $0xe0] sm:$0xff]  }
  0x4d   : > { %5113 = vmatprep.mubr.bf16.mxu0 %v1156_v35 }
  0xd4   : > { %v5019_v42 = vpop.f32.mrf.mxu0 }
  0xd5   : > { %v454_v43 = vadd.f32 %v5019_v42, %v5752_v41 }
  0xd6   : > { %v445_v44 = vpop.f32.mrf.mxu0 }
  0xd7   : > { %v574_v45 = vmax.f32 %v454_v43, 0.0  ;;  %v446_v46 = vadd.f32 %v5752_v41, %v445_v44  ;;  %v5551_v44 = vld [vmem:[%s6651_s3 + $0xd8] sm:$0xff]  }
  0xd8   : > { %v5020_v47 = vpop.f32.mrf.mxu0 }
  0xd9   : > { %661 = vst [vmem:[#allocation2 + $0x31] sm:$0xff] %v574_v45  ;;  %v572_v48 = vmax.f32 %v446_v46, 0.0  ;;  %v457_v49 = vadd.f32 %v5020_v47, %v5752_v41 }
  0xda   : > { %v448_v50 = vpop.f32.mrf.mxu0 }
  0xdb   : > { %659 = vst [vmem:[#allocation2 + $0x19] sm:$0xff] %v572_v48  ;;  %v575_v51 = vmax.f32 %v457_v49, 0.0  ;;  %v449_v52 = vadd.f32 %v5752_v41, %v448_v50  ;;  %v5552_v49 = vld [vmem:[%s6651_s3 + $0xd0] sm:$0xff]  }
  0xdc   : > { %v5023_v53 = vpop.f32.mrf.mxu0 }
  0xdd   : > { %662 = vst [vmem:[#allocation2 + $0x39] sm:$0xff] %v575_v51  ;;  %v573_v54 = vmax.f32 %v449_v52, 0.0  ;;  %v470_v55 = vadd.f32 %v5023_v53, %v5752_v41  ;;  %v1158_v62 = vpack.c.bf16 %v575_v51, %v574_v45  ;;  %v5544_v52 = vld [vmem:[%s6651_s3 + $0x98] sm:$0xff]  }
  0xde   : > { %v461_v56 = vpop.f32.mrf.mxu0 }
  0xdf   : > { %660 = vst [vmem:[#allocation2 + $0x21] sm:$0xff] %v573_v54  ;;  %v578_v57 = vmax.f32 %v470_v55, 0.0  ;;  %v462_v58 = vadd.f32 %v5752_v41, %v461_v56  ;;  %v1157_v59 = vpack.c.bf16 %v573_v54, %v572_v48 }
  0xe0   : > { %v5024_v61 = vpop.f32.mrf.mxu0  ;;  %v727_v15 = vld [vmem:[#allocation2 + $0x30] sm:$0xff] }
  0xe1   : > { %665 = vst [vmem:[#allocation2 + $0x61] sm:$0xff] %v578_v57  ;;  %v576_v63 = vmax.f32 %v462_v58, 0.0  ;;  %v473_v0 = vadd.f32 %v5024_v61, %v5752_v41  ;;  %5114 = vmatmul.mubr.bf16.vlgmr.msra.gmra.mxu0 %v1157_v59 }
  0xe2   : > { %v464_v1 = vpop.f32.mrf.mxu0  ;;  %5117 = vmatprep.mubr.bf16.mxu0 %v1158_v62  ;;  %5194 = vmatpush3.bf16.msra.mxu0 %v5545_v40  ;;  %v725_v10 = vld [vmem:[#allocation2 + $0x18] sm:$0xff]  ;;  %v5543_v40 = vld [vmem:[%s6651_s3 + $0xa0] sm:$0xff]  }
  0xe3   : > { %663 = vst [vmem:[#allocation2 + $0x49] sm:$0xff] %v576_v63  ;;  %v579_v2 = vmax.f32 %v473_v0, 0.0  ;;  %v465_v3 = vadd.f32 %v5752_v41, %v464_v1  ;;  %5195 = vmatprep.subr.bf16.mxu0 %v5546_v60 }
  0xe4   : > { %v5027_v5 = vpop.f32.mrf.mxu0  ;;  %v728_v8 = vld [vmem:[#allocation2 + $0x38] sm:$0xff] }
  0xe5   : > { %666 = vst [vmem:[#allocation2 + $0x69] sm:$0xff] %v579_v2  ;;  %v577_v6 = vmax.f32 %v465_v3, 0.0  ;;  %v486_v7 = vadd.f32 %v5027_v5, %v5752_v41  ;;  %v5775_v19 = vpack.c.bf16 %v728_v8, %v727_v15  ;;  %v1160_v22 = vpack.c.bf16 %v579_v2, %v578_v57  ;;  %v5554_v5 = vld [vmem:[%s6651_s3 + $0xc8] sm:$0xff]  }
  0xe6   : > { %v477_v9 = vpop.f32.mrf.mxu0  ;;  %v726_v11 = vld [vmem:[#allocation2 + $0x20] sm:$0xff]  ;;  %5196 = vmatpush3.bf16.msra.mxu0 %v5546_v60 }
  0xe7   : > { %664 = vst [vmem:[#allocation2 + $0x51] sm:$0xff] %v577_v6  ;;  %v582_v12 = vmax.f32 %v486_v7, 0.0  ;;  %v478_v13 = vadd.f32 %v5752_v41, %v477_v9  ;;  %v5770_v14 = vpack.c.bf16 %v726_v11, %v725_v10  ;;  %v1159_v17 = vpack.c.bf16 %v577_v6, %v576_v63  ;;  %5197 = vmatprep.subr.bf16.mxu0 %v5548_v4 }
  0xe8   : > { %v5028_v18 = vpop.f32.mrf.mxu0  ;;  %v731_v38 = vld [vmem:[#allocation2 + $0x60] sm:$0xff] }
  0xe9   : > { %669 = vst [vmem:[#allocation2 + $0x91] sm:$0xff] %v582_v12  ;;  %v580_v20 = vmax.f32 %v478_v13, 0.0  ;;  %v489_v21 = vadd.f32 %v5028_v18, %v5752_v41  ;;  %5066 = vmatmul.mubr.bf16.vlgmr.msra.gmra.mxu1 %v5770_v14  ;;  %5118 = vmatmul.mubr.bf16.gmra.mxu0 %v1159_v17  ;;  %v5555_v13 = vld [vmem:[%s6651_s3 + $0xc0] sm:$0xff]  }
  0xea   : > { %5146 = vmatpush3.bf16.msra.mxu1 %v5743_v39  ;;  %v480_v24 = vpop.f32.mrf.mxu0  ;;  %5069 = vmatprep.mubr.bf16.mxu1 %v5775_v19  ;;  %v729_v33 = vld [vmem:[#allocation2 + $0x48] sm:$0xff] }
  0xeb   : > { %667 = vst [vmem:[#allocation2 + $0x79] sm:$0xff] %v580_v20  ;;  %v583_v25 = vmax.f32 %v489_v21, 0.0  ;;  %v481_v26 = vadd.f32 %v5752_v41, %v480_v24  ;;  %5147 = vmatprep.subr.bf16.mxu1 %v5541_v16  ;;  %5121 = vmatprep.mubr.bf16.mxu0 %v1160_v22 }
  0xec   : > { %v5031_v28 = vpop.f32.mrf.mxu0  ;;  %5198 = vmatpush3.bf16.msra.mxu0 %v5548_v4  ;;  %v732_v31 = vld [vmem:[#allocation2 + $0x68] sm:$0xff]  ;;  %v5547_v4 = vld [vmem:[%s6651_s3 + $0x90] sm:$0xff]  }
  0xed   : > { %670 = vst [vmem:[#allocation2 + $0x99] sm:$0xff] %v583_v25  ;;  %v581_v29 = vmax.f32 %v481_v26, 0.0  ;;  %v502_v30 = vadd.f32 %v5031_v28, %v5752_v41  ;;  %5199 = vmatprep.subr.bf16.mxu0 %v5549_v23  ;;  %v5795_v43 = vpack.c.bf16 %v732_v31, %v731_v38  ;;  %v1162_v47 = vpack.c.bf16 %v583_v25, %v582_v12  ;;  %v5550_v12 = vld [vmem:[%s6651_s3 + $0x88] sm:$0xff]   ;;  %v5850_v31 = vld [vmem:[%s6651_s3 + $0x178] sm:$0xff]  }
  0xee   : > { %v493_v32 = vpop.f32.mrf.mxu0  ;;  %v730_v34 = vld [vmem:[#allocation2 + $0x50] sm:$0xff]  ;;  %5148 = vmatpush3.bf16.msra.mxu1 %v5541_v16 }
  0xef   : > { %668 = vst [vmem:[#allocation2 + $0x81] sm:$0xff] %v581_v29  ;;  %v586_v35 = vmax.f32 %v502_v30, 0.0  ;;  %v494_v36 = vadd.f32 %v5752_v41, %v493_v32  ;;  %v5790_v37 = vpack.c.bf16 %v730_v34, %v729_v33  ;;  %5149 = vmatprep.subr.bf16.mxu1 %v5542_v27  ;;  %v1161_v39 = vpack.c.bf16 %v581_v29, %v580_v20  ;;  %v5553_v30 = vld [vmem:[%s6651_s3 + $0x80] sm:$0xff]  }
  0xf0   : > { %v5032_v42 = vpop.f32.mrf.mxu0  ;;  %5200 = vmatpush3.bf16.msra.mxu0 %v5549_v23  ;;  %v735_v63 = vld [vmem:[#allocation2 + $0x90] sm:$0xff] }
  0xf1   : > { %673 = vst [vmem:[#allocation2 + $0xc1] sm:$0xff] %v586_v35  ;;  %v584_v45 = vmax.f32 %v494_v36, 0.0  ;;  %v505_v46 = vadd.f32 %v5032_v42, %v5752_v41  ;;  %5070 = vmatmul.mubr.bf16.gmra.mxu1 %v5790_v37  ;;  %5122 = vmatmul.mubr.bf16.gmra.mxu0 %v1161_v39  ;;  %v5862_v39 = vld [vmem:[%s6651_s3 + $0x138] sm:$0xff]  }
  0xf2   : > { %v496_v48 = vpop.f32.mrf.mxu0  ;;  %5073 = vmatprep.mubr.bf16.mxu1 %v5795_v43  ;;  %5150 = vmatpush3.bf16.msra.mxu1 %v5542_v27  ;;  %v733_v58 = vld [vmem:[#allocation2 + $0x78] sm:$0xff] }
  0xf3   : > { %671 = vst [vmem:[#allocation2 + $0xa9] sm:$0xff] %v584_v45  ;;  %v587_v50 = vmax.f32 %v505_v46, 0.0  ;;  %v497_v51 = vadd.f32 %v5752_v41, %v496_v48  ;;  %5125 = vmatprep.mubr.bf16.mxu0 %v1162_v47  ;;  %5151 = vmatprep.subr.bf16.mxu1 %v5543_v40 }
  0xf4   : > { %v5035_v53 = vpop.f32.mrf.mxu0  ;;  %5201 = vmatprep.subr.bf16.mxu0 %v5551_v44  ;;  %v736_v56 = vld [vmem:[#allocation2 + $0x98] sm:$0xff] }
  0xf5   : > { %674 = vst [vmem:[#allocation2 + $0xc9] sm:$0xff] %v587_v50  ;;  %v5810_v54 = vmax.f32 %v497_v51, 0.0  ;;  %v518_v55 = vadd.f32 %v5035_v53, %v5752_v41  ;;  %5202 = vmatpush3.bf16.msra.mxu0 %v5551_v44  ;;  %v5818_v2 = vpack.c.bf16 %v736_v56, %v735_v63  ;;  %v1164_v3 = vpack.c.bf16 %v587_v50, %v586_v35 }
  0xf6   : > { %v509_v57 = vpop.f32.mrf.mxu0  ;;  %v734_v59 = vld [vmem:[#allocation2 + $0x80] sm:$0xff]  ;;  %5152 = vmatpush3.bf16.msra.mxu1 %v5543_v40  ;;  %5203 = vmatprep.subr.bf16.mxu0 %v5552_v49 }
  0xf7   : > { %672 = vst [vmem:[#allocation2 + $0xb1] sm:$0xff] %v5810_v54  ;;  %v590_v60 = vmax.f32 %v518_v55, 0.0  ;;  %v510_v61 = vadd.f32 %v5752_v41, %v509_v57  ;;  %v5815_v62 = vpack.c.bf16 %v734_v59, %v733_v58  ;;  %v1163_v0 = vpack.c.bf16 %v5810_v54, %v584_v45  ;;  %5153 = vmatprep.subr.bf16.mxu1 %v5544_v52 }
  0xf8   : > { %v5036_v1 = vpop.f32.mrf.mxu0  ;;  %v739_v25 = vld [vmem:[#allocation2 + $0xc0] sm:$0xff] }
  0xf9   : > { %677 = vst [vmem:[#allocation2 + $0xf1] sm:$0xff] %v590_v60  ;;  %v588_v6 = vmax.f32 %v510_v61, 0.0  ;;  %v521_v7 = vadd.f32 %v5036_v1, %v5752_v41  ;;  %5074 = vmatmul.mubr.bf16.gmra.mxu1 %v5815_v62  ;;  %5126 = vmatmul.mubr.bf16.gmra.mxu0 %v1163_v0 }
  0xfa   : > { %v512_v8 = vpop.f32.mrf.mxu0  ;;  %5077 = vmatprep.mubr.bf16.mxu1 %v5818_v2  ;;  %5129 = vmatprep.mubr.bf16.mxu0 %v1164_v3  ;;  %v737_v20 = vld [vmem:[#allocation2 + $0xa8] sm:$0xff] }
  0xfb   : > { %675 = vst [vmem:[#allocation2 + $0xd9] sm:$0xff] %v588_v6  ;;  %v591_v9 = vmax.f32 %v521_v7, 0.0  ;;  %v513_v10 = vadd.f32 %v5752_v41, %v512_v8  ;;  %5154 = vmatpush3.bf16.msra.mxu1 %v5544_v52  ;;  %5204 = vmatpush3.bf16.msra.mxu0 %v5552_v49 }
  0xfc   : > { %v5039_v11 = vpop.f32.mrf.mxu0  ;;  %5155 = vmatprep.subr.bf16.mxu1 %v5547_v4  ;;  %5205 = vmatprep.subr.bf16.mxu0 %v5554_v5  ;;  %v740_v17 = vld [vmem:[#allocation2 + $0xc8] sm:$0xff] }
  0xfd   : > { %678 = vst [vmem:[#allocation2 + $0xf9] sm:$0xff] %v591_v9  ;;  %v589_v15 = vmax.f32 %v513_v10, 0.0  ;;  %v534_v16 = vadd.f32 %v5039_v11, %v5752_v41  ;;  %v5842_v28 = vpack.c.bf16 %v740_v17, %v739_v25  ;;  %v1166_v29 = vpack.c.bf16 %v591_v9, %v590_v60 }
  0xfe   : > { %v525_v18 = vpop.f32.mrf.mxu0  ;;  %v738_v21 = vld [vmem:[#allocation2 + $0xb0] sm:$0xff] }
  0xff   : > { %676 = vst [vmem:[#allocation2 + $0xe1] sm:$0xff] %v589_v15  ;;  %v594_v22 = vmax.f32 %v534_v16, 0.0  ;;  %v526_v23 = vadd.f32 %v5752_v41, %v525_v18  ;;  %v5838_v24 = vpack.c.bf16 %v738_v21, %v737_v20  ;;  %v5840_v26 = vpack.c.bf16 %v589_v15, %v588_v6  ;;  %5156 = vmatpush3.bf16.msra.mxu1 %v5547_v4 }
 0x100   : > { %5206 = vmatpush3.bf16.msra.mxu0 %v5554_v5  ;;  %v5040_v27 = vpop.f32.mrf.mxu0  ;;  %5157 = vmatprep.subr.bf16.mxu1 %v5550_v12  ;;  %v743_v51 = vld [vmem:[#allocation2 + $0xf0] sm:$0xff] }
 0x101   : > { %5207 = vmatprep.subr.bf16.mxu0 %v5555_v13  ;;  %681 = vst [vmem:[#allocation2 + $0x121] sm:$0xff] %v594_v22  ;;  %v592_v32 = vmax.f32 %v526_v23, 0.0  ;;  %v537_v33 = vadd.f32 %v5040_v27, %v5752_v41  ;;  %5078 = vmatmul.mubr.bf16.gmra.mxu1 %v5838_v24 }
 0x102   : > { %5130 = vmatmul.mubr.bf16.gmra.mxu0 %v5840_v26  ;;  %v528_v34 = vpop.f32.mrf.mxu0  ;;  %5081 = vmatprep.mubr.bf16.mxu1 %v5842_v28  ;;  %v741_v46 = vld [vmem:[#allocation2 + $0xd8] sm:$0xff] }
 0x103   : > { %5133 = vmatprep.mubr.bf16.mxu0 %v1166_v29  ;;  %679 = vst [vmem:[#allocation2 + $0x109] sm:$0xff] %v592_v32  ;;  %v5856_v35 = vmax.f32 %v537_v33, 0.0  ;;  %v529_v36 = vadd.f32 %v5752_v41, %v528_v34  ;;  %5158 = vmatpush3.bf16.msra.mxu1 %v5550_v12 }
 0x104   : > { %5208 = vmatpush3.bf16.msra.mxu0 %v5555_v13  ;;  %v5043_v38 = vpop.f32.mrf.mxu0  ;;  %5159 = vmatprep.subr.bf16.mxu1 %v5553_v30  ;;  %v744_v44 = vld [vmem:[#allocation2 + $0xf8] sm:$0xff] }
 0x105   : > { %5289 = vmatprep.subr.bf16.mxu0 %v5850_v31  ;;  %682 = vst [vmem:[#allocation2 + $0x129] sm:$0xff] %v5856_v35  ;;  %v593_v40 = vmax.f32 %v529_v36, 0.0  ;;  %v550_v42 = vadd.f32 %v5043_v38, %v5752_v41  ;;  %v5872_v55 = vpack.c.bf16 %v744_v44, %v743_v51  ;;  %v1168_v56 = vpack.c.bf16 %v5856_v35, %v594_v22  ;;  %v1463_v36 = vld [vmem:[#allocation2 + $0xa] sm:$0xff] }
 0x106   : > { %v541_v45 = vpop.f32.mrf.mxu0  ;;  %v742_v47 = vld [vmem:[#allocation2 + $0xe0] sm:$0xff] }
 0x107   : > { %680 = vst [vmem:[#allocation2 + $0x111] sm:$0xff] %v593_v40  ;;  %v598_v48 = vmax.f32 %v550_v42, 0.0  ;;  %v542_v49 = vadd.f32 %v5752_v41, %v541_v45  ;;  %v5868_v50 = vpack.c.bf16 %v742_v47, %v741_v46  ;;  %v5870_v52 = vpack.c.bf16 %v593_v40, %v592_v32  ;;  %5160 = vmatpush3.bf16.msra.mxu1 %v5553_v30  ;;  %v5562_v45 = vld [vmem:[%s6651_s3 + $0x170] sm:$0xff]   ;;  %v1465_v46 = vld [vmem:[#allocation2 + $0x22] sm:$0xff] }
 0x108   : > { %v5044_v53 = vpop.f32.mrf.mxu0  ;;  %5241 = vmatprep.subr.bf16.mxu1 %v5862_v39  ;;  %v747_v10 = vld [vmem:[#allocation2 + $0x120] sm:$0xff]  ;;  %v5564_v47 = vld [vmem:[%s6651_s3 + $0x168] sm:$0xff]  }
 0x109   : > { %685 = vst [vmem:[#allocation2 + $0x151] sm:$0xff] %v598_v48  ;;  %v596_v57 = vmax.f32 %v542_v49, 0.0  ;;  %v553_v58 = vadd.f32 %v5044_v53, %v5752_v41  ;;  %5082 = vmatmul.mubr.bf16.gmra.mxu1 %v5868_v50  ;;  %v1467_v49 = vld [vmem:[#allocation2 + $0x3a] sm:$0xff] }
 0x10a   : > { %5134 = vmatmul.mubr.bf16.gmra.mxu0 %v5870_v52  ;;  %v544_v59 = vpop.f32.mrf.mxu0  ;;  %5085 = vmatprep.mubr.bf16.mxu1 %v5872_v55  ;;  %v745_v5 = vld [vmem:[#allocation2 + $0x108] sm:$0xff] }
 0x10b   : > { %5137 = vmatprep.mubr.bf16.mxu0 %v1168_v56  ;;  %683 = vst [vmem:[#allocation2 + $0x139] sm:$0xff] %v596_v57  ;;  %v599_v60 = vmax.f32 %v553_v58, 0.0  ;;  %v545_v61 = vadd.f32 %v5752_v41, %v544_v59  ;;  %v1468_v56 = vld [vmem:[#allocation2 + $0x4a] sm:$0xff]  ;;  %v1470_v58 = vld [vmem:[#allocation2 + $0x62] sm:$0xff] }
 0x10c   : > { %v5047_v63 = vpop.f32.mrf.mxu0  ;;  %v748_v3 = vld [vmem:[#allocation2 + $0x128] sm:$0xff] }
 0x10d   : > { %686 = vst [vmem:[#allocation2 + $0x159] sm:$0xff] %v599_v60  ;;  %v597_v0 = vmax.f32 %v545_v61, 0.0  ;;  %v566_v1 = vadd.f32 %v5047_v63, %v5752_v41  ;;  %v5887_v13 = vpack.c.bf16 %v748_v3, %v747_v10  ;;  %v5889_v15 = vpack.c.bf16 %v599_v60, %v598_v48  ;;  %v1466_v48 = vld [vmem:[#allocation2 + $0x32] sm:$0xff] }
 0x10e   : > { %v557_v4 = vpop.f32.mrf.mxu0  ;;  %v746_v6 = vld [vmem:[#allocation2 + $0x110] sm:$0xff]  ;;  %v5926_v53 = vpack.c.bf16 %v1467_v49, %v1466_v48  ;;  %v5560_v63 = vld [vmem:[%s6651_s3 + $0x118] sm:$0xff]  }
 0x10f   : > { %684 = vst [vmem:[#allocation2 + $0x141] sm:$0xff] %v597_v0  ;;  %v602_v7 = vmax.f32 %v566_v1, 0.0  ;;  %v558_v8 = vadd.f32 %v5752_v41, %v557_v4  ;;  %v5883_v9 = vpack.c.bf16 %v746_v6, %v745_v5  ;;  %v5885_v11 = vpack.c.bf16 %v597_v0, %v596_v57  ;;  %v1469_v57 = vld [vmem:[#allocation2 + $0x52] sm:$0xff]  ;;  %v1472_v0 = vld [vmem:[#allocation2 + $0x7a] sm:$0xff]  ;;  %v1473_v1 = vld [vmem:[#allocation2 + $0x82] sm:$0xff] }
 0x110   : > { %v5048_v12 = vpop.f32.mrf.mxu0  ;;  %v751_v32 = vld [vmem:[#allocation2 + $0x150] sm:$0xff]  ;;  %v5939_v59 = vpack.c.bf16 %v1469_v57, %v1468_v56  ;;  %v1475_v4 = vld [vmem:[#allocation2 + $0x9a] sm:$0xff]  ;;  %v5570_v6 = vld [vmem:[%s6651_s3 + $0x148] sm:$0xff]  }
 0x111   : > { %689 = vst [vmem:[#allocation2 + $0x181] sm:$0xff] %v602_v7  ;;  %v600_v16 = vmax.f32 %v558_v8, 0.0  ;;  %v569_v17 = vadd.f32 %v5048_v12, %v5752_v41  ;;  %5086 = vmatmul.mubr.bf16.gmra.mxu1 %v5883_v9  ;;  %v5568_v61 = vld [vmem:[%s6651_s3 + $0x150] sm:$0xff]   ;;  %v5571_v12 = vld [vmem:[%s6651_s3 + $0x140] sm:$0xff]  }
 0x112   : > { %5138 = vmatmul.mubr.bf16.gmra.mxu0 %v5885_v11  ;;  %v560_v18 = vpop.f32.mrf.mxu0  ;;  %5089 = vmatprep.mubr.bf16.mxu1 %v5887_v13  ;;  %v749_v27 = vld [vmem:[#allocation2 + $0x138] sm:$0xff]  ;;  %v1476_v8 = vld [vmem:[#allocation2 + $0xaa] sm:$0xff] }
 0x113   : > { %5141 = vmatprep.mubr.bf16.mxu0 %v5889_v15  ;;  %687 = vst [vmem:[#allocation2 + $0x169] sm:$0xff] %v600_v16  ;;  %v603_v20 = vmax.f32 %v569_v17, 0.0  ;;  %v561_v21 = vadd.f32 %v5752_v41, %v560_v18  ;;  %v1462_v41 = vld [vmem:[#allocation2 + $0x2] sm:$0xff]  ;;  %v1474_v3 = vld [vmem:[#allocation2 + $0x92] sm:$0xff] }
 0x114   : > { %v752_v23 = vld [vmem:[#allocation2 + $0x158] sm:$0xff]  ;;  %v1526_v42 = vpack.c.bf16 %v1463_v36, %v1462_v41  ;;  %v5961_v5 = vpack.c.bf16 %v1475_v4, %v1474_v3  ;;  %v5569_v18 = vld [vmem:[%s6651_s3 + $0x100] sm:$0xff]   ;;  %v2209_v3 = vld [vmem:[#allocation2 + $0x69] sm:$0xff] }
 0x115   : > { %690 = vst [vmem:[#allocation2 + $0x189] sm:$0xff] %v603_v20  ;;  %v601_v22 = vmax.f32 %v561_v21, 0.0  ;;  %v5897_v25 = vpack.c.bf16 %v603_v20, %v602_v7  ;;  %v5903_v34 = vpack.c.bf16 %v752_v23, %v751_v32  ;;  %v5566_v7 = vld [vmem:[%s6651_s3 + $0x108] sm:$0xff]   ;;  %v1477_v10 = vld [vmem:[#allocation2 + $0xb2] sm:$0xff]  ;;  %v1480_v21 = vld [vmem:[#allocation2 + $0xda] sm:$0xff] }
 0x116   : > { %v750_v29 = vld [vmem:[#allocation2 + $0x140] sm:$0xff]  ;;  %v5979_v17 = vpack.c.bf16 %v1477_v10, %v1476_v8  ;;  %v5577_v20 = vld [vmem:[%s6651_s3 + $0x1f8] sm:$0xff]   ;;  %v5584_v10 = vld [vmem:[%s6651_s3 + $0x1d0] sm:$0xff]  }
 0x117   : > { %688 = vst [vmem:[#allocation2 + $0x171] sm:$0xff] %v601_v22  ;;  %v5899_v30 = vpack.c.bf16 %v750_v29, %v749_v27  ;;  %v5901_v33 = vpack.c.bf16 %v601_v22, %v600_v16  ;;  %v1478_v16 = vld [vmem:[#allocation2 + $0xc2] sm:$0xff]  ;;  %v5572_v23 = vld [vmem:[%s6651_s3 + $0x1b8] sm:$0xff]  }
 0x118   : > { %v1481_v22 = vld [vmem:[#allocation2 + $0xe2] sm:$0xff]  ;;  %v1482_v27 = vld [vmem:[#allocation2 + $0xf2] sm:$0xff]  ;;  %v1483_v29 = vld [vmem:[#allocation2 + $0xfa] sm:$0xff] }
 0x119   : > { %5090 = vmatmul.mubr.bf16.gmra.mxu1 %v5899_v30  ;;  %v5996_v32 = vpack.c.bf16 %v1481_v22, %v1480_v21  ;;  %v1485_v41 = vld [vmem:[#allocation2 + $0x112] sm:$0xff]  ;;  %v1486_v36 = vld [vmem:[#allocation2 + $0x122] sm:$0xff] }
 0x11a   : > { %5142 = vmatmul.mubr.bf16.gmra.mxu0 %v5901_v33  ;;  %5093 = vmatprep.mubr.bf16.mxu1 %v5903_v34  ;;  %v753_v38 = vld [vmem:[#allocation2 + $0x168] sm:$0xff]  ;;  %v2202_v56 = vld [vmem:[#allocation2 + $0x19] sm:$0xff] }
 0x11b   : > { %5209 = vmatprep.mubr.bf16.mxu0 %v5770_v14  ;;  %v1464_v14 = vld [vmem:[#allocation2 + $0x1a] sm:$0xff]  ;;  %v5586_v21 = vld [vmem:[%s6651_s3 + $0x1c8] sm:$0xff]  }
 0x11c   : > { %v5921_v51 = vpack.c.bf16 %v1465_v46, %v1464_v14  ;;  %v1863_v14 = vld [vmem:[#allocation2 + $0x188] sm:$0xff]  ;;  %v1491_v46 = vld [vmem:[#allocation2 + $0x15a] sm:$0xff] }
 0x11d   : > { %v2211_v4 = vld [vmem:[#allocation2 + $0x81] sm:$0xff]  ;;  %v2217_v22 = vld [vmem:[#allocation2 + $0xc9] sm:$0xff] }
 0x11e   : > { %v754_v40 = vld [vmem:[#allocation2 + $0x170] sm:$0xff] }
 0x11f   : > { %v5909_v44 = vpack.c.bf16 %v754_v40, %v753_v38  ;;  %v1487_v38 = vld [vmem:[#allocation2 + $0x12a] sm:$0xff] }
 0x121   : > { %5094 = vmatmul.mubr.bf16.gmra.mxu1 %v5909_v44 }
 0x122   : > { %5210 = vmatmul.mubr.bf16.vlgmr.msra.gmra.mxu0 %v5775_v19  ;;  %5161 = vmatprep.mubr.bf16.mxu1 %v1526_v42  ;;  %v5557_v19 = vld [vmem:[%s6651_s3 + $0x130] sm:$0xff]   ;;  %v6006_v42 = vpack.c.bf16 %v1487_v38, %v1486_v36  ;;  %v2602_v38 = vld [vmem:[#allocation2 + $0x182] sm:$0xff] }
 0x123   : > { %5213 = vmatprep.mubr.bf16.mxu0 %v5790_v37  ;;  %5290 = vmatpush3.bf16.msra.mxu0 %v5850_v31  ;;  %v5565_v37 = vld [vmem:[%s6651_s3 + $0x160] sm:$0xff]   ;;  %v5558_v31 = vld [vmem:[%s6651_s3 + $0x128] sm:$0xff]  }
 0x124   : > { %5291 = vmatprep.subr.bf16.mxu0 %v5562_v45 }
 0x127   : > { %5292 = vmatpush3.bf16.msra.mxu0 %v5562_v45  ;;  %v1489_v45 = vld [vmem:[#allocation2 + $0x142] sm:$0xff] }
 0x128   : > { %5293 = vmatprep.subr.bf16.mxu0 %v5564_v47 }
 0x129   : > { %5162 = vmatmul.mubr.bf16.vlgmr.msra.gmra.mxu1 %v5921_v51 }
 0x12a   : > { %5214 = vmatmul.mubr.bf16.gmra.mxu0 %v5795_v43  ;;  %5242 = vmatpush3.bf16.msra.mxu1 %v5862_v39  ;;  %v1471_v43 = vld [vmem:[#allocation2 + $0x6a] sm:$0xff]  ;;  %v5559_v39 = vld [vmem:[%s6651_s3 + $0x120] sm:$0xff]  }
 0x12b   : > { %5165 = vmatprep.mubr.bf16.mxu1 %v5926_v53  ;;  %5243 = vmatprep.subr.bf16.mxu1 %v5557_v19  ;;  %v5944_v60 = vpack.c.bf16 %v1471_v43, %v1470_v58  ;;  %v5578_v58 = vld [vmem:[%s6651_s3 + $0x1f0] sm:$0xff]   ;;  %v5580_v43 = vld [vmem:[%s6651_s3 + $0x1e8] sm:$0xff]  }
 0x12c   : > { %5217 = vmatprep.mubr.bf16.mxu0 %v5815_v62  ;;  %5294 = vmatpush3.bf16.msra.mxu0 %v5564_v47  ;;  %v5567_v62 = vld [vmem:[%s6651_s3 + $0x158] sm:$0xff]   ;;  %v1862_v47 = vld [vmem:[#allocation2 + $0x180] sm:$0xff] }
 0x12d   : > { %5295 = vmatprep.subr.bf16.mxu0 %v5565_v37  ;;  %v6014_v49 = vpack.c.bf16 %v1863_v14, %v1862_v47  ;;  %v5590_v14 = vld [vmem:[%s6651_s3 + $0x228] sm:$0xff]  }
 0x12e   : > { %5244 = vmatpush3.bf16.msra.mxu1 %v5557_v19  ;;  %v2945_v47 = vld [vmem:[#allocation2 + $0x48] sm:$0xff] }
 0x12f   : > { %5245 = vmatprep.subr.bf16.mxu1 %v5558_v31 }
 0x130   : > { %5296 = vmatpush3.bf16.msra.mxu0 %v5565_v37  ;;  %v2203_v37 = vld [vmem:[#allocation2 + $0x21] sm:$0xff] }
 0x131   : > { %5166 = vmatmul.mubr.bf16.gmra.mxu1 %v5939_v59  ;;  %5297 = vmatprep.subr.bf16.mxu0 %v5567_v62  ;;  %v2266_v57 = vpack.c.bf16 %v2203_v37, %v2202_v56 }
 0x132   : > { %5218 = vmatmul.mubr.bf16.gmra.mxu0 %v5818_v2  ;;  %5169 = vmatprep.mubr.bf16.mxu1 %v5944_v60  ;;  %v5959_v2 = vpack.c.bf16 %v1473_v1, %v1472_v0  ;;  %v5573_v0 = vld [vmem:[%s6651_s3 + $0x1b0] sm:$0xff]   ;;  %v5574_v1 = vld [vmem:[%s6651_s3 + $0x1a8] sm:$0xff]  }
 0x133   : > { %5246 = vmatpush3.bf16.msra.mxu1 %v5558_v31  ;;  %5221 = vmatprep.mubr.bf16.mxu0 %v5838_v24  ;;  %v5563_v24 = vld [vmem:[%s6651_s3 + $0x110] sm:$0xff]  }
 0x134   : > { %5247 = vmatprep.subr.bf16.mxu1 %v5559_v39  ;;  %5298 = vmatpush3.bf16.msra.mxu0 %v5567_v62  ;;  %v2204_v62 = vld [vmem:[#allocation2 + $0x31] sm:$0xff] }
 0x135   : > { %5299 = vmatprep.subr.bf16.mxu0 %v5568_v61 }
 0x137   : > { %5248 = vmatpush3.bf16.msra.mxu1 %v5559_v39  ;;  %v2207_v39 = vld [vmem:[#allocation2 + $0x51] sm:$0xff] }
 0x138   : > { %5249 = vmatprep.subr.bf16.mxu1 %v5560_v63  ;;  %5300 = vmatpush3.bf16.msra.mxu0 %v5568_v61 }
 0x139   : > { %5170 = vmatmul.mubr.bf16.gmra.mxu1 %v5959_v2  ;;  %5301 = vmatprep.subr.bf16.mxu0 %v5570_v6 }
 0x13a   : > { %5222 = vmatmul.mubr.bf16.gmra.mxu0 %v5842_v28  ;;  %5173 = vmatprep.mubr.bf16.mxu1 %v5961_v5  ;;  %v1479_v28 = vld [vmem:[#allocation2 + $0xca] sm:$0xff] }
 0x13b   : > { %5225 = vmatprep.mubr.bf16.mxu0 %v5868_v50  ;;  %5250 = vmatpush3.bf16.msra.mxu1 %v5560_v63  ;;  %v5981_v50 = vpack.c.bf16 %v1479_v28, %v1478_v16  ;;  %v2206_v63 = vld [vmem:[#allocation2 + $0x49] sm:$0xff]  ;;  %v2213_v16 = vld [vmem:[#allocation2 + $0x99] sm:$0xff] }
 0x13c   : > { %5251 = vmatprep.subr.bf16.mxu1 %v5563_v24  ;;  %5302 = vmatpush3.bf16.msra.mxu0 %v5570_v6  ;;  %v2210_v6 = vld [vmem:[#allocation2 + $0x79] sm:$0xff]  ;;  %v6070_v28 = vld [vmem:[#allocation2 + $0xa9] sm:$0xff] }
 0x13d   : > { %5303 = vmatprep.subr.bf16.mxu0 %v5571_v12  ;;  %v6055_v8 = vpack.c.bf16 %v2211_v4, %v2210_v6 }
 0x13f   : > { %5252 = vmatpush3.bf16.msra.mxu1 %v5563_v24  ;;  %v2208_v24 = vld [vmem:[#allocation2 + $0x61] sm:$0xff] }
 0x140   : > { %5253 = vmatprep.subr.bf16.mxu1 %v5566_v7  ;;  %5304 = vmatpush3.bf16.msra.mxu0 %v5571_v12  ;;  %v5576_v12 = vld [vmem:[%s6651_s3 + $0x198] sm:$0xff]  }
 0x141   : > { %5174 = vmatmul.mubr.bf16.gmra.mxu1 %v5979_v17  ;;  %5385 = vmatprep.subr.bf16.mxu0 %v5577_v20 }
 0x142   : > { %5226 = vmatmul.mubr.bf16.gmra.mxu0 %v5872_v55  ;;  %5177 = vmatprep.mubr.bf16.mxu1 %v5981_v50  ;;  %v5998_v55 = vpack.c.bf16 %v1483_v29, %v1482_v27  ;;  %v2216_v27 = vld [vmem:[#allocation2 + $0xc1] sm:$0xff] }
 0x143   : > { %5229 = vmatprep.mubr.bf16.mxu0 %v5883_v9  ;;  %5254 = vmatpush3.bf16.msra.mxu1 %v5566_v7  ;;  %v1484_v9 = vld [vmem:[#allocation2 + $0x10a] sm:$0xff]  ;;  %v5575_v7 = vld [vmem:[%s6651_s3 + $0x1a0] sm:$0xff]   ;;  %v6091_v29 = vpack.c.bf16 %v2217_v22, %v2216_v27 }
 0x144   : > { %5255 = vmatprep.subr.bf16.mxu1 %v5569_v18  ;;  %v6004_v40 = vpack.c.bf16 %v1485_v41, %v1484_v9  ;;  %v2221_v9 = vld [vmem:[#allocation2 + $0xf9] sm:$0xff]  ;;  %v2220_v41 = vld [vmem:[#allocation2 + $0xf1] sm:$0xff] }
 0x145   : > { %v6103_v36 = vpack.c.bf16 %v2221_v9, %v2220_v41  ;;  %v3327_v27 = vld [vmem:[#allocation2 + $0xd9] sm:$0xff] }
 0x147   : > { %5256 = vmatpush3.bf16.msra.mxu1 %v5569_v18 }
 0x148   : > { %5337 = vmatprep.subr.bf16.mxu1 %v5572_v23 }
 0x149   : > { %5178 = vmatmul.mubr.bf16.gmra.mxu1 %v5996_v32 }
 0x14a   : > { %5230 = vmatmul.mubr.bf16.gmra.mxu0 %v5887_v13  ;;  %5181 = vmatprep.mubr.bf16.mxu1 %v5998_v55  ;;  %v1488_v13 = vld [vmem:[#allocation2 + $0x13a] sm:$0xff] }
 0x14b   : > { %5233 = vmatprep.mubr.bf16.mxu0 %v5899_v30  ;;  %v1490_v30 = vld [vmem:[#allocation2 + $0x152] sm:$0xff]  ;;  %v6012_v48 = vpack.c.bf16 %v1489_v45, %v1488_v13 }
 0x14c   : > { %v6016_v19 = vpack.c.bf16 %v1491_v46, %v1490_v30  ;;  %v2948_v30 = vld [vmem:[#allocation2 + $0x68] sm:$0xff] }
 0x151   : > { %5182 = vmatmul.mubr.bf16.gmra.mxu1 %v6004_v40 }
 0x152   : > { %5234 = vmatmul.mubr.bf16.gmra.mxu0 %v5903_v34  ;;  %5185 = vmatprep.mubr.bf16.mxu1 %v6006_v42  ;;  %v1492_v34 = vld [vmem:[#allocation2 + $0x16a] sm:$0xff] }
 0x153   : > { %5237 = vmatprep.mubr.bf16.mxu0 %v5909_v44  ;;  %v1493_v44 = vld [vmem:[#allocation2 + $0x172] sm:$0xff] }
 0x154   : > { %v6022_v31 = vpack.c.bf16 %v1493_v44, %v1492_v34 }
 0x159   : > { %5186 = vmatmul.mubr.bf16.gmra.mxu1 %v6012_v48 }
 0x15a   : > { %5238 = vmatmul.mubr.bf16.gmra.mxu0 %v6014_v49  ;;  %5189 = vmatprep.mubr.bf16.mxu1 %v6016_v19 }
 0x15b   : > { %5305 = vmatprep.mubr.bf16.mxu0 %v5921_v51  ;;  %v2205_v51 = vld [vmem:[#allocation2 + $0x39] sm:$0xff] }
 0x15c   : > { %v6033_v61 = vpack.c.bf16 %v2205_v51, %v2204_v62 }
 0x161   : > { %5190 = vmatmul.mubr.bf16.gmra.mxu1 %v6022_v31 }
 0x162   : > { %5306 = vmatmul.mubr.bf16.vlgmr.msra.gmra.mxu0 %v5926_v53  ;;  %5257 = vmatprep.mubr.bf16.mxu1 %v2266_v57  ;;  %v6038_v53 = vpack.c.bf16 %v2207_v39, %v2206_v63  ;;  %v3324_v39 = vld [vmem:[#allocation2 + $0xb1] sm:$0xff] }
 0x163   : > { %5309 = vmatprep.mubr.bf16.mxu0 %v5939_v59  ;;  %5386 = vmatpush3.bf16.msra.mxu0 %v5577_v20  ;;  %v5581_v59 = vld [vmem:[%s6651_s3 + $0x1e0] sm:$0xff]   ;;  %v2272_v20 = vpack.c.bf16 %v5810_v54, %v6070_v28  ;;  %v5582_v54 = vld [vmem:[%s6651_s3 + $0x188] sm:$0xff]  }
 0x164   : > { %5387 = vmatprep.subr.bf16.mxu0 %v5578_v58 }
 0x167   : > { %5388 = vmatpush3.bf16.msra.mxu0 %v5578_v58 }
 0x168   : > { %5389 = vmatprep.subr.bf16.mxu0 %v5580_v43 }
 0x169   : > { %5258 = vmatmul.mubr.bf16.vlgmr.msra.gmra.mxu1 %v6033_v61 }
 0x16a   : > { %5310 = vmatmul.mubr.bf16.gmra.mxu0 %v5944_v60  ;;  %5338 = vmatpush3.bf16.msra.mxu1 %v5572_v23  ;;  %v6050_v60 = vpack.c.bf16 %v2209_v3, %v2208_v24  ;;  %v5587_v23 = vld [vmem:[%s6651_s3 + $0x1c0] sm:$0xff]   ;;  %v2951_v3 = vld [vmem:[#allocation2 + $0x90] sm:$0xff]  ;;  %v3382_v24 = vpack.c.bf16 %v3324_v39, %v6070_v28 }
 0x16b   : > { %5261 = vmatprep.mubr.bf16.mxu1 %v6038_v53  ;;  %5339 = vmatprep.subr.bf16.mxu1 %v5573_v0 }
 0x16c   : > { %5313 = vmatprep.mubr.bf16.mxu0 %v5959_v2  ;;  %5390 = vmatpush3.bf16.msra.mxu0 %v5580_v43  ;;  %v5583_v2 = vld [vmem:[%s6651_s3 + $0x1d8] sm:$0xff]   ;;  %v2950_v43 = vld [vmem:[#allocation2 + $0x80] sm:$0xff] }
 0x16d   : > { %5391 = vmatprep.subr.bf16.mxu0 %v5581_v59 }
 0x16e   : > { %5340 = vmatpush3.bf16.msra.mxu1 %v5573_v0 }
 0x16f   : > { %5341 = vmatprep.subr.bf16.mxu1 %v5574_v1 }
 0x170   : > { %5392 = vmatpush3.bf16.msra.mxu0 %v5581_v59 }
 0x171   : > { %5262 = vmatmul.mubr.bf16.gmra.mxu1 %v6050_v60  ;;  %5393 = vmatprep.subr.bf16.mxu0 %v5583_v2 }
 0x172   : > { %5314 = vmatmul.mubr.bf16.gmra.mxu0 %v5961_v5  ;;  %5265 = vmatprep.mubr.bf16.mxu1 %v6055_v8  ;;  %v2212_v5 = vld [vmem:[#allocation2 + $0x91] sm:$0xff] }
 0x173   : > { %5342 = vmatpush3.bf16.msra.mxu1 %v5574_v1  ;;  %5317 = vmatprep.mubr.bf16.mxu0 %v5979_v17  ;;  %v6072_v18 = vpack.c.bf16 %v2213_v16, %v2212_v5  ;;  %v5579_v17 = vld [vmem:[%s6651_s3 + $0x190] sm:$0xff]  }
 0x174   : > { %5343 = vmatprep.subr.bf16.mxu1 %v5575_v7  ;;  %5394 = vmatpush3.bf16.msra.mxu0 %v5583_v2 }
 0x175   : > { %5395 = vmatprep.subr.bf16.mxu0 %v5584_v10 }
 0x177   : > { %5344 = vmatpush3.bf16.msra.mxu1 %v5575_v7  ;;  %v5592_v7 = vld [vmem:[%s6651_s3 + $0x218] sm:$0xff]  }
 0x178   : > { %5345 = vmatprep.subr.bf16.mxu1 %v5576_v12  ;;  %5396 = vmatpush3.bf16.msra.mxu0 %v5584_v10 }
 0x179   : > { %5266 = vmatmul.mubr.bf16.gmra.mxu1 %v6072_v18  ;;  %5397 = vmatprep.subr.bf16.mxu0 %v5586_v21 }
 0x17a   : > { %5318 = vmatmul.mubr.bf16.gmra.mxu0 %v5981_v50  ;;  %5269 = vmatprep.mubr.bf16.mxu1 %v2272_v20  ;;  %v5585_v50 = vld [vmem:[%s6651_s3 + $0x180] sm:$0xff]  }
 0x17b   : > { %5321 = vmatprep.mubr.bf16.mxu0 %v5996_v32  ;;  %5346 = vmatpush3.bf16.msra.mxu1 %v5576_v12  ;;  %v5588_v32 = vld [vmem:[%s6651_s3 + $0x238] sm:$0xff]   ;;  %v5593_v12 = vld [vmem:[%s6651_s3 + $0x210] sm:$0xff]   ;;  %v3328_v20 = vld [vmem:[#allocation2 + $0xe1] sm:$0xff] }
 0x17c   : > { %5347 = vmatprep.subr.bf16.mxu1 %v5579_v17  ;;  %5398 = vmatpush3.bf16.msra.mxu0 %v5586_v21  ;;  %v2956_v21 = vld [vmem:[#allocation2 + $0xc8] sm:$0xff]  ;;  %v3384_v41 = vpack.c.bf16 %v3328_v20, %v3327_v27  ;;  %v2963_v20 = vld [vmem:[#allocation2 + $0x120] sm:$0xff] }
 0x17d   : > { %5399 = vmatprep.subr.bf16.mxu0 %v5587_v23 }
 0x17f   : > { %5348 = vmatpush3.bf16.msra.mxu1 %v5579_v17 }
 0x180   : > { %5349 = vmatprep.subr.bf16.mxu1 %v5582_v54  ;;  %5400 = vmatpush3.bf16.msra.mxu0 %v5587_v23  ;;  %v2953_v23 = vld [vmem:[#allocation2 + $0xa8] sm:$0xff] }
 0x181   : > { %5270 = vmatmul.mubr.bf16.gmra.mxu1 %v6091_v29  ;;  %5433 = vmatprep.subr.bf16.mxu0 %v5588_v32 }
 0x182   : > { %5322 = vmatmul.mubr.bf16.gmra.mxu0 %v5998_v55  ;;  %5273 = vmatprep.mubr.bf16.mxu1 %v5840_v26  ;;  %v6109_v26 = vld [vmem:[#allocation2 + $0x121] sm:$0xff] }
 0x183   : > { %5325 = vmatprep.mubr.bf16.mxu0 %v6004_v40  ;;  %5350 = vmatpush3.bf16.msra.mxu1 %v5582_v54  ;;  %v2277_v55 = vpack.c.bf16 %v5856_v35, %v6109_v26  ;;  %v2603_v40 = vld [vmem:[#allocation2 + $0x18a] sm:$0xff]  ;;  %v2944_v35 = vld [vmem:[#allocation2 + $0x38] sm:$0xff] }
 0x184   : > { %5351 = vmatprep.subr.bf16.mxu1 %v5585_v50  ;;  %v6116_v13 = vpack.c.bf16 %v2603_v40, %v2602_v38  ;;  %v5594_v40 = vld [vmem:[%s6651_s3 + $0x208] sm:$0xff]  }
 0x187   : > { %5352 = vmatpush3.bf16.msra.mxu1 %v5585_v50 }
 0x188   : > { %5481 = vmatprep.subr.bf16.mxu1 %v5588_v32 }
 0x189   : > { %5274 = vmatmul.mubr.bf16.gmra.mxu1 %v6103_v36 }
 0x18a   : > { %5326 = vmatmul.mubr.bf16.gmra.mxu0 %v6006_v42  ;;  %5277 = vmatprep.mubr.bf16.mxu1 %v5870_v52  ;;  %v2943_v52 = vld [vmem:[#allocation2 + $0x30] sm:$0xff] }
 0x18b   : > { %5329 = vmatprep.mubr.bf16.mxu0 %v6012_v48  ;;  %v3007_v42 = vpack.c.bf16 %v2944_v35, %v2943_v52 }
 0x191   : > { %5278 = vmatmul.mubr.bf16.gmra.mxu1 %v2277_v55 }
 0x192   : > { %5330 = vmatmul.mubr.bf16.gmra.mxu0 %v6016_v19  ;;  %5281 = vmatprep.mubr.bf16.mxu1 %v5885_v11  ;;  %v5589_v11 = vld [vmem:[%s6651_s3 + $0x230] sm:$0xff]   ;;  %v2947_v19 = vld [vmem:[#allocation2 + $0x60] sm:$0xff] }
 0x193   : > { %5333 = vmatprep.mubr.bf16.mxu0 %v6022_v31  ;;  %v3009_v34 = vpack.c.bf16 %v2948_v30, %v2947_v19  ;;  %v5591_v31 = vld [vmem:[%s6651_s3 + $0x220] sm:$0xff]   ;;  %v3334_v19 = vld [vmem:[#allocation2 + $0x129] sm:$0xff] }
 0x194   : > { %v5595_v30 = vld [vmem:[%s6651_s3 + $0x200] sm:$0xff]  }
 0x199   : > { %5282 = vmatmul.mubr.bf16.gmra.mxu1 %v5889_v15 }
 0x19a   : > { %5334 = vmatmul.mubr.bf16.gmra.mxu0 %v6116_v13  ;;  %5285 = vmatprep.mubr.bf16.mxu1 %v5901_v33  ;;  %v2946_v33 = vld [vmem:[#allocation2 + $0x50] sm:$0xff] }
 0x19b   : > { %5401 = vmatprep.mubr.bf16.mxu0 %v6033_v61  ;;  %v3008_v48 = vpack.c.bf16 %v2946_v33, %v2945_v47  ;;  %v2952_v61 = vld [vmem:[#allocation2 + $0x98] sm:$0xff]  ;;  %v2958_v33 = vld [vmem:[#allocation2 + $0xe0] sm:$0xff] }
 0x19c   : > { %v3011_v6 = vpack.c.bf16 %v2952_v61, %v2951_v3  ;;  %v2960_v47 = vld [vmem:[#allocation2 + $0xf8] sm:$0xff] }
 0x1a1   : > { %5286 = vmatmul.mubr.bf16.gmra.mxu1 %v5897_v25  ;;  %v5115_v45 = vpop.f32.mrf.mxu0 }
 0x1a2   : > { %5402 = vmatmul.mubr.bf16.vlgmr.msra.gmra.mxu0 %v6038_v53  ;;  %5353 = vmatprep.mubr.bf16.mxu1 %v3007_v42  ;;  %v2949_v53 = vld [vmem:[#allocation2 + $0x78] sm:$0xff] }
 0x1a3   : > { %5405 = vmatprep.mubr.bf16.mxu0 %v6050_v60  ;;  %v1271_v15 = vpop.f32.mrf.mxu0  ;;  %5434 = vmatpush3.bf16.msra.mxu0 %v5588_v32  ;;  %v3010_v1 = vpack.c.bf16 %v2950_v43, %v2949_v53 }
 0x1a4   : > { %5435 = vmatprep.subr.bf16.mxu0 %v5589_v11 }
 0x1a5   : > { %v5116_v46 = vpop.f32.mrf.mxu0 }
 0x1a7   : > { %v1274_v25 = vpop.f32.mrf.mxu0  ;;  %5436 = vmatpush3.bf16.msra.mxu0 %v5589_v11 }
 0x1a8   : > { %5437 = vmatprep.subr.bf16.mxu0 %v5590_v14 }
 0x1a9   : > { %v5067_v44 = vpop.f32.mrf.mxu1  ;;  %5354 = vmatmul.mubr.bf16.vlgmr.msra.gmra.mxu1 %v3008_v48  ;;  %v5119_v37 = vpop.f32.mrf.mxu0 }
 0x1aa   : > { %5406 = vmatmul.mubr.bf16.gmra.mxu0 %v6055_v8  ;;  %v6135_v56 = vadd.f32 %v5115_v45, %v5067_v44  ;;  %5489 = vmatpush3.bf16.msra.mxu1 %v5588_v32 }
 0x1ab   : > { %5357 = vmatprep.mubr.bf16.mxu1 %v3009_v34  ;;  %v901_v57 = vpop.f32.mrf.mxu1  ;;  %5482 = vmatprep.subr.bf16.mxu1 %v5589_v11  ;;  %v1287_v58 = vpop.f32.mrf.mxu0  ;;  %v3331_v34 = vld [vmem:[#allocation2 + $0x109] sm:$0xff] }
 0x1ac   : > { %5409 = vmatprep.mubr.bf16.mxu0 %v6072_v18  ;;  %v6138_v51 = vadd.f32 %v1271_v15, %v901_v57  ;;  %5438 = vmatpush3.bf16.msra.mxu0 %v5590_v14  ;;  %v2954_v18 = vld [vmem:[#allocation2 + $0xb0] sm:$0xff] }
 0x1ad   : > { %v5068_v62 = vpop.f32.mrf.mxu1  ;;  %v5120_v63 = vpop.f32.mrf.mxu0  ;;  %5439 = vmatprep.subr.bf16.mxu0 %v5591_v31  ;;  %v3012_v32 = vpack.c.bf16 %v2954_v18, %v2953_v23 }
 0x1ae   : > { %v6140_v0 = vadd.f32 %v5116_v46, %v5068_v62  ;;  %5490 = vmatpush3.bf16.msra.mxu1 %v5589_v11  ;;  %v3387_v62 = vpack.c.bf16 %v3334_v19, %v6109_v26 }
 0x1af   : > { %v904_v59 = vpop.f32.mrf.mxu1  ;;  %v1290_v4 = vpop.f32.mrf.mxu0  ;;  %5483 = vmatprep.subr.bf16.mxu1 %v5590_v14 }
 0x1b0   : > { %v6143_v60 = vadd.f32 %v1274_v25, %v904_v59  ;;  %5440 = vmatpush3.bf16.msra.mxu0 %v5591_v31 }
 0x1b1   : > { %v5071_v8 = vpop.f32.mrf.mxu1  ;;  %5358 = vmatmul.mubr.bf16.gmra.mxu1 %v3010_v1  ;;  %v5123_v2 = vpop.f32.mrf.mxu0  ;;  %5441 = vmatprep.subr.bf16.mxu0 %v5592_v7 }
 0x1b2   : > { %5410 = vmatmul.mubr.bf16.gmra.mxu0 %v3382_v24  ;;  %v6148_v10 = vadd.f32 %v5119_v37, %v5071_v8  ;;  %5361 = vmatprep.mubr.bf16.mxu1 %v3011_v6  ;;  %v3336_v24 = vld [vmem:[#allocation2 + $0x141] sm:$0xff]  ;;  %v3338_v8 = vld [vmem:[#allocation2 + $0x159] sm:$0xff] }
 0x1b3   : > { %5491 = vmatpush3.bf16.msra.mxu1 %v5590_v14  ;;  %v917_v16 = vpop.f32.mrf.mxu1  ;;  %5413 = vmatprep.mubr.bf16.mxu0 %v6091_v29  ;;  %v1303_v28 = vpop.f32.mrf.mxu0  ;;  %v2955_v29 = vld [vmem:[#allocation2 + $0xc0] sm:$0xff]  ;;  %v3332_v14 = vld [vmem:[#allocation2 + $0x111] sm:$0xff]  ;;  %v2964_v6 = vld [vmem:[#allocation2 + $0x128] sm:$0xff] }
 0x1b4   : > { %5484 = vmatprep.subr.bf16.mxu1 %v5591_v31  ;;  %v6154_v5 = vadd.f32 %v1287_v58, %v917_v16  ;;  %5442 = vmatpush3.bf16.msra.mxu0 %v5592_v7  ;;  %v3013_v38 = vpack.c.bf16 %v2956_v21, %v2955_v29  ;;  %v3386_v58 = vpack.c.bf16 %v3332_v14, %v3331_v34  ;;  %v3335_v16 = vld [vmem:[#allocation2 + $0x139] sm:$0xff]  ;;  %v3342_v14 = vld [vmem:[#allocation2 + $0x189] sm:$0xff] }
 0x1b5   : > { %v5072_v17 = vpop.f32.mrf.mxu1  ;;  %v5124_v22 = vpop.f32.mrf.mxu0  ;;  %5443 = vmatprep.subr.bf16.mxu0 %v5593_v12  ;;  %v3388_v21 = vpack.c.bf16 %v3336_v24, %v3335_v16  ;;  %v3017_v27 = vpack.c.bf16 %v2964_v6, %v2963_v20  ;;  %v3684_v16 = vld [vmem:[#allocation2 + $0x3a] sm:$0xff] }
 0x1b6   : > { %v6156_v54 = vadd.f32 %v5120_v63, %v5072_v17 }
 0x1b7   : > { %5492 = vmatpush3.bf16.msra.mxu1 %v5591_v31  ;;  %v920_v50 = vpop.f32.mrf.mxu1  ;;  %v1306_v9 = vpop.f32.mrf.mxu0  ;;  %v2959_v31 = vld [vmem:[#allocation2 + $0xf0] sm:$0xff] }
 0x1b8   : > { %5485 = vmatprep.subr.bf16.mxu1 %v5592_v7  ;;  %v6158_v55 = vadd.f32 %v1290_v4, %v920_v50  ;;  %5444 = vmatpush3.bf16.msra.mxu0 %v5593_v12  ;;  %v3015_v39 = vpack.c.bf16 %v2960_v47, %v2959_v31  ;;  %v2962_v4 = vld [vmem:[#allocation2 + $0x110] sm:$0xff] }
 0x1b9   : > { %v5075_v35 = vpop.f32.mrf.mxu1  ;;  %5362 = vmatmul.mubr.bf16.gmra.mxu1 %v3012_v32  ;;  %v5127_v52 = vpop.f32.mrf.mxu0  ;;  %5445 = vmatprep.subr.bf16.mxu0 %v5594_v40  ;;  %v3339_v47 = vld [vmem:[#allocation2 + $0x169] sm:$0xff] }
 0x1ba   : > { %5414 = vmatmul.mubr.bf16.gmra.mxu0 %v3384_v41  ;;  %v6163_v42 = vadd.f32 %v5123_v2, %v5075_v35  ;;  %5365 = vmatprep.mubr.bf16.mxu1 %v3013_v38  ;;  %v2966_v35 = vld [vmem:[#allocation2 + $0x140] sm:$0xff] }
 0x1bb   : > { %5417 = vmatprep.mubr.bf16.mxu0 %v6103_v36  ;;  %v933_v11 = vpop.f32.mrf.mxu1  ;;  %v1319_v45 = vpop.f32.mrf.mxu0  ;;  %5493 = vmatpush3.bf16.msra.mxu1 %v5592_v7  ;;  %v2957_v36 = vld [vmem:[#allocation2 + $0xd8] sm:$0xff] }
 0x1bc   : > { %v6166_v15 = vadd.f32 %v1303_v28, %v933_v11  ;;  %5486 = vmatprep.subr.bf16.mxu1 %v5593_v12  ;;  %v3014_v37 = vpack.c.bf16 %v2958_v33, %v2957_v36  ;;  %5446 = vmatpush3.bf16.msra.mxu0 %v5594_v40  ;;  %v2967_v36 = vld [vmem:[#allocation2 + $0x150] sm:$0xff] }
 0x1bd   : > { %v5076_v46 = vpop.f32.mrf.mxu1  ;;  %v5128_v48 = vpop.f32.mrf.mxu0  ;;  %5447 = vmatprep.subr.bf16.mxu0 %v5595_v30 }
 0x1be   : > { %v6171_v25 = vadd.f32 %v5124_v22, %v5076_v46  ;;  %v3337_v22 = vld [vmem:[#allocation2 + $0x151] sm:$0xff] }
 0x1bf   : > { %v936_v44 = vpop.f32.mrf.mxu1  ;;  %v1322_v57 = vpop.f32.mrf.mxu0  ;;  %5494 = vmatpush3.bf16.msra.mxu1 %v5593_v12  ;;  %v2961_v12 = vld [vmem:[#allocation2 + $0x108] sm:$0xff]  ;;  %v3389_v50 = vpack.c.bf16 %v3338_v8, %v3337_v22  ;;  %v2965_v46 = vld [vmem:[#allocation2 + $0x138] sm:$0xff] }
 0x1c0   : > { %v6173_v43 = vadd.f32 %v1306_v9, %v936_v44  ;;  %5487 = vmatprep.subr.bf16.mxu1 %v5594_v40  ;;  %5448 = vmatpush3.bf16.msra.mxu0 %v5595_v30  ;;  %v3016_v18 = vpack.c.bf16 %v2962_v4, %v2961_v12  ;;  %v3018_v19 = vpack.c.bf16 %v2966_v35, %v2965_v46  ;;  %v3683_v12 = vld [vmem:[#allocation2 + $0x32] sm:$0xff]  ;;  %v3687_v46 = vld [vmem:[#allocation2 + $0x62] sm:$0xff] }
 0x1c1   : > { %v5079_v61 = vpop.f32.mrf.mxu1  ;;  %5366 = vmatmul.mubr.bf16.gmra.mxu1 %v3014_v37  ;;  %v3341_v37 = vld [vmem:[#allocation2 + $0x181] sm:$0xff] }
 0x1c2   : > { %v5131_v63 = vpop.f32.mrf.mxu0  ;;  %5418 = vmatmul.mubr.bf16.gmra.mxu0 %v3386_v58  ;;  %v6176_v53 = vadd.f32 %v5127_v52, %v5079_v61  ;;  %5369 = vmatprep.mubr.bf16.mxu1 %v3015_v39  ;;  %v3340_v52 = vld [vmem:[#allocation2 + $0x171] sm:$0xff]  ;;  %v3391_v58 = vpack.c.bf16 %v3342_v14, %v3341_v37 }
 0x1c3   : > { %5421 = vmatprep.mubr.bf16.mxu0 %v3387_v62  ;;  %v949_v59 = vpop.f32.mrf.mxu1  ;;  %5495 = vmatpush3.bf16.msra.mxu1 %v5594_v40  ;;  %v3390_v44 = vpack.c.bf16 %v3340_v52, %v3339_v47  ;;  %v3685_v52 = vld [vmem:[#allocation2 + $0x4a] sm:$0xff] }
 0x1c4   : > { %v1335_v1 = vpop.f32.mrf.mxu0  ;;  %v6178_v3 = vadd.f32 %v1319_v45, %v949_v59  ;;  %5488 = vmatprep.subr.bf16.mxu1 %v5595_v30  ;;  %v2968_v45 = vld [vmem:[#allocation2 + $0x158] sm:$0xff]  ;;  %v3344_v59 = vld [vmem:[#allocation2 + $0x1a1] sm:$0xff]  ;;  %v3688_v47 = vld [vmem:[#allocation2 + $0x6a] sm:$0xff] }
 0x1c5   : > { %v5080_v26 = vpop.f32.mrf.mxu1 }
 0x1c6   : > { %v5132_v7 = vpop.f32.mrf.mxu0  ;;  %v6180_v2 = vadd.f32 %v5128_v48, %v5080_v26  ;;  %v2970_v26 = vld [vmem:[#allocation2 + $0x170] sm:$0xff] }
 0x1c7   : > { %v952_v28 = vpop.f32.mrf.mxu1  ;;  %5496 = vmatpush3.bf16.msra.mxu1 %v5595_v30 }
 0x1c8   : > { %v1338_v17 = vpop.f32.mrf.mxu0  ;;  %v6182_v23 = vadd.f32 %v1322_v57, %v952_v28  ;;  %v3019_v57 = vpack.c.bf16 %v2968_v45, %v2967_v36 }
 0x1c9   : > { %v5083_v32 = vpop.f32.mrf.mxu1  ;;  %5370 = vmatmul.mubr.bf16.gmra.mxu1 %v3016_v18  ;;  %v2969_v18 = vld [vmem:[#allocation2 + $0x168] sm:$0xff] }
 0x1ca   : > { %v5135_v29 = vpop.f32.mrf.mxu0  ;;  %5422 = vmatmul.mubr.bf16.gmra.mxu0 %v3388_v21  ;;  %v6184_v9 = vadd.f32 %v5131_v63, %v5083_v32  ;;  %5373 = vmatprep.mubr.bf16.mxu1 %v3017_v27  ;;  %v3343_v63 = vld [vmem:[#allocation2 + $0x199] sm:$0xff]  ;;  %v3747_v27 = vpack.c.bf16 %v3684_v16, %v3683_v12 }
 0x1cb   : > { %5425 = vmatprep.mubr.bf16.mxu0 %v3389_v50  ;;  %v965_v41 = vpop.f32.mrf.mxu1  ;;  %v3392_v8 = vpack.c.bf16 %v3344_v59, %v3343_v63 }
 0x1cc   : > { %v1351_v38 = vpop.f32.mrf.mxu0  ;;  %v6186_v40 = vadd.f32 %v1335_v1, %v965_v41 }
 0x1cd   : > { %v5084_v11 = vpop.f32.mrf.mxu1 }
 0x1ce   : > { %v5136_v33 = vpop.f32.mrf.mxu0  ;;  %v6188_v30 = vadd.f32 %v5132_v7, %v5084_v11  ;;  %v3686_v11 = vld [vmem:[#allocation2 + $0x52] sm:$0xff] }
 0x1cf   : > { %v968_v48 = vpop.f32.mrf.mxu1 }
 0x1d0   : > { %v1354_v34 = vpop.f32.mrf.mxu0  ;;  %v6190_v31 = vadd.f32 %v1338_v17, %v968_v48  ;;  %v3020_v17 = vpack.c.bf16 %v2970_v26, %v2969_v18 }
 0x1d1   : > { %v5087_v39 = vpop.f32.mrf.mxu1  ;;  %5374 = vmatmul.mubr.bf16.gmra.mxu1 %v3018_v19 }
 0x1d2   : > { %v5139_v62 = vpop.f32.mrf.mxu0  ;;  %5426 = vmatmul.mubr.bf16.gmra.mxu0 %v3390_v44  ;;  %v6192_v61 = vadd.f32 %v5135_v29, %v5087_v39  ;;  %5377 = vmatprep.mubr.bf16.mxu1 %v3019_v57  ;;  %v3748_v44 = vpack.c.bf16 %v3686_v11, %v3685_v52 }
 0x1d3   : > { %5429 = vmatprep.mubr.bf16.mxu0 %v3391_v58  ;;  %v981_v1 = vpop.f32.mrf.mxu1 }
 0x1d4   : > { %v1367_v4 = vpop.f32.mrf.mxu0  ;;  %v6194_v24 = vadd.f32 %v1351_v38, %v981_v1  ;;  %v3689_v1 = vld [vmem:[#allocation2 + $0x7a] sm:$0xff] }
 0x1d5   : > { %v5088_v6 = vpop.f32.mrf.mxu1 }
 0x1d6   : > { %v5140_v7 = vpop.f32.mrf.mxu0  ;;  %v6196_v28 = vadd.f32 %v5136_v33, %v5088_v6  ;;  %v5596_v33 = vld [vmem:[#allocation2] sm:$0xff]  ;;  %v3691_v6 = vld [vmem:[#allocation2 + $0x92] sm:$0xff] }
 0x1d7   : > { %v984_v20 = vpop.f32.mrf.mxu1  ;;  %v3022_v14 = vpack.c.bf16 %v5596_v33, %v5596_v33  ;;  %v3694_v33 = vld [vmem:[#allocation2 + $0xb2] sm:$0xff] }
 0x1d8   : > { %v1370_v21 = vpop.f32.mrf.mxu0  ;;  %v6198_v22 = vadd.f32 %v1354_v34, %v984_v20 }
 0x1d9   : > { %v5091_v50 = vpop.f32.mrf.mxu1  ;;  %5378 = vmatmul.mubr.bf16.gmra.mxu1 %v3020_v17 }
 0x1da   : > { %v5143_v32 = vpop.f32.mrf.mxu0  ;;  %5430 = vmatmul.mubr.bf16.gmra.mxu0 %v3392_v8  ;;  %v6200_v29 = vadd.f32 %v5139_v62, %v5091_v50  ;;  %5381 = vmatprep.mubr.bf16.mxu1 %v6014_v49  ;;  %v3749_v49 = vpack.c.bf16 %v3688_v47, %v3687_v46  ;;  %v3695_v46 = vld [vmem:[#allocation2 + $0xc2] sm:$0xff]  ;;  %v3696_v47 = vld [vmem:[#allocation2 + $0xca] sm:$0xff] }
 0x1db   : > { %5449 = vmatprep.mubr.bf16.mxu0 %v3747_v27  ;;  %v997_v41 = vpop.f32.mrf.mxu1 }
 0x1dc   : > { %v1383_v38 = vpop.f32.mrf.mxu0  ;;  %v6203_v35 = vadd.f32 %v1367_v4, %v997_v41  ;;  %v3690_v4 = vld [vmem:[#allocation2 + $0x82] sm:$0xff] }
 0x1dd   : > { %v5092_v45 = vpop.f32.mrf.mxu1  ;;  %v3750_v18 = vpack.c.bf16 %v3690_v4, %v3689_v1 }
 0x1de   : > { %v5144_v48 = vpop.f32.mrf.mxu0  ;;  %v6205_v19 = vadd.f32 %v5140_v7, %v5092_v45  ;;  %v3692_v7 = vld [vmem:[#allocation2 + $0x9a] sm:$0xff]  ;;  %v3693_v45 = vld [vmem:[#allocation2 + $0xaa] sm:$0xff] }
 0x1df   : > { %v1000_v36 = vpop.f32.mrf.mxu1 }
 0x1e0   : > { %v1386_v34 = vpop.f32.mrf.mxu0  ;;  %v6207_v37 = vadd.f32 %v1370_v21, %v1000_v36  ;;  %v3751_v21 = vpack.c.bf16 %v3692_v7, %v3691_v6 }
 0x1e1   : > { %v5095_v57 = vpop.f32.mrf.mxu1  ;;  %5382 = vmatmul.mubr.bf16.gmra.mxu1 %v3022_v14 }
 0x1e2   : > { %v5211_v58 = vpop.f32.mrf.mxu0  ;;  %5450 = vmatmul.mubr.bf16.vlgmr.msra.gmra.mxu0 %v3748_v44  ;;  %v6209_v39 = vadd.f32 %v5143_v32, %v5095_v57  ;;  %5453 = vmatprep.mubr.bf16.mxu1 %v3749_v49  ;;  %v3752_v49 = vpack.c.bf16 %v3694_v33, %v3693_v45 }
 0x1e3   : > { %v1013_v62 = vpop.f32.mrf.mxu1 }
 0x1e4   : > { %v2011_v63 = vpop.f32.mrf.mxu0  ;;  %v6211_v59 = vadd.f32 %v1383_v38, %v1013_v62  ;;  %v3753_v62 = vpack.c.bf16 %v3696_v47, %v3695_v46 }
 0x1e5   : > { %v5096_v26 = vpop.f32.mrf.mxu1 }
 0x1e6   : > { %v5212_v8 = vpop.f32.mrf.mxu0  ;;  %v6213_v12 = vadd.f32 %v5144_v48, %v5096_v26 }
 0x1e7   : > { %v1016_v16 = vpop.f32.mrf.mxu1 }
 0x1e8   : > { %v2014_v20 = vpop.f32.mrf.mxu0  ;;  %v6215_v17 = vadd.f32 %v1386_v34, %v1016_v16  ;;  %v3697_v16 = vld [vmem:[#allocation2 + $0xda] sm:$0xff] }
 0x1e9   : > { %v5163_v27 = vpop.f32.mrf.mxu1  ;;  %5454 = vmatmul.mubr.bf16.vlgmr.msra.gmra.mxu1 %v3750_v18 }
 0x1ea   : > { %v5215_v50 = vpop.f32.mrf.mxu0  ;;  %v1770_v32 = vadd.f32 %v5163_v27, %v6135_v56  ;;  %5457 = vmatprep.mubr.bf16.mxu1 %v3751_v21  ;;  %v3699_v21 = vld [vmem:[#allocation2 + $0xf2] sm:$0xff] }
 0x1eb   : > { %v1641_v41 = vpop.f32.mrf.mxu1 }
 0x1ec   : > { %v2027_v38 = vpop.f32.mrf.mxu0  ;;  %v6218_v52 = vadd.f32 %v5211_v58, %v1770_v32  ;;  %v1768_v11 = vadd.f32 %v1641_v41, %v6138_v51 }
 0x1ed   : > { %v5164_v14 = vpop.f32.mrf.mxu1 }
 0x1ee   : > { %v5216_v48 = vpop.f32.mrf.mxu0  ;;  %v6221_v36 = vadd.f32 %v2011_v63, %v1768_v11  ;;  %v1771_v34 = vadd.f32 %v5164_v14, %v6140_v0 }
 0x1ef   : > { %v1644_v44 = vpop.f32.mrf.mxu1 }
 0x1f0   : > { %v2030_v56 = vpop.f32.mrf.mxu0  ;;  %v6224_v57 = vadd.f32 %v5212_v8, %v1771_v34  ;;  %v1769_v58 = vadd.f32 %v1644_v44, %v6143_v60  ;;  %v3698_v8 = vld [vmem:[#allocation2 + $0xe2] sm:$0xff]  ;;  %v3700_v60 = vld [vmem:[#allocation2 + $0xfa] sm:$0xff] }
 0x1f1   : > { %v5167_v1 = vpop.f32.mrf.mxu1  ;;  %5458 = vmatmul.mubr.bf16.gmra.mxu1 %v3752_v49  ;;  %v3754_v11 = vpack.c.bf16 %v3698_v8, %v3697_v16  ;;  %v3755_v33 = vpack.c.bf16 %v3700_v60, %v3699_v21  ;;  %v3701_v49 = vld [vmem:[#allocation2 + $0x10a] sm:$0xff] }
 0x1f2   : > { %v5219_v51 = vpop.f32.mrf.mxu0  ;;  %v6227_v4 = vadd.f32 %v2014_v20, %v1769_v58  ;;  %v1774_v26 = vadd.f32 %v5167_v1, %v6148_v10  ;;  %5461 = vmatprep.mubr.bf16.mxu1 %v3753_v62  ;;  %v3703_v62 = vld [vmem:[#allocation2 + $0x122] sm:$0xff] }
 0x1f3   : > { %v1657_v63 = vpop.f32.mrf.mxu1 }
 0x1f4   : > { %v2043_v6 = vpop.f32.mrf.mxu0  ;;  %v6230_v7 = vadd.f32 %v5215_v50, %v1774_v26  ;;  %v1772_v0 = vadd.f32 %v1657_v63, %v6154_v5 }
 0x1f5   : > { %v5168_v18 = vpop.f32.mrf.mxu1 }
 0x1f6   : > { %v5220_v27 = vpop.f32.mrf.mxu0  ;;  %v6233_v32 = vadd.f32 %v2027_v38, %v1772_v0  ;;  %v1775_v20 = vadd.f32 %v5168_v18, %v6156_v54 }
 0x1f7   : > { %v1660_v41 = vpop.f32.mrf.mxu1 }
 0x1f8   : > { %v2046_v10 = vpop.f32.mrf.mxu0  ;;  %v6236_v45 = vadd.f32 %v5216_v48, %v1775_v20  ;;  %v1773_v50 = vadd.f32 %v1660_v41, %v6158_v55  ;;  %v3702_v48 = vld [vmem:[#allocation2 + $0x112] sm:$0xff]  ;;  %v3704_v55 = vld [vmem:[#allocation2 + $0x12a] sm:$0xff] }
 0x1f9   : > { %v5171_v14 = vpop.f32.mrf.mxu1  ;;  %5462 = vmatmul.mubr.bf16.gmra.mxu1 %v3754_v11  ;;  %v3756_v0 = vpack.c.bf16 %v3702_v48, %v3701_v49  ;;  %v3757_v8 = vpack.c.bf16 %v3704_v55, %v3703_v62  ;;  %v3705_v11 = vld [vmem:[#allocation2 + $0x13a] sm:$0xff] }
 0x1fa   : > { %v5223_v5 = vpop.f32.mrf.mxu0  ;;  %v6239_v46 = vadd.f32 %v2030_v56, %v1773_v50  ;;  %v1778_v47 = vadd.f32 %v5171_v14, %v6163_v42  ;;  %5465 = vmatprep.mubr.bf16.mxu1 %v3755_v33  ;;  %v3707_v33 = vld [vmem:[#allocation2 + $0x152] sm:$0xff] }
 0x1fb   : > { %v1673_v38 = vpop.f32.mrf.mxu1 }
 0x1fc   : > { %v2059_v34 = vpop.f32.mrf.mxu0  ;;  %v6242_v44 = vadd.f32 %v5219_v51, %v1778_v47  ;;  %v1776_v54 = vadd.f32 %v1673_v38, %v6166_v15 }
 0x1fd   : > { %v5172_v58 = vpop.f32.mrf.mxu1 }
 0x1fe   : > { %v5224_v1 = vpop.f32.mrf.mxu0  ;;  %v6245_v26 = vadd.f32 %v2043_v6, %v1776_v54  ;;  %v1779_v56 = vadd.f32 %v5172_v58, %v6171_v25 }
 0x1ff   : > { %v1676_v63 = vpop.f32.mrf.mxu1 }
 0x200   : > { %v2062_v42 = vpop.f32.mrf.mxu0  ;;  %v6248_v16 = vadd.f32 %v5220_v27, %v1779_v56  ;;  %v1777_v51 = vadd.f32 %v1676_v63, %v6173_v43  ;;  %v3706_v27 = vld [vmem:[#allocation2 + $0x142] sm:$0xff]  ;;  %v3708_v43 = vld [vmem:[#allocation2 + $0x15a] sm:$0xff] }
 0x201   : > { %v5175_v18 = vpop.f32.mrf.mxu1  ;;  %5466 = vmatmul.mubr.bf16.gmra.mxu1 %v3756_v0  ;;  %v3758_v54 = vpack.c.bf16 %v3706_v27, %v3705_v11  ;;  %v3759_v48 = vpack.c.bf16 %v3708_v43, %v3707_v33  ;;  %v3709_v0 = vld [vmem:[#allocation2 + $0x16a] sm:$0xff] }
 0x202   : > { %v5227_v15 = vpop.f32.mrf.mxu0  ;;  %v6251_v21 = vadd.f32 %v2046_v10, %v1777_v51  ;;  %v1782_v60 = vadd.f32 %v5175_v18, %v6176_v53  ;;  %5469 = vmatprep.mubr.bf16.mxu1 %v3757_v8 }
 0x203   : > { %v1689_v6 = vpop.f32.mrf.mxu1 }
 0x204   : > { %v2075_v20 = vpop.f32.mrf.mxu0  ;;  %v6254_v41 = vadd.f32 %v5223_v5, %v1782_v60  ;;  %v1780_v25 = vadd.f32 %v1689_v6, %v6178_v3 }
 0x205   : > { %v5176_v50 = vpop.f32.mrf.mxu1 }
 0x206   : > { %v5228_v14 = vpop.f32.mrf.mxu0  ;;  %v6257_v47 = vadd.f32 %v2059_v34, %v1780_v25  ;;  %v1783_v10 = vadd.f32 %v5176_v50, %v6180_v2  ;;  %v3714_v50 = vld [vmem:[#allocation2 + $0x1a2] sm:$0xff] }
 0x207   : > { %v1692_v38 = vpop.f32.mrf.mxu1 }
 0x208   : > { %v2078_v53 = vpop.f32.mrf.mxu0  ;;  %v6260_v49 = vadd.f32 %v5224_v1, %v1783_v10  ;;  %v1781_v5 = vadd.f32 %v1692_v38, %v6182_v23  ;;  %v3710_v1 = vld [vmem:[#allocation2 + $0x172] sm:$0xff] }
 0x209   : > { %v5179_v58 = vpop.f32.mrf.mxu1  ;;  %5470 = vmatmul.mubr.bf16.gmra.mxu1 %v3758_v54 }
 0x20a   : > { %v5231_v3 = vpop.f32.mrf.mxu0  ;;  %v6263_v62 = vadd.f32 %v2062_v42, %v1781_v5  ;;  %v1786_v55 = vadd.f32 %v5179_v58, %v6184_v9  ;;  %5473 = vmatprep.mubr.bf16.mxu1 %v3759_v48  ;;  %v3760_v42 = vpack.c.bf16 %v3710_v1, %v3709_v0 }
 0x20b   : > { %v1705_v34 = vpop.f32.mrf.mxu1 }
 0x20c   : > { %v2091_v56 = vpop.f32.mrf.mxu0  ;;  %v6266_v63 = vadd.f32 %v5227_v15, %v1786_v55  ;;  %v1784_v2 = vadd.f32 %v1705_v34, %v6186_v40 }
 0x20d   : > { %v5180_v51 = vpop.f32.mrf.mxu1 }
 0x20e   : > { %v5232_v8 = vpop.f32.mrf.mxu0  ;;  %v6269_v23 = vadd.f32 %v2075_v20, %v1784_v2  ;;  %v1787_v18 = vadd.f32 %v5180_v51, %v6188_v30  ;;  %v3713_v20 = vld [vmem:[#allocation2 + $0x19a] sm:$0xff] }
 0x20f   : > { %v1708_v60 = vpop.f32.mrf.mxu1  ;;  %v3762_v38 = vpack.c.bf16 %v3714_v50, %v3713_v20 }
 0x210   : > { %v2094_v6 = vpop.f32.mrf.mxu0  ;;  %v6272_v25 = vadd.f32 %v5228_v14, %v1787_v18  ;;  %v1785_v9 = vadd.f32 %v1708_v60, %v6190_v31 }
 0x211   : > { %v5183_v11 = vpop.f32.mrf.mxu1  ;;  %5474 = vmatmul.mubr.bf16.gmra.mxu1 %v3760_v42 }
 0x212   : > { %v5235_v15 = vpop.f32.mrf.mxu0  ;;  %v6275_v27 = vadd.f32 %v2078_v53, %v1785_v9  ;;  %v1790_v40 = vadd.f32 %v5183_v11, %v6192_v61  ;;  %5477 = vmatprep.mubr.bf16.mxu1 %v6116_v13 }
 0x213   : > { %v1721_v33 = vpop.f32.mrf.mxu1 }
 0x214   : > { %v2107_v30 = vpop.f32.mrf.mxu0  ;;  %v6279_v43 = vadd.f32 %v5231_v3, %v1790_v40  ;;  %v1788_v14 = vadd.f32 %v1721_v33, %v6194_v24 }
 0x215   : > { %v5184_v10 = vpop.f32.mrf.mxu1 }
 0x216   : > { %v5236_v31 = vpop.f32.mrf.mxu0  ;;  %v6282_v54 = vadd.f32 %v2091_v56, %v1788_v14  ;;  %v1791_v53 = vadd.f32 %v5184_v10, %v6196_v28 }
 0x217   : > { %v1724_v5 = vpop.f32.mrf.mxu1 }
 0x218   : > { %v2110_v48 = vpop.f32.mrf.mxu0  ;;  %v6285_v61 = vadd.f32 %v5232_v8, %v1791_v53  ;;  %v1789_v13 = vadd.f32 %v1724_v5, %v6198_v22 }
 0x219   : > { %v5187_v58 = vpop.f32.mrf.mxu1  ;;  %5478 = vmatmul.mubr.bf16.gmra.mxu1 %v3762_v38 }
 0x21a   : > { %v5239_v55 = vpop.f32.mrf.mxu0  ;;  %v6288_v3 = vadd.f32 %v2094_v6, %v1789_v13  ;;  %v1794_v24 = vadd.f32 %v5187_v58, %v6200_v29 }
 0x21b   : > { %v1737_v34 = vpop.f32.mrf.mxu1 }
 0x21c   : > { %v2123_v2 = vpop.f32.mrf.mxu0  ;;  %v6291_v0 = vadd.f32 %v5235_v15, %v1794_v24  ;;  %v1792_v56 = vadd.f32 %v1737_v34, %v6203_v35 }
 0x21d   : > { %v5188_v28 = vpop.f32.mrf.mxu1 }
 0x21e   : > { %v5240_v1 = vpop.f32.mrf.mxu0  ;;  %v6294_v51 = vadd.f32 %v2107_v30, %v1792_v56  ;;  %v1795_v8 = vadd.f32 %v5188_v28, %v6205_v19 }
 0x21f   : > { %v1740_v22 = vpop.f32.mrf.mxu1 }
 0x220   : > { %v2126_v18 = vpop.f32.mrf.mxu0  ;;  %v6297_v60 = vadd.f32 %v5236_v31, %v1795_v8  ;;  %v1793_v42 = vadd.f32 %v1740_v22, %v6207_v37 }
 0x221   : > { %v5191_v6 = vpop.f32.mrf.mxu1 }
 0x222   : > { %v5307_v29 = vpop.f32.mrf.mxu0  ;;  %v6300_v9 = vadd.f32 %v2110_v48, %v1793_v42  ;;  %v1798_v11 = vadd.f32 %v5191_v6, %v6209_v39 }
 0x223   : > { %v1753_v15 = vpop.f32.mrf.mxu1 }
 0x224   : > { %v2751_v35 = vpop.f32.mrf.mxu0  ;;  %v6303_v40 = vadd.f32 %v5239_v55, %v1798_v11  ;;  %v1796_v20 = vadd.f32 %v1753_v15, %v6211_v59 }
 0x225   : > { %v5192_v50 = vpop.f32.mrf.mxu1 }
 0x226   : > { %v5308_v19 = vpop.f32.mrf.mxu0  ;;  %v6306_v33 = vadd.f32 %v2123_v2, %v1796_v20  ;;  %v1799_v30 = vadd.f32 %v5192_v50, %v6213_v12 }
 0x227   : > { %v1756_v14 = vpop.f32.mrf.mxu1 }
 0x228   : > { %v2754_v37 = vpop.f32.mrf.mxu0  ;;  %v6309_v10 = vadd.f32 %v5240_v1, %v1799_v30  ;;  %v1797_v38 = vadd.f32 %v1756_v14, %v6215_v17 }
 0x229   : > { %v5259_v31 = vpop.f32.mrf.mxu1 }
 0x22a   : > { %v5311_v39 = vpop.f32.mrf.mxu0  ;;  %v6312_v53 = vadd.f32 %v2126_v18, %v1797_v38  ;;  %v2510_v5 = vadd.f32 %v5259_v31, %v6218_v52 }
 0x22b   : > { %v2381_v48 = vpop.f32.mrf.mxu1 }
 0x22c   : > { %v2767_v59 = vpop.f32.mrf.mxu0  ;;  %v6315_v13 = vadd.f32 %v5307_v29, %v2510_v5  ;;  %v2508_v58 = vadd.f32 %v2381_v48, %v6221_v36 }
 0x22d   : > { %v5260_v55 = vpop.f32.mrf.mxu1 }
 0x22e   : > { %v5312_v12 = vpop.f32.mrf.mxu0  ;;  %v6318_v24 = vadd.f32 %v2751_v35, %v2508_v58  ;;  %v2511_v34 = vadd.f32 %v5260_v55, %v6224_v57 }
 0x22f   : > { %v2384_v2 = vpop.f32.mrf.mxu1 }
 0x230   : > { %v2770_v17 = vpop.f32.mrf.mxu0  ;;  %v6321_v56 = vadd.f32 %v5308_v19, %v2511_v34  ;;  %v2509_v28 = vadd.f32 %v2384_v2, %v6227_v4 }
 0x231   : > { %v5263_v1 = vpop.f32.mrf.mxu1 }
 0x232   : > { %v5315_v52 = vpop.f32.mrf.mxu0  ;;  %v6324_v8 = vadd.f32 %v2754_v37, %v2509_v28  ;;  %v2514_v22 = vadd.f32 %v5263_v1, %v6230_v7 }
 0x233   : > { %v2397_v18 = vpop.f32.mrf.mxu1 }
 0x234   : > { %v2783_v36 = vpop.f32.mrf.mxu0  ;;  %v6327_v42 = vadd.f32 %v5311_v39, %v2514_v22  ;;  %v2512_v6 = vadd.f32 %v2397_v18, %v6233_v32 }
 0x235   : > { %v5264_v29 = vpop.f32.mrf.mxu1 }
 0x236   : > { %v5316_v57 = vpop.f32.mrf.mxu0  ;;  %v6330_v11 = vadd.f32 %v2767_v59, %v2512_v6  ;;  %v2515_v15 = vadd.f32 %v5264_v29, %v6236_v45 }
 0x237   : > { %v2400_v35 = vpop.f32.mrf.mxu1 }
 0x238   : > { %v2786_v4 = vpop.f32.mrf.mxu0  ;;  %v6333_v20 = vadd.f32 %v5312_v12, %v2515_v15  ;;  %v2513_v50 = vadd.f32 %v2400_v35, %v6239_v46 }
 0x239   : > { %v5267_v19 = vpop.f32.mrf.mxu1 }
 0x23a   : > { %v5319_v7 = vpop.f32.mrf.mxu0  ;;  %v6336_v30 = vadd.f32 %v2770_v17, %v2513_v50  ;;  %v2518_v14 = vadd.f32 %v5267_v19, %v6242_v44 }
 0x23b   : > { %v2413_v37 = vpop.f32.mrf.mxu1 }
 0x23c   : > { %v2799_v32 = vpop.f32.mrf.mxu0  ;;  %v6339_v38 = vadd.f32 %v5315_v52, %v2518_v14  ;;  %v2516_v31 = vadd.f32 %v2413_v37, %v6245_v26 }
 0x23d   : > { %v5268_v39 = vpop.f32.mrf.mxu1 }
 0x23e   : > { %v5320_v45 = vpop.f32.mrf.mxu0  ;;  %v6342_v5 = vadd.f32 %v2783_v36, %v2516_v31  ;;  %v2519_v48 = vadd.f32 %v5268_v39, %v6248_v16 }
 0x23f   : > { %v2416_v59 = vpop.f32.mrf.mxu1 }
 0x240   : > { %v2802_v46 = vpop.f32.mrf.mxu0  ;;  %v6345_v58 = vadd.f32 %v5316_v57, %v2519_v48  ;;  %v2517_v55 = vadd.f32 %v2416_v59, %v6251_v21 }
 0x241   : > { %v5271_v12 = vpop.f32.mrf.mxu1 }
 0x242   : > { %v5323_v44 = vpop.f32.mrf.mxu0  ;;  %v6348_v34 = vadd.f32 %v2786_v4, %v2517_v55  ;;  %v2522_v2 = vadd.f32 %v5271_v12, %v6254_v41 }
 0x243   : > { %v2429_v17 = vpop.f32.mrf.mxu1 }
 0x244   : > { %v2815_v26 = vpop.f32.mrf.mxu0  ;;  %v6351_v28 = vadd.f32 %v5319_v7, %v2522_v2  ;;  %v2520_v1 = vadd.f32 %v2429_v17, %v6257_v47 }
 0x245   : > { %v5272_v52 = vpop.f32.mrf.mxu1 }
 0x246   : > { %v5324_v16 = vpop.f32.mrf.mxu0  ;;  %v6354_v22 = vadd.f32 %v2799_v32, %v2520_v1  ;;  %v2523_v18 = vadd.f32 %v5272_v52, %v6260_v49 }
 0x247   : > { %v2432_v36 = vpop.f32.mrf.mxu1 }
 0x248   : > { %v2818_v21 = vpop.f32.mrf.mxu0  ;;  %v6357_v6 = vadd.f32 %v5320_v45, %v2523_v18  ;;  %v2521_v29 = vadd.f32 %v2432_v36, %v6263_v62 }
 0x249   : > { %v5275_v57 = vpop.f32.mrf.mxu1 }
 0x24a   : > { %v5327_v41 = vpop.f32.mrf.mxu0  ;;  %v6360_v15 = vadd.f32 %v2802_v46, %v2521_v29  ;;  %v2526_v35 = vadd.f32 %v5275_v57, %v6266_v63 }
 0x24b   : > { %v2445_v4 = vpop.f32.mrf.mxu1 }
 0x24c   : > { %v2831_v47 = vpop.f32.mrf.mxu0  ;;  %v6363_v50 = vadd.f32 %v5323_v44, %v2526_v35  ;;  %v2524_v19 = vadd.f32 %v2445_v4, %v6269_v23 }
 0x24d   : > { %v5276_v7 = vpop.f32.mrf.mxu1 }
 0x24e   : > { %v5328_v49 = vpop.f32.mrf.mxu0  ;;  %v6366_v14 = vadd.f32 %v2815_v26, %v2524_v19  ;;  %v2527_v37 = vadd.f32 %v5276_v7, %v6272_v25 }
 0x24f   : > { %v2448_v32 = vpop.f32.mrf.mxu1 }
 0x250   : > { %v2834_v62 = vpop.f32.mrf.mxu0  ;;  %v6369_v31 = vadd.f32 %v5324_v16, %v2527_v37  ;;  %v2525_v39 = vadd.f32 %v2448_v32, %v6275_v27 }
 0x251   : > { %v5279_v45 = vpop.f32.mrf.mxu1 }
 0x252   : > { %v5331_v63 = vpop.f32.mrf.mxu0  ;;  %v6372_v48 = vadd.f32 %v2818_v21, %v2525_v39  ;;  %v2530_v59 = vadd.f32 %v5279_v45, %v6279_v43 }
 0x253   : > { %v2461_v46 = vpop.f32.mrf.mxu1 }
 0x254   : > { %v2847_v23 = vpop.f32.mrf.mxu0  ;;  %v6375_v55 = vadd.f32 %v5327_v41, %v2530_v59  ;;  %v2528_v12 = vadd.f32 %v2461_v46, %v6282_v54 }
 0x255   : > { %v5280_v44 = vpop.f32.mrf.mxu1 }
 0x256   : > { %v5332_v25 = vpop.f32.mrf.mxu0  ;;  %v6378_v2 = vadd.f32 %v2831_v47, %v2528_v12  ;;  %v2531_v17 = vadd.f32 %v5280_v44, %v6285_v61 }
 0x257   : > { %v2464_v26 = vpop.f32.mrf.mxu1 }
 0x258   : > { %v2850_v27 = vpop.f32.mrf.mxu0  ;;  %v6381_v1 = vadd.f32 %v5328_v49, %v2531_v17  ;;  %v2529_v52 = vadd.f32 %v2464_v26, %v6288_v3 }
 0x259   : > { %v5283_v16 = vpop.f32.mrf.mxu1 }
 0x25a   : > { %v5335_v43 = vpop.f32.mrf.mxu0  ;;  %v6384_v18 = vadd.f32 %v2834_v62, %v2529_v52  ;;  %v2534_v36 = vadd.f32 %v5283_v16, %v6291_v0 }
 0x25b   : > { %v2477_v21 = vpop.f32.mrf.mxu1 }
 0x25c   : > { %v2863_v54 = vpop.f32.mrf.mxu0  ;;  %v6387_v29 = vadd.f32 %v5331_v63, %v2534_v36  ;;  %v2532_v57 = vadd.f32 %v2477_v21, %v6294_v51 }
 0x25d   : > { %v5284_v41 = vpop.f32.mrf.mxu1 }
 0x25e   : > { %v5336_v61 = vpop.f32.mrf.mxu0  ;;  %v6390_v35 = vadd.f32 %v2847_v23, %v2532_v57  ;;  %v2535_v4 = vadd.f32 %v5284_v41, %v6297_v60 }
 0x25f   : > { %v2480_v47 = vpop.f32.mrf.mxu1 }
 0x260   : > { %v2866_v3 = vpop.f32.mrf.mxu0  ;;  %v6393_v19 = vadd.f32 %v5332_v25, %v2535_v4  ;;  %v2533_v7 = vadd.f32 %v2480_v47, %v6300_v9 }
 0x261   : > { %v5287_v49 = vpop.f32.mrf.mxu1 }
 0x262   : > { %6654 = vst [vmem:[#allocation4_spill] sm:$0xff] %v6393_v19  ;;  %v5403_v0 = vpop.f32.mrf.mxu0  ;;  %v6396_v37 = vadd.f32 %v2850_v27, %v2533_v7  ;;  %v2538_v32 = vadd.f32 %v5287_v49, %v6303_v40 }
 0x263   : > { %v2493_v62 = vpop.f32.mrf.mxu1 }
 0x264   : > { %6655 = vst [vmem:[#allocation5_spill] sm:$0xff] %v6396_v37  ;;  %v3492_v51 = vpop.f32.mrf.mxu0  ;;  %v6399_v39 = vadd.f32 %v5335_v43, %v2538_v32  ;;  %v2536_v45 = vadd.f32 %v2493_v62, %v6306_v33 }
 0x265   : > { %v5288_v63 = vpop.f32.mrf.mxu1 }
 0x266   : > { %v6402_v60 = vpop.f32.mrf.mxu0  ;;  %v6404_v59 = vadd.f32 %v2863_v54, %v2536_v45  ;;  %v2539_v46 = vadd.f32 %v5288_v63, %v6309_v10 }
 0x267   : > { %v2496_v9 = vpop.f32.mrf.mxu1 }
 0x268   : > { %v6407_v23 = vpop.f32.mrf.mxu0  ;;  %v6409_v12 = vadd.f32 %v5336_v61, %v2539_v46  ;;  %v2537_v40 = vadd.f32 %v2496_v9, %v6312_v53 }
 0x269   : > { %v5355_v44 = vpop.f32.mrf.mxu1 }
 0x26a   : > { %6656 = vst [vmem:[#allocation6_spill] sm:$0xff] %v6409_v12  ;;  %v5407_v25 = vpop.f32.mrf.mxu0  ;;  %v6412_v17 = vadd.f32 %v2866_v3, %v2537_v40  ;;  %v3251_v33 = vadd.f32 %v5355_v44, %v6315_v13 }
 0x26b   : > { %v3122_v26 = vpop.f32.mrf.mxu1 }
 0x26c   : > { %6657 = vst [vmem:[#allocation7_spill] sm:$0xff] %v6412_v17  ;;  %v3508_v27 = vpop.f32.mrf.mxu0  ;;  %v6415_v52 = vadd.f32 %v5403_v0, %v3251_v33  ;;  %v3249_v16 = vadd.f32 %v3122_v26, %v6318_v24 }
 0x26d   : > { %v6418_v10 = vpop.f32.mrf.mxu1 }
 0x26e   : > { %v6420_v43 = vpop.f32.mrf.mxu0  ;;  %v6422_v36 = vadd.f32 %v3492_v51, %v3249_v16 }
 0x26f   : > { %v6424_v21 = vpop.f32.mrf.mxu1 }
 0x270   : > { %v6426_v53 = vpop.f32.mrf.mxu0 }
 0x271   : > { %v5359_v54 = vpop.f32.mrf.mxu1 }
 0x272   : > { %v5411_v57 = vpop.f32.mrf.mxu0  ;;  %v3255_v13 = vadd.f32 %v5359_v54, %v6327_v42 }
 0x273   : > { %v3138_v41 = vpop.f32.mrf.mxu1 }
 0x274   : > { %v3524_v61 = vpop.f32.mrf.mxu0  ;;  %v6429_v4 = vadd.f32 %v5407_v25, %v3255_v13  ;;  %v3253_v24 = vadd.f32 %v3138_v41, %v6330_v11 }
 0x275   : > { %v6432_v47 = vpop.f32.mrf.mxu1 }
 0x276   : > { %v6434_v3 = vpop.f32.mrf.mxu0  ;;  %v6436_v7 = vadd.f32 %v3508_v27, %v3253_v24 }
 0x277   : > { %v6438_v49 = vpop.f32.mrf.mxu1 }
 0x278   : > { %v6440_v0 = vpop.f32.mrf.mxu0 }
 0x279   : > { %v5363_v32 = vpop.f32.mrf.mxu1 }
 0x27a   : > { %v5415_v62 = vpop.f32.mrf.mxu0  ;;  %v3259_v42 = vadd.f32 %v5363_v32, %v6339_v38 }
 0x27b   : > { %v3154_v51 = vpop.f32.mrf.mxu1 }
 0x27c   : > { %v3540_v45 = vpop.f32.mrf.mxu0  ;;  %v6443_v63 = vadd.f32 %v5411_v57, %v3259_v42  ;;  %v3257_v11 = vadd.f32 %v3154_v51, %v6342_v5 }
 0x27d   : > { %v6446_v46 = vpop.f32.mrf.mxu1 }
 0x27e   : > { %v6448_v9 = vpop.f32.mrf.mxu0  ;;  %v6450_v40 = vadd.f32 %v3524_v61, %v3257_v11 }
 0x27f   : > { %v6452_v44 = vpop.f32.mrf.mxu1 }
 0x280   : > { %v6454_v25 = vpop.f32.mrf.mxu0 }
 0x281   : > { %v5367_v33 = vpop.f32.mrf.mxu1 }
 0x282   : > { %v5419_v26 = vpop.f32.mrf.mxu0  ;;  %v3263_v38 = vadd.f32 %v5367_v33, %v6351_v28 }
 0x283   : > { %v3170_v27 = vpop.f32.mrf.mxu1 }
 0x284   : > { %v3556_v16 = vpop.f32.mrf.mxu0  ;;  %v6457_v54 = vadd.f32 %v5415_v62, %v3263_v38  ;;  %v3261_v5 = vadd.f32 %v3170_v27, %v6354_v22 }
 0x285   : > { %v6460_v57 = vpop.f32.mrf.mxu1 }
 0x286   : > { %v6462_v13 = vpop.f32.mrf.mxu0  ;;  %v6464_v41 = vadd.f32 %v3540_v45, %v3261_v5 }
 0x287   : > { %v6466_v61 = vpop.f32.mrf.mxu1 }
 0x288   : > { %v6468_v24 = vpop.f32.mrf.mxu0 }
 0x289   : > { %v5371_v32 = vpop.f32.mrf.mxu1 }
 0x28a   : > { %v5423_v42 = vpop.f32.mrf.mxu0  ;;  %v3267_v28 = vadd.f32 %v5371_v32, %v6363_v50 }
 0x28b   : > { %v3186_v51 = vpop.f32.mrf.mxu1 }
 0x28c   : > { %v3572_v11 = vpop.f32.mrf.mxu0  ;;  %v6471_v62 = vadd.f32 %v5419_v26, %v3267_v28  ;;  %v3265_v22 = vadd.f32 %v3186_v51, %v6366_v14 }
 0x28d   : > { %v6474_v33 = vpop.f32.mrf.mxu1 }
 0x28e   : > { %v6476_v38 = vpop.f32.mrf.mxu0  ;;  %v6478_v45 = vadd.f32 %v3556_v16, %v3265_v22 }
 0x28f   : > { %6658 = vst [vmem:[#allocation8_spill] sm:$0xff] %v6476_v38  ;;  %v6480_v27 = vpop.f32.mrf.mxu1 }
 0x290   : > { %v6482_v5 = vpop.f32.mrf.mxu0 }
 0x291   : > { %6659 = vst [vmem:[#allocation9_spill] sm:$0xff] %v6482_v5  ;;  %v5375_v17 = vpop.f32.mrf.mxu1 }
 0x292   : > { %v5427_v12 = vpop.f32.mrf.mxu0  ;;  %v3271_v50 = vadd.f32 %v5375_v17, %v6375_v55 }
 0x293   : > { %v3202_v32 = vpop.f32.mrf.mxu1 }
 0x294   : > { %v3588_v37 = vpop.f32.mrf.mxu0  ;;  %v6485_v26 = vadd.f32 %v5423_v42, %v3271_v50  ;;  %v3269_v14 = vadd.f32 %v3202_v32, %v6378_v2 }
 0x295   : > { %v6488_v28 = vpop.f32.mrf.mxu1 }
 0x296   : > { %6660 = vst [vmem:[#allocation10_spill] sm:$0xff] %v6485_v26  ;;  %v6490_v51 = vpop.f32.mrf.mxu0  ;;  %v6492_v16 = vadd.f32 %v3572_v11, %v3269_v14 }
 0x297   : > { %6661 = vst [vmem:[#allocation11_spill] sm:$0xff] %v6490_v51  ;;  %v6494_v22 = vpop.f32.mrf.mxu1 }
 0x298   : > { %v6496_v19 = vpop.f32.mrf.mxu0 }
 0x299   : > { %6662 = vst [vmem:[#allocation12_spill] sm:$0xff] %v6496_v19  ;;  %v5379_v5 = vpop.f32.mrf.mxu1 }
 0x29a   : > { %v5431_v38 = vpop.f32.mrf.mxu0  ;;  %v3275_v55 = vadd.f32 %v5379_v5, %v6387_v29  ;;  %v3252_v29 = vadd.f32 %v6418_v10, %v6321_v56  ;;  %v6525_v56 = vld [vmem:[%s6652_s4] ss:$0 sm:$0xff] }
 0x29b   : > { %v3218_v17 = vpop.f32.mrf.mxu1 }
 0x29c   : > { %v3604_v42 = vpop.f32.mrf.mxu0  ;;  %v6499_v50 = vadd.f32 %v5427_v12, %v3275_v55  ;;  %v3273_v2 = vadd.f32 %v3218_v17, %v6390_v35  ;;  %v3250_v35 = vadd.f32 %v6424_v21, %v6324_v8 }
 0x29d   : > { %v6502_v32 = vpop.f32.mrf.mxu1 }
 0x29e   : > { %v6504_v26 = vpop.f32.mrf.mxu0  ;;  %v6506_v11 = vadd.f32 %v3588_v37, %v3273_v2 }
 0x29f   : > { %6663 = vst [vmem:[#allocation13_spill] sm:$0xff] %v6504_v26  ;;  %v6509_v14 = vpop.f32.mrf.mxu1 }
 0x2a0   : > { %v6511_v19 = vpop.f32.mrf.mxu0 }
 0x2a1   : > { %6664 = vst [vmem:[#allocation14_spill] sm:$0xff] %v6511_v19  ;;  %v5383_v5 = vpop.f32.mrf.mxu1  ;;  %v3622_v19 = vadd.f32 %v6402_v60, %v3252_v29 }
 0x2a2   : > { %v5451_v51 = vpop.f32.mrf.mxu0  ;;  %v3279_v12 = vadd.f32 %v5383_v5, %v6399_v39 }
 0x2a3   : > { %v3234_v55 = vpop.f32.mrf.mxu1  ;;  %v3991_v37 = vadd.f32 %v5451_v51, %v6415_v52  ;;  %v3620_v52 = vadd.f32 %v6407_v23, %v3250_v35  ;;  %v3254_v23 = vadd.f32 %v6438_v49, %v6336_v30 }
 0x2a4   : > { %v3862_v17 = vpop.f32.mrf.mxu0  ;;  %v6519_v2 = vadd.f32 %v5431_v38, %v3279_v12  ;;  %v3277_v26 = vadd.f32 %v3234_v55, %v6404_v59  ;;  %v3256_v12 = vadd.f32 %v6432_v47, %v6333_v20 }
 0x2a5   : > { %v3989_v10 = vadd.f32 %v3862_v17, %v6422_v36  ;;  %v6529_v8 = vpop.f32.mrf.mxu1  ;;  %v4094_v59 = vadd.f32 %v6525_v56, %v3991_v37 }
 0x2a6   : > { %v5452_v39 = vpop.f32.mrf.mxu0  ;;  %v6532_v21 = vadd.f32 %v3604_v42, %v3277_v26  ;;  %v3626_v17 = vadd.f32 %v6420_v43, %v3256_v12  ;;  %v3260_v43 = vadd.f32 %v6446_v46, %v6345_v58 }
 0x2a7   : > { %v6534_v38 = vpop.f32.mrf.mxu1  ;;  %v3992_v51 = vadd.f32 %v5452_v39, %v3622_v19  ;;  %v4092_v36 = vadd.f32 %v6525_v56, %v3989_v10  ;;  %v4126_v35 = vmax.f32 %v4094_v59, 0.0  ;;  %v3624_v10 = vadd.f32 %v6426_v53, %v3254_v23 }
 0x2a8   : > { %v3865_v5 = vpop.f32.mrf.mxu0  ;;  %v3630_v46 = vadd.f32 %v6434_v3, %v3260_v43 }
 0x2a9   : > { %v3990_v60 = vadd.f32 %v3865_v5, %v3620_v52  ;;  %v5455_v29 = vpop.f32.mrf.mxu1  ;;  %v4095_v55 = vadd.f32 %v6525_v56, %v3992_v51  ;;  %v4124_v20 = vmax.f32 %v4092_v36, 0.0  ;;  %v3258_v36 = vadd.f32 %v6452_v44, %v6348_v34 }
 0x2aa   : > { %v3995_v26 = vadd.f32 %v5455_v29, %v6429_v4 }
 0x2ab   : > { %v4093_v42 = vadd.f32 %v6525_v56, %v3990_v60  ;;  %v3878_v19 = vpop.f32.mrf.mxu1  ;;  %v4127_v37 = vmax.f32 %v4095_v55, 0.0 }
 0x2ac   : > { %v3993_v47 = vadd.f32 %v3878_v19, %v6436_v7  ;;  %v4098_v39 = vadd.f32 %v6525_v56, %v3995_v26 }
 0x2ad   : > { %v4125_v30 = vmax.f32 %v4093_v42, 0.0  ;;  %v4692_v49 = vpack.c.bf16 %v4127_v37, %v4126_v35  ;;  %v5456_v4 = vpop.f32.mrf.mxu1 }
 0x2ae   : > { %v3996_v52 = vadd.f32 %v5456_v4, %v3626_v17  ;;  %v4096_v51 = vadd.f32 %v6525_v56, %v3993_v47  ;;  %v4130_v60 = vmax.f32 %v4098_v39, 0.0  ;;  %v3628_v17 = vadd.f32 %v6440_v0, %v3258_v36 }
 0x2af   : > { %v4687_v59 = vpack.c.bf16 %v4125_v30, %v4124_v20  ;;  %4764 = vst [vmem:[%s6550_s17 + $0x8] sm:$0xff] %v4692_v49   ;;  %v3881_v7 = vpop.f32.mrf.mxu1  ;;  %v3264_v47 = vadd.f32 %v6460_v57, %v6357_v6 }
 0x2b0   : > { %v4099_v5 = vadd.f32 %v6525_v56, %v3996_v52  ;;  %v3994_v12 = vadd.f32 %v3881_v7, %v3624_v10  ;;  %v4128_v26 = vmax.f32 %v4096_v51, 0.0 }
 0x2b1   : > { %4688 = vst [vmem:[%s6550_s17] sm:$0xff] %v4687_v59   ;;  %v5459_v53 = vpop.f32.mrf.mxu1  ;;  %v3634_v6 = vadd.f32 %v6448_v9, %v3264_v47 }
 0x2b2   : > { %v4131_v29 = vmax.f32 %v4099_v5, 0.0  ;;  %v4097_v55 = vadd.f32 %v6525_v56, %v3994_v12  ;;  %v3999_v58 = vadd.f32 %v5459_v53, %v6443_v63  ;;  %v3268_v53 = vadd.f32 %v6474_v33, %v6369_v31 }
 0x2b3   : > { %v3894_v23 = vpop.f32.mrf.mxu1 }
 0x2b4   : > { %v4702_v42 = vpack.c.bf16 %v4131_v29, %v4130_v60  ;;  %v4129_v35 = vmax.f32 %v4097_v55, 0.0  ;;  %v3997_v19 = vadd.f32 %v3894_v23, %v6450_v40  ;;  %v4102_v44 = vadd.f32 %v6525_v56, %v3999_v58 }
 0x2b5   : > { %v5460_v37 = vpop.f32.mrf.mxu1  ;;  %v3262_v40 = vadd.f32 %v6466_v61, %v6360_v15  ;;  %v3638_v31 = vadd.f32 %v6462_v13, %v3268_v53 }
 0x2b6   : > { %4766 = vst [vmem:[%s6550_s17 + $0x18] sm:$0xff] %v4702_v42   ;;  %v4697_v34 = vpack.c.bf16 %v4129_v35, %v4128_v26  ;;  %v4000_v20 = vadd.f32 %v5460_v37, %v3630_v46  ;;  %v4100_v3 = vadd.f32 %v6525_v56, %v3997_v19  ;;  %v4134_v4 = vmax.f32 %v4102_v44, 0.0 }
 0x2b7   : > { %v3897_v63 = vpop.f32.mrf.mxu1  ;;  %v3632_v12 = vadd.f32 %v6454_v25, %v3262_v40  ;;  %v3272_v44 = vadd.f32 %v6488_v28, %v6381_v1  ;;  %v6666_v1 = vld [vmem:[#allocation8_spill] sm:$0xff] }
 0x2b8   : > { %4765 = vst [vmem:[%s6550_s17 + $0x10] sm:$0xff] %v4697_v34   ;;  %v4103_v30 = vadd.f32 %v6525_v56, %v4000_v20  ;;  %v3998_v49 = vadd.f32 %v3897_v63, %v3628_v17  ;;  %v4132_v59 = vmax.f32 %v4100_v3, 0.0 }
 0x2b9   : > { %v5463_v0 = vpop.f32.mrf.mxu1  ;;  %v3642_v28 = vadd.f32 %v6666_v1, %v3272_v44  ;;  %v6675_v1 = vld [vmem:[#allocation14_spill] sm:$0xff] }
 0x2ba   : > { %v4135_v10 = vmax.f32 %v4103_v30, 0.0  ;;  %v4101_v39 = vadd.f32 %v6525_v56, %v3998_v49  ;;  %v4003_v52 = vadd.f32 %v5463_v0, %v6457_v54  ;;  %v6665_v49 = vld [vmem:[#allocation10_spill] sm:$0xff] }
 0x2bb   : > { %v3910_v57 = vpop.f32.mrf.mxu1 }
 0x2bc   : > { %v4712_v43 = vpack.c.bf16 %v4135_v10, %v4134_v4  ;;  %v4133_v7 = vmax.f32 %v4101_v39, 0.0  ;;  %v4001_v51 = vadd.f32 %v3910_v57, %v6464_v41  ;;  %v4106_v61 = vadd.f32 %v6525_v56, %v4003_v52  ;;  %v6667_v57 = vld [vmem:[#allocation9_spill] sm:$0xff] }
 0x2bd   : > { %v5464_v5 = vpop.f32.mrf.mxu1  ;;  %v3266_v41 = vadd.f32 %v6480_v27, %v6372_v48 }
 0x2be   : > { %4768 = vst [vmem:[%s6550_s17 + $0x28] sm:$0xff] %v4712_v43   ;;  %v4707_v15 = vpack.c.bf16 %v4133_v7, %v4132_v59  ;;  %v4004_v36 = vadd.f32 %v5464_v5, %v3634_v6  ;;  %v4104_v9 = vadd.f32 %v6525_v56, %v4001_v51  ;;  %v4138_v55 = vmax.f32 %v4106_v61, 0.0  ;;  %v6668_v7 = vld [vmem:[#allocation4_spill] sm:$0xff] }
 0x2bf   : > { %v3913_v54 = vpop.f32.mrf.mxu1  ;;  %v3636_v17 = vadd.f32 %v6468_v24, %v3266_v41  ;;  %v3276_v51 = vadd.f32 %v6502_v32, %v6668_v7  ;;  %v6670_v32 = vld [vmem:[#allocation11_spill] sm:$0xff] }
 0x2c0   : > { %4767 = vst [vmem:[%s6550_s17 + $0x20] sm:$0xff] %v4707_v15   ;;  %v4107_v60 = vadd.f32 %v6525_v56, %v4004_v36  ;;  %v4002_v29 = vadd.f32 %v3913_v54, %v3632_v12  ;;  %v4136_v26 = vmax.f32 %v4104_v9, 0.0 }
 0x2c1   : > { %v5467_v25 = vpop.f32.mrf.mxu1  ;;  %v3646_v41 = vadd.f32 %v6670_v32, %v3276_v51 }
 0x2c2   : > { %v4139_v58 = vmax.f32 %v4107_v60, 0.0  ;;  %v4105_v46 = vadd.f32 %v6525_v56, %v4002_v29  ;;  %v4007_v23 = vadd.f32 %v5467_v25, %v6471_v62 }
 0x2c3   : > { %v3926_v33 = vpop.f32.mrf.mxu1 }
 0x2c4   : > { %v4722_v42 = vpack.c.bf16 %v4139_v58, %v4138_v55  ;;  %v4137_v35 = vmax.f32 %v4105_v46, 0.0  ;;  %v4005_v19 = vadd.f32 %v3926_v33, %v6478_v45  ;;  %v4110_v27 = vadd.f32 %v6525_v56, %v4007_v23  ;;  %v6671_v33 = vld [vmem:[#allocation12_spill] sm:$0xff] }
 0x2c5   : > { %v5468_v37 = vpop.f32.mrf.mxu1  ;;  %v3270_v45 = vadd.f32 %v6494_v22, %v6384_v18 }
 0x2c6   : > { %4770 = vst [vmem:[%s6550_s17 + $0x38] sm:$0xff] %v4722_v42   ;;  %v4717_v48 = vpack.c.bf16 %v4137_v35, %v4136_v26  ;;  %v4008_v34 = vadd.f32 %v5468_v37, %v3638_v31  ;;  %v4108_v13 = vadd.f32 %v6525_v56, %v4005_v19  ;;  %v4142_v63 = vmax.f32 %v4110_v27, 0.0  ;;  %v6672_v19 = vld [vmem:[#allocation6_spill] sm:$0xff] }
 0x2c7   : > { %v3929_v62 = vpop.f32.mrf.mxu1  ;;  %v3640_v59 = vadd.f32 %v6667_v57, %v3270_v45  ;;  %v3280_v37 = vadd.f32 %v6529_v8, %v6672_v19  ;;  %v6674_v8 = vld [vmem:[#allocation13_spill] sm:$0xff] }
 0x2c8   : > { %4769 = vst [vmem:[%s6550_s17 + $0x30] sm:$0xff] %v4717_v48   ;;  %v4111_v20 = vadd.f32 %v6525_v56, %v4008_v34  ;;  %v4006_v47 = vadd.f32 %v3929_v62, %v3636_v17  ;;  %v4140_v4 = vmax.f32 %v4108_v13, 0.0 }
 0x2c9   : > { %v5471_v24 = vpop.f32.mrf.mxu1  ;;  %v3650_v45 = vadd.f32 %v6674_v8, %v3280_v37 }
 0x2ca   : > { %v4143_v3 = vmax.f32 %v4111_v20, 0.0  ;;  %v4109_v30 = vadd.f32 %v6525_v56, %v4006_v47  ;;  %v4011_v40 = vadd.f32 %v5471_v24, %v6665_v49 }
 0x2cb   : > { %v3942_v0 = vpop.f32.mrf.mxu1 }
 0x2cc   : > { %v4732_v10 = vpack.c.bf16 %v4143_v3, %v4142_v63  ;;  %v4141_v39 = vmax.f32 %v4109_v30, 0.0  ;;  %v4009_v52 = vadd.f32 %v3942_v0, %v6492_v16  ;;  %v4114_v22 = vadd.f32 %v6525_v56, %v4011_v40  ;;  %v6669_v16 = vld [vmem:[#allocation5_spill] sm:$0xff] }
 0x2cd   : > { %v5472_v6 = vpop.f32.mrf.mxu1  ;;  %v3274_v36 = vadd.f32 %v6509_v14, %v6669_v16 }
 0x2ce   : > { %4772 = vst [vmem:[%s6550_s17 + $0x48] sm:$0xff] %v4732_v10   ;;  %v4727_v18 = vpack.c.bf16 %v4141_v39, %v4140_v4  ;;  %v4012_v43 = vadd.f32 %v5472_v6, %v3642_v28  ;;  %v4112_v12 = vadd.f32 %v6525_v56, %v4009_v52  ;;  %v4146_v54 = vmax.f32 %v4114_v22, 0.0 }
 0x2cf   : > { %v3945_v5 = vpop.f32.mrf.mxu1  ;;  %v3644_v26 = vadd.f32 %v6671_v33, %v3274_v36 }
 0x2d0   : > { %4771 = vst [vmem:[%s6550_s17 + $0x40] sm:$0xff] %v4727_v18   ;;  %v4115_v15 = vadd.f32 %v6525_v56, %v4012_v43  ;;  %v4010_v61 = vadd.f32 %v3945_v5, %v3640_v59  ;;  %v4144_v55 = vmax.f32 %v4112_v12, 0.0 }
 0x2d1   : > { %v5475_v53 = vpop.f32.mrf.mxu1 }
 0x2d2   : > { %v4147_v9 = vmax.f32 %v4115_v15, 0.0  ;;  %v4113_v60 = vadd.f32 %v6525_v56, %v4010_v61  ;;  %v4015_v29 = vadd.f32 %v5475_v53, %v6499_v50 }
 0x2d3   : > { %v3958_v25 = vpop.f32.mrf.mxu1 }
 0x2d4   : > { %v4742_v58 = vpack.c.bf16 %v4147_v9, %v4146_v54  ;;  %v4145_v46 = vmax.f32 %v4113_v60, 0.0  ;;  %v4013_v23 = vadd.f32 %v3958_v25, %v6506_v11  ;;  %v4118_v42 = vadd.f32 %v6525_v56, %v4015_v29  ;;  %v6673_v11 = vld [vmem:[#allocation7_spill] sm:$0xff] }
 0x2d5   : > { %v5476_v31 = vpop.f32.mrf.mxu1  ;;  %v3278_v34 = vadd.f32 %v6534_v38, %v6673_v11 }
 0x2d6   : > { %4774 = vst [vmem:[%s6550_s17 + $0x58] sm:$0xff] %v4742_v58   ;;  %v4737_v14 = vpack.c.bf16 %v4145_v46, %v4144_v55  ;;  %v4016_v35 = vadd.f32 %v5476_v31, %v3646_v41  ;;  %v4116_v17 = vadd.f32 %v6525_v56, %v4013_v23  ;;  %v4150_v62 = vmax.f32 %v4118_v42, 0.0 }
 0x2d7   : > { %v3961_v50 = vpop.f32.mrf.mxu1  ;;  %v3648_v28 = vadd.f32 %v6675_v1, %v3278_v34 }
 0x2d8   : > { %4773 = vst [vmem:[%s6550_s17 + $0x50] sm:$0xff] %v4737_v14   ;;  %v4119_v48 = vadd.f32 %v6525_v56, %v4016_v35  ;;  %v4014_v27 = vadd.f32 %v3961_v50, %v3644_v26  ;;  %v4148_v63 = vmax.f32 %v4116_v17, 0.0 }
 0x2d9   : > { %v5479_v44 = vpop.f32.mrf.mxu1 }
 0x2da   : > { %v4151_v13 = vmax.f32 %v4119_v48, 0.0  ;;  %v4117_v20 = vadd.f32 %v6525_v56, %v4014_v27  ;;  %v4019_v47 = vadd.f32 %v5479_v44, %v6519_v2 }
 0x2db   : > { %v3974_v24 = vpop.f32.mrf.mxu1 }
 0x2dc   : > { %v4752_v3 = vpack.c.bf16 %v4151_v13, %v4150_v62  ;;  %v4149_v30 = vmax.f32 %v4117_v20, 0.0  ;;  %v4017_v49 = vadd.f32 %v3974_v24, %v6532_v21  ;;  %v4122_v0 = vadd.f32 %v6525_v56, %v4019_v47 }
 0x2dd   : > { %v5480_v40 = vpop.f32.mrf.mxu1 }
 0x2de   : > { %4776 = vst [vmem:[%s6550_s17 + $0x68] sm:$0xff] %v4752_v3   ;;  %v4747_v38 = vpack.c.bf16 %v4149_v30, %v4148_v63  ;;  %v4020_v4 = vadd.f32 %v5480_v40, %v3650_v45  ;;  %v4120_v2 = vadd.f32 %v6525_v56, %v4017_v49  ;;  %v4154_v6 = vmax.f32 %v4122_v0, 0.0 }
 0x2df   : > { %v3977_v10 = vpop.f32.mrf.mxu1 }
 0x2e0   : > { %4775 = vst [vmem:[%s6550_s17 + $0x60] sm:$0xff] %v4747_v38   ;;  %v4123_v39 = vadd.f32 %v6525_v56, %v4020_v4  ;;  %v4018_v52 = vadd.f32 %v3977_v10, %v3648_v28  ;;  %v4152_v59 = vmax.f32 %v4120_v2, 0.0 }
 0x2e2   : > { %v4155_v57 = vmax.f32 %v4123_v39, 0.0  ;;  %v4121_v21 = vadd.f32 %v6525_v56, %v4018_v52 }
 0x2e4   : > { %v4762_v18 = vpack.c.bf16 %v4155_v57, %v4154_v6  ;;  %v4153_v22 = vmax.f32 %v4121_v21, 0.0 }
 0x2e6   : > { %4778 = vst [vmem:[%s6550_s17 + $0x78] sm:$0xff] %v4762_v18   ;;  %v4757_v43 = vpack.c.bf16 %v4153_v22, %v4152_v59 }
 0x2e8   : > { %4777 = vst [vmem:[%s6550_s17 + $0x70] sm:$0xff] %v4757_v43  }
 0x2e9 PF: > { %s15_s18 = sadd.s32 1, %s5603_s18  }
 0x2ea   : > { %p12_p5 = scmp.ge.s32.totalorder %s15_s18, 4  }
 0x2ec   :  { %14 = sbr.rel (!%p12_p5) target bundleno = 1 (0x1), region = 80 }

</bundles_post_ra>
